<compile_context>
chip_gen: v7x
topology: tpu7x:2x2x1
jax: 0.10.0
libtpu: 0.0.40
codegen_flags: <defaults>
</compile_context>

<pallas_src>
import functools

import jax
import jax.numpy as jnp
from jax.experimental import pallas as pl
from jax.experimental.pallas import tpu as pltpu


def _round_up(x, m):
    return ((x + m - 1) // m) * m


# ---------------------------------------------------------------------------
# VMEM budgeting (generation-aware: ~22 MiB footprint on v7x, ~45 MiB on
# v5e/v6e), and per-layer tile selection.
# ---------------------------------------------------------------------------
@functools.lru_cache(maxsize=None)
def _vmem_budget():
    try:
        cap = int(pltpu.get_tpu_info().vmem_capacity_bytes)
    except Exception:
        cap = 64 << 20                       # conservative: v7x per-core VMEM
    limit = min(cap // 2, 64 << 20)          # scoped VMEM requested from Mosaic
    budget = int(limit * 0.7)                # target for the pipeline footprint
    return budget, limit


def _pipeline_footprint(tm, tk, tn, cout, nk):
    nbuf = 3 if nk > 1 else 2                # Buffered(3) when K is split
    a = nbuf * tm * tk * 2                   # bf16 A tiles
    b = nbuf * tk * tn * 2                   # bf16 B tiles
    o = 2 * tm * cout * 2                    # bf16 output tiles
    acc = tm * tn * 4                        # f32 accumulator scratch
    shift = 2 * tn * 4                       # f32 shift row
    return a + b + o + acc + shift


def _choose_tiles(m_rows, K, Np, cout, budget):
    """tm large first (B re-read count = ceil(M/tm)), then tk large (overhead
    amortization / B-resident when tk == K).  tn is always the full Np."""
    tn = Np
    if m_rows < 128:
        tms = [m_rows]                       # already rounded to a multiple of 8
    else:
        tms = [t for t in (1024, 512, 384, 256, 128) if t <= m_rows] or [128]
    tks = [t for t in range(K, 0, -128) if K % t == 0]   # K is a multiple of 128
    for tm in tms:
        for tk in tks:
            if _pipeline_footprint(tm, tk, tn, cout, K // tk) <= budget:
                return tm, tk, tn
    return tms[-1], tks[-1], tn              # smallest tiles as a last resort


# ---------------------------------------------------------------------------
# Pallas kernel: K-tiled matmul, f32 accumulator initialized with the
# per-channel shift, fused LeakyReLU epilogue, narrow (cout-wide) writeback.
# ---------------------------------------------------------------------------
def _conv_matmul_kernel(a_ref, b_ref, shift_ref, o_ref, acc_ref, *,
                        negative_slope, cout):
    k = pl.program_id(1)

    @pl.when(k == 0)
    def _init():
        # shift folded into the accumulator init (review item): no epilogue add.
        acc_ref[...] = jnp.broadcast_to(shift_ref[...], acc_ref.shape)

    acc_ref[...] += jnp.dot(a_ref[...], b_ref[...],
                            preferred_element_type=jnp.float32)

    @pl.when(k == pl.num_programs(1) - 1)
    def _epilogue():
        y = acc_ref[...][:, :cout]           # drop the zero-padded N columns
        if negative_slope is not None:
            y = jnp.where(y >= 0.0, y, negative_slope * y)
        o_ref[...] = y.astype(o_ref.dtype)


def fused_conv_matmul(a, b, shift, *, cout, negative_slope,
                      out_dtype=jnp.bfloat16):
    """a: (M, K) bf16 im2col patches; b: (K, Np) bf16 (BN/bias scale folded,
    zero-padded columns); shift: (Np,) f32.  K and Np are multiples of 128.
    Returns (M, cout) in out_dtype (only the real output channels are written).
    """
    M, K = a.shape
    Kb, Np = b.shape
    assert K == Kb and K % 128 == 0 and Np % 128 == 0 and cout <= Np

    budget, vmem_limit = _vmem_budget()

    if M >= 128:
        m_rows = M                           # ragged last M block handled by Pallas
    else:
        m_rows = _round_up(M, 8)             # tiny case: pad a handful of rows
        if m_rows != M:
            a = jnp.pad(a, ((0, m_rows - M), (0, 0)))

    tm, tk, tn = _choose_tiles(m_rows, K, Np, cout, budget)
    nm = pl.cdiv(m_rows, tm)
    nk = K // tk

    # Deeper pipelining only when K is split across grid steps (review item).
    stream_kw = dict(pipeline_mode=pl.Buffered(3)) if nk > 1 else {}

    shift2 = shift.astype(jnp.float32).reshape(1, Np)

    out = pl.pallas_call(
        functools.partial(_conv_matmul_kernel,
                          negative_slope=negative_slope, cout=cout),
        out_shape=jax.ShapeDtypeStruct((m_rows, cout), out_dtype),
        grid_spec=pltpu.PrefetchScalarGridSpec(
            num_scalar_prefetch=0,
            grid=(nm, nk),
            in_specs=[
                pl.BlockSpec((tm, tk), lambda i, k: (i, k), **stream_kw),  # A
                pl.BlockSpec((tk, tn), lambda i, k: (k, 0), **stream_kw),  # B
                pl.BlockSpec((1, tn), lambda i, k: (0, 0)),                # shift
            ],
            out_specs=pl.BlockSpec((tm, cout), lambda i, k: (i, 0)),
            scratch_shapes=[pltpu.VMEM((tm, tn), jnp.float32)],
        ),
        compiler_params=pltpu.CompilerParams(
            dimension_semantics=("parallel", "arbitrary"),
            vmem_limit_bytes=vmem_limit),
    )(a, b, shift2)
    return out[:M] if m_rows != M else out


# ---------------------------------------------------------------------------
# JAX glue: channels-last im2col for Conv3d.  Columns ordered (kd, kh, kw, c);
# channel zero-pad to c_pad rides in the same jnp.pad as the spatial padding.
# TODO(synk): replace with an in-kernel tap-decomposed conv to remove the
# materialized patch matrix (top review item).
# ---------------------------------------------------------------------------
def im2col_3d_ndhwc(x, k, stride, pad, c_pad):
    N, D, H, W, C = x.shape
    xp = jnp.pad(x, ((0, 0), (pad, pad), (pad, pad), (pad, pad), (0, c_pad - C)))
    OD = (D + 2 * pad - k) // stride + 1
    OH = (H + 2 * pad - k) // stride + 1
    OW = (W + 2 * pad - k) // stride + 1
    cols = []
    for kd in range(k):
        for kh in range(k):
            for kw_ in range(k):
                cols.append(xp[
                    :,
                    kd: kd + stride * (OD - 1) + 1: stride,
                    kh: kh + stride * (OH - 1) + 1: stride,
                    kw_: kw_ + stride * (OW - 1) + 1: stride,
                    :,
                ])  # (N, OD, OH, OW, c_pad)
    A = jnp.stack(cols, axis=4)                          # (N, OD, OH, OW, k^3, c_pad)
    A = A.reshape(N * OD * OH * OW, k * k * k * c_pad)   # lane axis = (tap, c)
    return A, (OD, OH, OW)


# ---------------------------------------------------------------------------
# NLayerDiscriminator: parameter construction + forward
# ---------------------------------------------------------------------------
def build_discriminator_params(key, input_nc, ndf=64, n_layers=3):
    kw = 4
    eps = 1e-5
    # (cin, cout, stride, has_bias, has_bn, leaky_slope) — mirrors the PyTorch module
    cfgs = [(input_nc, ndf, 2, True, False, 0.2)]
    nf_mult = 1
    for n in range(1, n_layers):
        nf_prev, nf_mult = nf_mult, min(2 ** n, 8)
        cfgs.append((ndf * nf_prev, ndf * nf_mult, 2, False, True, 0.2))
    nf_prev, nf_mult = nf_mult, min(2 ** n_layers, 8)
    cfgs.append((ndf * nf_prev, ndf * nf_mult, 1, False, True, 0.2))
    cfgs.append((ndf * nf_mult, 1, 1, True, False, None))

    params = []
    for (cin, cout, stride, has_bias, has_bn, act) in cfgs:
        key, k1, k2, k3, k4 = jax.random.split(key, 5)
        w = 0.02 * jax.random.normal(k1, (cout, cin, kw, kw, kw), jnp.float32)
        if has_bn:
            gamma = 1.0 + 0.02 * jax.random.normal(k2, (cout,), jnp.float32)
            beta = 0.02 * jax.random.normal(k3, (cout,), jnp.float32)
            # eval-mode BatchNorm3d (running stats 0, 1) folded to per-channel affine
            scale = gamma / jnp.sqrt(1.0 + eps)
            shift = beta
        else:
            bias = (0.02 * jax.random.normal(k4, (cout,), jnp.float32)
                    if has_bias else jnp.zeros((cout,), jnp.float32))
            scale = jnp.ones((cout,), jnp.float32)
            shift = bias

        c_pad = _round_up(cin, 2)        # k^3 * c_pad is then a multiple of 128
        n_pad = _round_up(cout, 128)     # lane-dense B columns (kernel writes cout)
        # Fold scale into the (linear) conv weight, reorder to im2col column
        # order (kd, kh, kw, cin), zero-pad cin/cout, cast to bf16 for the MXU.
        w_eff = w * scale[:, None, None, None, None]
        w_eff = jnp.transpose(w_eff, (2, 3, 4, 1, 0))          # (kd, kh, kw, cin, cout)
        w_eff = jnp.pad(w_eff, ((0, 0),) * 3 + ((0, c_pad - cin), (0, n_pad - cout)))
        B = w_eff.reshape(kw * kw * kw * c_pad, n_pad).astype(jnp.bfloat16)
        shift_p = jnp.pad(shift, (0, n_pad - cout)).astype(jnp.float32)

        params.append(dict(B=B, shift=shift_p, stride=stride, act=act,
                           cout=cout, c_pad=c_pad))
    return params


def discriminator_forward(x_ncdhw, params, use_sigmoid=False):
    """x: (N, C, D, H, W) float32 -> (N, 1, D', H', W') float32."""
    kw, pad = 4, 2          # padw = ceil((kw - 1) / 2) = 2, as in the PyTorch spec
    n = x_ncdhw.shape[0]
    # channels-last bf16 activations between layers (lane-dense, half the HBM)
    x = jnp.transpose(x_ncdhw, (0, 2, 3, 4, 1)).astype(jnp.bfloat16)
    for p in params:
        A, (od, oh, ow) = im2col_3d_ndhwc(x, kw, p["stride"], pad, p["c_pad"])
        O = fused_conv_matmul(A, p["B"], p["shift"], cout=p["cout"],
                              negative_slope=p["act"], out_dtype=jnp.bfloat16)
        x = O.reshape(n, od, oh, ow, p["cout"])   # no channel-slice copy needed
    out = jnp.transpose(x, (0, 4, 1, 2, 3)).astype(jnp.float32)   # back to NCDHW
    if use_sigmoid:
        out = jax.nn.sigmoid(out)
    return out


if __name__ == "__main__":
    key = jax.random.PRNGKey(0)
    k_param, k_in = jax.random.split(key)

    # small but structurally faithful: input_nc=1, ndf=8, n_layers=3
    input_nc, ndf, n_layers = 1, 8, 3
    params = build_discriminator_params(k_param, input_nc=input_nc, ndf=ndf,
                                        n_layers=n_layers)

    x = jax.random.normal(k_in, (2, input_nc, 8, 8, 8), jnp.float32)  # NCDHW

    fwd = jax.jit(lambda inp: discriminator_forward(inp, params, use_sigmoid=False))
    out = jax.block_until_ready(fwd(x))

    # expected spatial chain: 8 -> 5 -> 3 -> 2 -> 3 -> 4, single output channel
    assert out.shape == (2, 1, 4, 4, 4), out.shape
    assert out.dtype == jnp.float32
    assert bool(jnp.all(jnp.isfinite(out)))
    print("KERNEL_OK")
</pallas_src>

<mosaic_0001>
module attributes {stable_mosaic.version = 11 : i64} {
  func.func @_conv_matmul_kernel(%arg0: i32, %arg1: i32, %arg2: memref<128x128xbf16, #tpu.memory_space<vmem>>, %arg3: memref<128x128xbf16, #tpu.memory_space<vmem>>, %arg4: memref<1x128xf32, #tpu.memory_space<vmem>>, %arg5: memref<128x8xbf16, #tpu.memory_space<vmem>>, %arg6: memref<128x128xf32, #tpu.memory_space<vmem>>) attributes {dimension_semantics = [#tpu.dimension_semantics<parallel>, #tpu.dimension_semantics<arbitrary>], iteration_bounds = array<i64: 2, 1>, scalar_prefetch = 0 : i64, scratch_operands = 1 : i64, tpu.core_type = #tpu.core_type<tc>, window_params = [{transform_indices = @transform_0, window_bounds = array<i64: 128, 128>}, {transform_indices = @transform_1, window_bounds = array<i64: 128, 128>}, {pipeline_mode = #tpu.pipeline_mode<synchronous>, transform_indices = @transform_2, window_bounds = array<i64: 1, 128>}, {transform_indices = @transform_3, window_bounds = array<i64: 128, 8>}]} {
    %c0_i32 = arith.constant 0 : i32
    %0 = arith.cmpi eq, %arg1, %c0_i32 : i32
    %1 = arith.extui %0 : i1 to i32
    %c0_i32_0 = arith.constant 0 : i32
    %2 = arith.cmpi ne, %1, %c0_i32_0 : i32
    scf.if %2 {
      %c0_10 = arith.constant 0 : index
      %c0_11 = arith.constant 0 : index
      %12 = vector.load %arg4[%c0_10, %c0_11] : memref<1x128xf32, #tpu.memory_space<vmem>>, vector<1x128xf32>
      %13 = vector.shape_cast %12 : vector<1x128xf32> to vector<1x128xf32>
      %14 = vector.broadcast %13 : vector<1x128xf32> to vector<128x128xf32>
      %c0_12 = arith.constant 0 : index
      %c0_13 = arith.constant 0 : index
      %15 = vector.load %arg6[%c0_12, %c0_13] : memref<128x128xf32, #tpu.memory_space<vmem>>, vector<128x128xf32>
      tpu.vector_store %arg6[%c0_12, %c0_13], %14 {strides = array<i32>} : memref<128x128xf32, #tpu.memory_space<vmem>>, vector<128x128xf32>,
    } else {
    }
    %c0 = arith.constant 0 : index
    %c0_1 = arith.constant 0 : index
    %3 = vector.load %arg6[%c0, %c0_1] : memref<128x128xf32, #tpu.memory_space<vmem>>, vector<128x128xf32>
    %c0_2 = arith.constant 0 : index
    %c0_3 = arith.constant 0 : index
    %4 = vector.load %arg2[%c0_2, %c0_3] : memref<128x128xbf16, #tpu.memory_space<vmem>>, vector<128x128xbf16>
    %c0_4 = arith.constant 0 : index
    %c0_5 = arith.constant 0 : index
    %5 = vector.load %arg3[%c0_4, %c0_5] : memref<128x128xbf16, #tpu.memory_space<vmem>>, vector<128x128xbf16>
    %cst = arith.constant dense<0.000000e+00> : vector<128x128xf32>
    %6 = tpu.matmul %4, %5, %cst {dimension_numbers = #tpu.dot_dimension_numbers<[1], [0], [0], [1], [0, 0, 1, 1], [], []>} : vector<128x128xbf16>, vector<128x128xbf16>, vector<128x128xf32> -> vector<128x128xf32>
    %7 = arith.addf %3, %6 : vector<128x128xf32>
    %c0_6 = arith.constant 0 : index
    %c0_7 = arith.constant 0 : index
    %8 = vector.load %arg6[%c0_6, %c0_7] : memref<128x128xf32, #tpu.memory_space<vmem>>, vector<128x128xf32>
    tpu.vector_store %arg6[%c0_6, %c0_7], %7 {strides = array<i32>} : memref<128x128xf32, #tpu.memory_space<vmem>>, vector<128x128xf32>,
    %c0_i32_8 = arith.constant 0 : i32
    %9 = arith.cmpi eq, %arg1, %c0_i32_8 : i32
    %10 = arith.extui %9 : i1 to i32
    %c0_i32_9 = arith.constant 0 : i32
    %11 = arith.cmpi ne, %10, %c0_i32_9 : i32
    scf.if %11 {
      %c0_10 = arith.constant 0 : index
      %c0_11 = arith.constant 0 : index
      %12 = vector.load %arg6[%c0_10, %c0_11] : memref<128x128xf32, #tpu.memory_space<vmem>>, vector<128x128xf32>
      %13 = vector.extract_strided_slice %12 {offsets = [0, 0], sizes = [128, 8], strides = [1, 1]} : vector<128x128xf32> to vector<128x8xf32>
      %cst_12 = arith.constant 0.000000e+00 : f32
      %14 = vector.broadcast %cst_12 : f32 to vector<128x8xf32>
      %15 = arith.cmpf oge, %13, %14 : vector<128x8xf32>
      %cst_13 = arith.constant 2.000000e-01 : f32
      %16 = vector.broadcast %cst_13 : f32 to vector<128x8xf32>
      %17 = arith.mulf %16, %13 : vector<128x8xf32>
      %18 = arith.select %15, %13, %17 : vector<128x8xi1>, vector<128x8xf32>
      %19 = arith.truncf %18 : vector<128x8xf32> to vector<128x8xbf16>
      %c0_14 = arith.constant 0 : index
      %c0_15 = arith.constant 0 : index
      %20 = vector.load %arg5[%c0_14, %c0_15] : memref<128x8xbf16, #tpu.memory_space<vmem>>, vector<128x8xbf16>
      tpu.vector_store %arg5[%c0_14, %c0_15], %19 {strides = array<i32>} : memref<128x8xbf16, #tpu.memory_space<vmem>>, vector<128x8xbf16>,
    } else {
    }
    return
  }
  func.func @transform_0(%arg0: i32, %arg1: i32) -> (i32, i32) {
    %c0_i32 = arith.constant 0 : i32
    return %arg0, %arg1 : i32, i32
  }
  func.func @transform_1(%arg0: i32, %arg1: i32) -> (i32, i32) {
    %c0_i32 = arith.constant 0 : i32
    %c0_i32_0 = arith.constant 0 : i32
    return %arg1, %c0_i32 : i32, i32
  }
  func.func @transform_2(%arg0: i32, %arg1: i32) -> (i32, i32) {
    %c0_i32 = arith.constant 0 : i32
    %c0_i32_0 = arith.constant 0 : i32
    %c0_i32_1 = arith.constant 0 : i32
    return %c0_i32, %c0_i32_0 : i32, i32
  }
  func.func @transform_3(%arg0: i32, %arg1: i32) -> (i32, i32) {
    %c0_i32 = arith.constant 0 : i32
    %c0_i32_0 = arith.constant 0 : i32
    return %arg0, %c0_i32 : i32, i32
  }
}

module attributes {stable_mosaic.version = 11 : i64} {
  func.func @_conv_matmul_kernel(%arg0: i32, %arg1: i32, %arg2: memref<56x512xbf16, #tpu.memory_space<vmem>>, %arg3: memref<512x128xbf16, #tpu.memory_space<vmem>>, %arg4: memref<1x128xf32, #tpu.memory_space<vmem>>, %arg5: memref<56x16xbf16, #tpu.memory_space<vmem>>, %arg6: memref<56x128xf32, #tpu.memory_space<vmem>>) attributes {dimension_semantics = [#tpu.dimension_semantics<parallel>, #tpu.dimension_semantics<arbitrary>], iteration_bounds = array<i64: 1, 1>, scalar_prefetch = 0 : i64, scratch_operands = 1 : i64, tpu.core_type = #tpu.core_type<tc>, window_params = [{transform_indices = @transform_0, window_bounds = array<i64: 56, 512>}, {transform_indices = @transform_1, window_bounds = array<i64: 512, 128>}, {pipeline_mode = #tpu.pipeline_mode<synchronous>, transform_indices = @transform_2, window_bounds = array<i64: 1, 128>}, {transform_indices = @transform_3, window_bounds = array<i64: 56, 16>}]} {
    %c0_i32 = arith.constant 0 : i32
    %0 = arith.cmpi eq, %arg1, %c0_i32 : i32
    %1 = arith.extui %0 : i1 to i32
    %c0_i32_0 = arith.constant 0 : i32
    %2 = arith.cmpi ne, %1, %c0_i32_0 : i32
    scf.if %2 {
      %c0_10 = arith.constant 0 : index
      %c0_11 = arith.constant 0 : index
      %12 = vector.load %arg4[%c0_10, %c0_11] : memref<1x128xf32, #tpu.memory_space<vmem>>, vector<1x128xf32>
      %13 = vector.shape_cast %12 : vector<1x128xf32> to vector<1x128xf32>
      %14 = vector.broadcast %13 : vector<1x128xf32> to vector<56x128xf32>
      %c0_12 = arith.constant 0 : index
      %c0_13 = arith.constant 0 : index
      %15 = vector.load %arg6[%c0_12, %c0_13] : memref<56x128xf32, #tpu.memory_space<vmem>>, vector<56x128xf32>
      tpu.vector_store %arg6[%c0_12, %c0_13], %14 {strides = array<i32>} : memref<56x128xf32, #tpu.memory_space<vmem>>, vector<56x128xf32>,
    } else {
    }
    %c0 = arith.constant 0 : index
    %c0_1 = arith.constant 0 : index
    %3 = vector.load %arg6[%c0, %c0_1] : memref<56x128xf32, #tpu.memory_space<vmem>>, vector<56x128xf32>
    %c0_2 = arith.constant 0 : index
    %c0_3 = arith.constant 0 : index
    %4 = vector.load %arg2[%c0_2, %c0_3] : memref<56x512xbf16, #tpu.memory_space<vmem>>, vector<56x512xbf16>
    %c0_4 = arith.constant 0 : index
    %c0_5 = arith.constant 0 : index
    %5 = vector.load %arg3[%c0_4, %c0_5] : memref<512x128xbf16, #tpu.memory_space<vmem>>, vector<512x128xbf16>
    %cst = arith.constant dense<0.000000e+00> : vector<56x128xf32>
    %6 = tpu.matmul %4, %5, %cst {dimension_numbers = #tpu.dot_dimension_numbers<[1], [0], [0], [1], [0, 0, 1, 1], [], []>} : vector<56x512xbf16>, vector<512x128xbf16>, vector<56x128xf32> -> vector<56x128xf32>
    %7 = arith.addf %3, %6 : vector<56x128xf32>
    %c0_6 = arith.constant 0 : index
    %c0_7 = arith.constant 0 : index
    %8 = vector.load %arg6[%c0_6, %c0_7] : memref<56x128xf32, #tpu.memory_space<vmem>>, vector<56x128xf32>
    tpu.vector_store %arg6[%c0_6, %c0_7], %7 {strides = array<i32>} : memref<56x128xf32, #tpu.memory_space<vmem>>, vector<56x128xf32>,
    %c0_i32_8 = arith.constant 0 : i32
    %9 = arith.cmpi eq, %arg1, %c0_i32_8 : i32
    %10 = arith.extui %9 : i1 to i32
    %c0_i32_9 = arith.constant 0 : i32
    %11 = arith.cmpi ne, %10, %c0_i32_9 : i32
    scf.if %11 {
      %c0_10 = arith.constant 0 : index
      %c0_11 = arith.constant 0 : index
      %12 = vector.load %arg6[%c0_10, %c0_11] : memref<56x128xf32, #tpu.memory_space<vmem>>, vector<56x128xf32>
      %13 = vector.extract_strided_slice %12 {offsets = [0, 0], sizes = [56, 16], strides = [1, 1]} : vector<56x128xf32> to vector<56x16xf32>
      %cst_12 = arith.constant 0.000000e+00 : f32
      %14 = vector.broadcast %cst_12 : f32 to vector<56x16xf32>
      %15 = arith.cmpf oge, %13, %14 : vector<56x16xf32>
      %cst_13 = arith.constant 2.000000e-01 : f32
      %16 = vector.broadcast %cst_13 : f32 to vector<56x16xf32>
      %17 = arith.mulf %16, %13 : vector<56x16xf32>
      %18 = arith.select %15, %13, %17 : vector<56x16xi1>, vector<56x16xf32>
      %19 = arith.truncf %18 : vector<56x16xf32> to vector<56x16xbf16>
      %c0_14 = arith.constant 0 : index
      %c0_15 = arith.constant 0 : index
      %20 = vector.load %arg5[%c0_14, %c0_15] : memref<56x16xbf16, #tpu.memory_space<vmem>>, vector<56x16xbf16>
      tpu.vector_store %arg5[%c0_14, %c0_15], %19 {strides = array<i32>} : memref<56x16xbf16, #tpu.memory_space<vmem>>, vector<56x16xbf16>,
    } else {
    }
    return
  }
  func.func @transform_0(%arg0: i32, %arg1: i32) -> (i32, i32) {
    %c0_i32 = arith.constant 0 : i32
    return %arg0, %arg1 : i32, i32
  }
  func.func @transform_1(%arg0: i32, %arg1: i32) -> (i32, i32) {
    %c0_i32 = arith.constant 0 : i32
    %c0_i32_0 = arith.constant 0 : i32
    return %arg1, %c0_i32 : i32, i32
  }
  func.func @transform_2(%arg0: i32, %arg1: i32) -> (i32, i32) {
    %c0_i32 = arith.constant 0 : i32
    %c0_i32_0 = arith.constant 0 : i32
    %c0_i32_1 = arith.constant 0 : i32
    return %c0_i32, %c0_i32_0 : i32, i32
  }
  func.func @transform_3(%arg0: i32, %arg1: i32) -> (i32, i32) {
    %c0_i32 = arith.constant 0 : i32
    %c0_i32_0 = arith.constant 0 : i32
    return %arg0, %c0_i32 : i32, i32
  }
}

module attributes {stable_mosaic.version = 11 : i64} {
  func.func @_conv_matmul_kernel(%arg0: i32, %arg1: i32, %arg2: memref<16x1024xbf16, #tpu.memory_space<vmem>>, %arg3: memref<1024x128xbf16, #tpu.memory_space<vmem>>, %arg4: memref<1x128xf32, #tpu.memory_space<vmem>>, %arg5: memref<16x32xbf16, #tpu.memory_space<vmem>>, %arg6: memref<16x128xf32, #tpu.memory_space<vmem>>) attributes {dimension_semantics = [#tpu.dimension_semantics<parallel>, #tpu.dimension_semantics<arbitrary>], iteration_bounds = array<i64: 1, 1>, scalar_prefetch = 0 : i64, scratch_operands = 1 : i64, tpu.core_type = #tpu.core_type<tc>, window_params = [{transform_indices = @transform_0, window_bounds = array<i64: 16, 1024>}, {transform_indices = @transform_1, window_bounds = array<i64: 1024, 128>}, {pipeline_mode = #tpu.pipeline_mode<synchronous>, transform_indices = @transform_2, window_bounds = array<i64: 1, 128>}, {transform_indices = @transform_3, window_bounds = array<i64: 16, 32>}]} {
    %c0_i32 = arith.constant 0 : i32
    %0 = arith.cmpi eq, %arg1, %c0_i32 : i32
    %1 = arith.extui %0 : i1 to i32
    %c0_i32_0 = arith.constant 0 : i32
    %2 = arith.cmpi ne, %1, %c0_i32_0 : i32
    scf.if %2 {
      %c0_10 = arith.constant 0 : index
      %c0_11 = arith.constant 0 : index
      %12 = vector.load %arg4[%c0_10, %c0_11] : memref<1x128xf32, #tpu.memory_space<vmem>>, vector<1x128xf32>
      %13 = vector.shape_cast %12 : vector<1x128xf32> to vector<1x128xf32>
      %14 = vector.broadcast %13 : vector<1x128xf32> to vector<16x128xf32>
      %c0_12 = arith.constant 0 : index
      %c0_13 = arith.constant 0 : index
      %15 = vector.load %arg6[%c0_12, %c0_13] : memref<16x128xf32, #tpu.memory_space<vmem>>, vector<16x128xf32>
      tpu.vector_store %arg6[%c0_12, %c0_13], %14 {strides = array<i32>} : memref<16x128xf32, #tpu.memory_space<vmem>>, vector<16x128xf32>,
    } else {
    }
    %c0 = arith.constant 0 : index
    %c0_1 = arith.constant 0 : index
    %3 = vector.load %arg6[%c0, %c0_1] : memref<16x128xf32, #tpu.memory_space<vmem>>, vector<16x128xf32>
    %c0_2 = arith.constant 0 : index
    %c0_3 = arith.constant 0 : index
    %4 = vector.load %arg2[%c0_2, %c0_3] : memref<16x1024xbf16, #tpu.memory_space<vmem>>, vector<16x1024xbf16>
    %c0_4 = arith.constant 0 : index
    %c0_5 = arith.constant 0 : index
    %5 = vector.load %arg3[%c0_4, %c0_5] : memref<1024x128xbf16, #tpu.memory_space<vmem>>, vector<1024x128xbf16>
    %cst = arith.constant dense<0.000000e+00> : vector<16x128xf32>
    %6 = tpu.matmul %4, %5, %cst {dimension_numbers = #tpu.dot_dimension_numbers<[1], [0], [0], [1], [0, 0, 1, 1], [], []>} : vector<16x1024xbf16>, vector<1024x128xbf16>, vector<16x128xf32> -> vector<16x128xf32>
    %7 = arith.addf %3, %6 : vector<16x128xf32>
    %c0_6 = arith.constant 0 : index
    %c0_7 = arith.constant 0 : index
    %8 = vector.load %arg6[%c0_6, %c0_7] : memref<16x128xf32, #tpu.memory_space<vmem>>, vector<16x128xf32>
    tpu.vector_store %arg6[%c0_6, %c0_7], %7 {strides = array<i32>} : memref<16x128xf32, #tpu.memory_space<vmem>>, vector<16x128xf32>,
    %c0_i32_8 = arith.constant 0 : i32
    %9 = arith.cmpi eq, %arg1, %c0_i32_8 : i32
    %10 = arith.extui %9 : i1 to i32
    %c0_i32_9 = arith.constant 0 : i32
    %11 = arith.cmpi ne, %10, %c0_i32_9 : i32
    scf.if %11 {
      %c0_10 = arith.constant 0 : index
      %c0_11 = arith.constant 0 : index
      %12 = vector.load %arg6[%c0_10, %c0_11] : memref<16x128xf32, #tpu.memory_space<vmem>>, vector<16x128xf32>
      %13 = vector.extract_strided_slice %12 {offsets = [0, 0], sizes = [16, 32], strides = [1, 1]} : vector<16x128xf32> to vector<16x32xf32>
      %cst_12 = arith.constant 0.000000e+00 : f32
      %14 = vector.broadcast %cst_12 : f32 to vector<16x32xf32>
      %15 = arith.cmpf oge, %13, %14 : vector<16x32xf32>
      %cst_13 = arith.constant 2.000000e-01 : f32
      %16 = vector.broadcast %cst_13 : f32 to vector<16x32xf32>
      %17 = arith.mulf %16, %13 : vector<16x32xf32>
      %18 = arith.select %15, %13, %17 : vector<16x32xi1>, vector<16x32xf32>
      %19 = arith.truncf %18 : vector<16x32xf32> to vector<16x32xbf16>
      %c0_14 = arith.constant 0 : index
      %c0_15 = arith.constant 0 : index
      %20 = vector.load %arg5[%c0_14, %c0_15] : memref<16x32xbf16, #tpu.memory_space<vmem>>, vector<16x32xbf16>
      tpu.vector_store %arg5[%c0_14, %c0_15], %19 {strides = array<i32>} : memref<16x32xbf16, #tpu.memory_space<vmem>>, vector<16x32xbf16>,
    } else {
    }
    return
  }
  func.func @transform_0(%arg0: i32, %arg1: i32) -> (i32, i32) {
    %c0_i32 = arith.constant 0 : i32
    return %arg0, %arg1 : i32, i32
  }
  func.func @transform_1(%arg0: i32, %arg1: i32) -> (i32, i32) {
    %c0_i32 = arith.constant 0 : i32
    %c0_i32_0 = arith.constant 0 : i32
    return %arg1, %c0_i32 : i32, i32
  }
  func.func @transform_2(%arg0: i32, %arg1: i32) -> (i32, i32) {
    %c0_i32 = arith.constant 0 : i32
    %c0_i32_0 = arith.constant 0 : i32
    %c0_i32_1 = arith.constant 0 : i32
    return %c0_i32, %c0_i32_0 : i32, i32
  }
  func.func @transform_3(%arg0: i32, %arg1: i32) -> (i32, i32) {
    %c0_i32 = arith.constant 0 : i32
    %c0_i32_0 = arith.constant 0 : i32
    return %arg0, %c0_i32 : i32, i32
  }
}

module attributes {stable_mosaic.version = 11 : i64} {
  func.func @_conv_matmul_kernel(%arg0: i32, %arg1: i32, %arg2: memref<56x2048xbf16, #tpu.memory_space<vmem>>, %arg3: memref<2048x128xbf16, #tpu.memory_space<vmem>>, %arg4: memref<1x128xf32, #tpu.memory_space<vmem>>, %arg5: memref<56x64xbf16, #tpu.memory_space<vmem>>, %arg6: memref<56x128xf32, #tpu.memory_space<vmem>>) attributes {dimension_semantics = [#tpu.dimension_semantics<parallel>, #tpu.dimension_semantics<arbitrary>], iteration_bounds = array<i64: 1, 1>, scalar_prefetch = 0 : i64, scratch_operands = 1 : i64, tpu.core_type = #tpu.core_type<tc>, window_params = [{transform_indices = @transform_0, window_bounds = array<i64: 56, 2048>}, {transform_indices = @transform_1, window_bounds = array<i64: 2048, 128>}, {pipeline_mode = #tpu.pipeline_mode<synchronous>, transform_indices = @transform_2, window_bounds = array<i64: 1, 128>}, {transform_indices = @transform_3, window_bounds = array<i64: 56, 64>}]} {
    %c0_i32 = arith.constant 0 : i32
    %0 = arith.cmpi eq, %arg1, %c0_i32 : i32
    %1 = arith.extui %0 : i1 to i32
    %c0_i32_0 = arith.constant 0 : i32
    %2 = arith.cmpi ne, %1, %c0_i32_0 : i32
    scf.if %2 {
      %c0_10 = arith.constant 0 : index
      %c0_11 = arith.constant 0 : index
      %12 = vector.load %arg4[%c0_10, %c0_11] : memref<1x128xf32, #tpu.memory_space<vmem>>, vector<1x128xf32>
      %13 = vector.shape_cast %12 : vector<1x128xf32> to vector<1x128xf32>
      %14 = vector.broadcast %13 : vector<1x128xf32> to vector<56x128xf32>
      %c0_12 = arith.constant 0 : index
      %c0_13 = arith.constant 0 : index
      %15 = vector.load %arg6[%c0_12, %c0_13] : memref<56x128xf32, #tpu.memory_space<vmem>>, vector<56x128xf32>
      tpu.vector_store %arg6[%c0_12, %c0_13], %14 {strides = array<i32>} : memref<56x128xf32, #tpu.memory_space<vmem>>, vector<56x128xf32>,
    } else {
    }
    %c0 = arith.constant 0 : index
    %c0_1 = arith.constant 0 : index
    %3 = vector.load %arg6[%c0, %c0_1] : memref<56x128xf32, #tpu.memory_space<vmem>>, vector<56x128xf32>
    %c0_2 = arith.constant 0 : index
    %c0_3 = arith.constant 0 : index
    %4 = vector.load %arg2[%c0_2, %c0_3] : memref<56x2048xbf16, #tpu.memory_space<vmem>>, vector<56x2048xbf16>
    %c0_4 = arith.constant 0 : index
    %c0_5 = arith.constant 0 : index
    %5 = vector.load %arg3[%c0_4, %c0_5] : memref<2048x128xbf16, #tpu.memory_space<vmem>>, vector<2048x128xbf16>
    %cst = arith.constant dense<0.000000e+00> : vector<56x128xf32>
    %6 = tpu.matmul %4, %5, %cst {dimension_numbers = #tpu.dot_dimension_numbers<[1], [0], [0], [1], [0, 0, 1, 1], [], []>} : vector<56x2048xbf16>, vector<2048x128xbf16>, vector<56x128xf32> -> vector<56x128xf32>
    %7 = arith.addf %3, %6 : vector<56x128xf32>
    %c0_6 = arith.constant 0 : index
    %c0_7 = arith.constant 0 : index
    %8 = vector.load %arg6[%c0_6, %c0_7] : memref<56x128xf32, #tpu.memory_space<vmem>>, vector<56x128xf32>
    tpu.vector_store %arg6[%c0_6, %c0_7], %7 {strides = array<i32>} : memref<56x128xf32, #tpu.memory_space<vmem>>, vector<56x128xf32>,
    %c0_i32_8 = arith.constant 0 : i32
    %9 = arith.cmpi eq, %arg1, %c0_i32_8 : i32
    %10 = arith.extui %9 : i1 to i32
    %c0_i32_9 = arith.constant 0 : i32
    %11 = arith.cmpi ne, %10, %c0_i32_9 : i32
    scf.if %11 {
      %c0_10 = arith.constant 0 : index
      %c0_11 = arith.constant 0 : index
      %12 = vector.load %arg6[%c0_10, %c0_11] : memref<56x128xf32, #tpu.memory_space<vmem>>, vector<56x128xf32>
      %13 = vector.extract_strided_slice %12 {offsets = [0, 0], sizes = [56, 64], strides = [1, 1]} : vector<56x128xf32> to vector<56x64xf32>
      %cst_12 = arith.constant 0.000000e+00 : f32
      %14 = vector.broadcast %cst_12 : f32 to vector<56x64xf32>
      %15 = arith.cmpf oge, %13, %14 : vector<56x64xf32>
      %cst_13 = arith.constant 2.000000e-01 : f32
      %16 = vector.broadcast %cst_13 : f32 to vector<56x64xf32>
      %17 = arith.mulf %16, %13 : vector<56x64xf32>
      %18 = arith.select %15, %13, %17 : vector<56x64xi1>, vector<56x64xf32>
      %19 = arith.truncf %18 : vector<56x64xf32> to vector<56x64xbf16>
      %c0_14 = arith.constant 0 : index
      %c0_15 = arith.constant 0 : index
      %20 = vector.load %arg5[%c0_14, %c0_15] : memref<56x64xbf16, #tpu.memory_space<vmem>>, vector<56x64xbf16>
      tpu.vector_store %arg5[%c0_14, %c0_15], %19 {strides = array<i32>} : memref<56x64xbf16, #tpu.memory_space<vmem>>, vector<56x64xbf16>,
    } else {
    }
    return
  }
  func.func @transform_0(%arg0: i32, %arg1: i32) -> (i32, i32) {
    %c0_i32 = arith.constant 0 : i32
    return %arg0, %arg1 : i32, i32
  }
  func.func @transform_1(%arg0: i32, %arg1: i32) -> (i32, i32) {
    %c0_i32 = arith.constant 0 : i32
    %c0_i32_0 = arith.constant 0 : i32
    return %arg1, %c0_i32 : i32, i32
  }
  func.func @transform_2(%arg0: i32, %arg1: i32) -> (i32, i32) {
    %c0_i32 = arith.constant 0 : i32
    %c0_i32_0 = arith.constant 0 : i32
    %c0_i32_1 = arith.constant 0 : i32
    return %c0_i32, %c0_i32_0 : i32, i32
  }
  func.func @transform_3(%arg0: i32, %arg1: i32) -> (i32, i32) {
    %c0_i32 = arith.constant 0 : i32
    %c0_i32_0 = arith.constant 0 : i32
    return %arg0, %c0_i32 : i32, i32
  }
}

module attributes {stable_mosaic.version = 11 : i64} {
  func.func @_conv_matmul_kernel(%arg0: i32, %arg1: i32, %arg2: memref<128x4096xbf16, #tpu.memory_space<vmem>>, %arg3: memref<4096x128xbf16, #tpu.memory_space<vmem>>, %arg4: memref<1x128xf32, #tpu.memory_space<vmem>>, %arg5: memref<128x1xbf16, #tpu.memory_space<vmem>>, %arg6: memref<128x128xf32, #tpu.memory_space<vmem>>) attributes {dimension_semantics = [#tpu.dimension_semantics<parallel>, #tpu.dimension_semantics<arbitrary>], iteration_bounds = array<i64: 1, 1>, scalar_prefetch = 0 : i64, scratch_operands = 1 : i64, tpu.core_type = #tpu.core_type<tc>, window_params = [{transform_indices = @transform_0, window_bounds = array<i64: 128, 4096>}, {transform_indices = @transform_1, window_bounds = array<i64: 4096, 128>}, {pipeline_mode = #tpu.pipeline_mode<synchronous>, transform_indices = @transform_2, window_bounds = array<i64: 1, 128>}, {transform_indices = @transform_3, window_bounds = array<i64: 128, 1>}]} {
    %c0_i32 = arith.constant 0 : i32
    %0 = arith.cmpi eq, %arg1, %c0_i32 : i32
    %1 = arith.extui %0 : i1 to i32
    %c0_i32_0 = arith.constant 0 : i32
    %2 = arith.cmpi ne, %1, %c0_i32_0 : i32
    scf.if %2 {
      %c0_10 = arith.constant 0 : index
      %c0_11 = arith.constant 0 : index
      %12 = vector.load %arg4[%c0_10, %c0_11] : memref<1x128xf32, #tpu.memory_space<vmem>>, vector<1x128xf32>
      %13 = vector.shape_cast %12 : vector<1x128xf32> to vector<1x128xf32>
      %14 = vector.broadcast %13 : vector<1x128xf32> to vector<128x128xf32>
      %c0_12 = arith.constant 0 : index
      %c0_13 = arith.constant 0 : index
      %15 = vector.load %arg6[%c0_12, %c0_13] : memref<128x128xf32, #tpu.memory_space<vmem>>, vector<128x128xf32>
      tpu.vector_store %arg6[%c0_12, %c0_13], %14 {strides = array<i32>} : memref<128x128xf32, #tpu.memory_space<vmem>>, vector<128x128xf32>,
    } else {
    }
    %c0 = arith.constant 0 : index
    %c0_1 = arith.constant 0 : index
    %3 = vector.load %arg6[%c0, %c0_1] : memref<128x128xf32, #tpu.memory_space<vmem>>, vector<128x128xf32>
    %c0_2 = arith.constant 0 : index
    %c0_3 = arith.constant 0 : index
    %4 = vector.load %arg2[%c0_2, %c0_3] : memref<128x4096xbf16, #tpu.memory_space<vmem>>, vector<128x4096xbf16>
    %c0_4 = arith.constant 0 : index
    %c0_5 = arith.constant 0 : index
    %5 = vector.load %arg3[%c0_4, %c0_5] : memref<4096x128xbf16, #tpu.memory_space<vmem>>, vector<4096x128xbf16>
    %cst = arith.constant dense<0.000000e+00> : vector<128x128xf32>
    %6 = tpu.matmul %4, %5, %cst {dimension_numbers = #tpu.dot_dimension_numbers<[1], [0], [0], [1], [0, 0, 1, 1], [], []>} : vector<128x4096xbf16>, vector<4096x128xbf16>, vector<128x128xf32> -> vector<128x128xf32>
    %7 = arith.addf %3, %6 : vector<128x128xf32>
    %c0_6 = arith.constant 0 : index
    %c0_7 = arith.constant 0 : index
    %8 = vector.load %arg6[%c0_6, %c0_7] : memref<128x128xf32, #tpu.memory_space<vmem>>, vector<128x128xf32>
    tpu.vector_store %arg6[%c0_6, %c0_7], %7 {strides = array<i32>} : memref<128x128xf32, #tpu.memory_space<vmem>>, vector<128x128xf32>,
    %c0_i32_8 = arith.constant 0 : i32
    %9 = arith.cmpi eq, %arg1, %c0_i32_8 : i32
    %10 = arith.extui %9 : i1 to i32
    %c0_i32_9 = arith.constant 0 : i32
    %11 = arith.cmpi ne, %10, %c0_i32_9 : i32
    scf.if %11 {
      %c0_10 = arith.constant 0 : index
      %c0_11 = arith.constant 0 : index
      %12 = vector.load %arg6[%c0_10, %c0_11] : memref<128x128xf32, #tpu.memory_space<vmem>>, vector<128x128xf32>
      %13 = vector.extract_strided_slice %12 {offsets = [0, 0], sizes = [128, 1], strides = [1, 1]} : vector<128x128xf32> to vector<128x1xf32>
      %14 = arith.truncf %13 : vector<128x1xf32> to vector<128x1xbf16>
      %c0_12 = arith.constant 0 : index
      %c0_13 = arith.constant 0 : index
      %15 = vector.load %arg5[%c0_12, %c0_13] : memref<128x1xbf16, #tpu.memory_space<vmem>>, vector<128x1xbf16>
      tpu.vector_store %arg5[%c0_12, %c0_13], %14 {strides = array<i32>} : memref<128x1xbf16, #tpu.memory_space<vmem>>, vector<128x1xbf16>,
    } else {
    }
    return
  }
  func.func @transform_0(%arg0: i32, %arg1: i32) -> (i32, i32) {
    %c0_i32 = arith.constant 0 : i32
    return %arg0, %arg1 : i32, i32
  }
  func.func @transform_1(%arg0: i32, %arg1: i32) -> (i32, i32) {
    %c0_i32 = arith.constant 0 : i32
    %c0_i32_0 = arith.constant 0 : i32
    return %arg1, %c0_i32 : i32, i32
  }
  func.func @transform_2(%arg0: i32, %arg1: i32) -> (i32, i32) {
    %c0_i32 = arith.constant 0 : i32
    %c0_i32_0 = arith.constant 0 : i32
    %c0_i32_1 = arith.constant 0 : i32
    return %c0_i32, %c0_i32_0 : i32, i32
  }
  func.func @transform_3(%arg0: i32, %arg1: i32) -> (i32, i32) {
    %c0_i32 = arith.constant 0 : i32
    %c0_i32_0 = arith.constant 0 : i32
    return %arg0, %c0_i32 : i32, i32
  }
}

</mosaic_0001>

<bundles_post_ra>
// kernel: _lambda_.5
= control target key start
LH: loop header
LB: loop body
LE: loop exit
PB: predicated region body
PF: predicated region fallthrough
CT: control target
= control target key end

     0   :  { %s960_s12 = smov 0   ;;  %s962_s13 = smov 0   ;;  %s1089_s0 = inlined_call_operand.vmem [shape: bf16[250,128], index: 0, kind: input, shape index: {}]   ;;  %s1090_s1 = inlined_call_operand.vmem [shape: bf16[128,128], index: 1, kind: input, shape index: {}]   ;;  %s1091_s2 = inlined_call_operand.vmem [shape: f32[1,128], index: 2, kind: input, shape index: {}]   ;;  %s1092_s3 = inlined_call_operand.vmem [shape: bf16[250,8], index: 3, kind: output, shape index: {}]  }
   0x1   :  { %s964_s14 = smov 0  }
   0x2 LB: > { %s25_s15 = sadd.s32 1, %s934_s13  ;;  %p756_p0 = scmp.ge.s32.totalorder %s938_s14, 1  ;;  %s938_s14 = sphi %s964_s14, %s13_s14   ;;  %s934_s13 = sphi %s962_s13, %s1094_s13   ;;  %s930_s12 = sphi %s960_s12, %s1093_s12  }
   0x3   : > { %p27_p1 = scmp.ge.s32.totalorder %s25_s15, 2  ;;  %p166_p2 = scmp.lt.s32.totalorder %s938_s14, 3 }
   0x5   : > { %s1096_s15 = smov (%p27_p1, %s25_s15), 0  ;;  %p167_p3 = pnand %p756_p0, %p166_p2 }
   0x6   : > { %v900_v0 = vld [vmem:[%s1090_s1] sm:$0xff] (!%p167_p3)   ;;  %s757_s18 = sshll.u32 (!%p167_p3), %s930_s12, 4  ;;  %v901_v1 = vld [vmem:[%s1090_s1 + $0x8] sm:$0xff] (!%p167_p3)   ;;  %v902_v2 = vld [vmem:[%s1090_s1 + $0x10] sm:$0xff] (!%p167_p3)   ;;  %vm651_vm0 = vcmask (!%p167_p3), 60416  }
   0x7   : > { %170 = sbr.rel (%p167_p3) target bundleno = 277 (0x115), region = 32  ;;  %p199_p4 = scmp.lt.s32.totalorder (!%p167_p3), %s757_s18, 31  ;;  %828 = vmatprep.subr.bf16.mxu0 (!%p167_p3), %v900_v0  ;;  %860 = vmatprep.subr.bf16.mxu1 (!%p167_p3), %v900_v0  ;;  %v903_v3 = vld [vmem:[%s1090_s1 + $0x18] sm:$0xff] (!%p167_p3)   ;;  %v904_v6 = vld [vmem:[%s1090_s1 + $0x20] sm:$0xff] (!%p167_p3)   ;;  %v905_v7 = vld [vmem:[%s1090_s1 + $0x28] sm:$0xff] (!%p167_p3)  }
   0x8   : > { %829 = vmatpush3.bf16.msra.mxu0 (!%p167_p3), %v900_v0  ;;  %868 = vmatpush3.bf16.msra.mxu1 (!%p167_p3), %v900_v0  ;;  %v906_v8 = vld [vmem:[%s1090_s1 + $0x30] sm:$0xff] (!%p167_p3)   ;;  %v907_v9 = vld [vmem:[%s1090_s1 + $0x38] sm:$0xff] (!%p167_p3)   ;;  %v1023_v16 = vld [vmem:[%s1091_s2] ss:$0 sm:$0xff] (!%p167_p3) }
   0x9   : > { %830 = vmatprep.subr.bf16.mxu0 (!%p167_p3), %v901_v1  ;;  %861 = vmatprep.subr.bf16.mxu1 (!%p167_p3), %v901_v1 }
   0xc   : > { %831 = vmatpush3.bf16.msra.mxu0 (!%p167_p3), %v901_v1  ;;  %869 = vmatpush3.bf16.msra.mxu1 (!%p167_p3), %v901_v1 }
   0xd   : > { %832 = vmatprep.subr.bf16.mxu0 (!%p167_p3), %v902_v2  ;;  %862 = vmatprep.subr.bf16.mxu1 (!%p167_p3), %v902_v2 }
   0xe   : > { %s1098_s18 = smov (!%p199_p4, %s757_s18), 31 }
   0xf   : > { %s758_s23 = sshll.u32 %s1098_s18, 2 }
  0x10   : > { %s995_s26 = scalar_lea.vmem %s1089_s0, %s758_s23  ;;  %833 = vmatpush3.bf16.msra.mxu0 %v902_v2  ;;  %870 = vmatpush3.bf16.msra.mxu1 %v902_v2  ;;  %s1034_s17 = scalar_lea.vmem %s1092_s3, %s758_s23 }
  0x11   : > { %v908_v4 = vld [vmem:[%s995_s26] sm:$0xff]   ;;  %834 = vmatprep.subr.bf16.mxu0 %v903_v3  ;;  %863 = vmatprep.subr.bf16.mxu1 %v903_v3  ;;  %v910_v10 = vld [vmem:[%s995_s26 + $0x8] sm:$0xff]   ;;  %v912_v12 = vld [vmem:[%s995_s26 + $0x10] sm:$0xff]  }
  0x12   : > { %v909_v5 = vld [vmem:[%s995_s26 + $0x20] sm:$0xff]   ;;  %844 = vmatprep.mubr.bf16.mxu0 %v908_v4  ;;  %v911_v11 = vld [vmem:[%s995_s26 + $0x28] sm:$0xff]   ;;  %v913_v13 = vld [vmem:[%s995_s26 + $0x30] sm:$0xff]  }
  0x13   : > { %852 = vmatprep.mubr.bf16.mxu1 %v909_v5  ;;  %v914_v14 = vld [vmem:[%s995_s26 + $0x18] sm:$0xff]  }
  0x14   : > { %835 = vmatpush3.bf16.msra.mxu0 %v903_v3  ;;  %871 = vmatpush3.bf16.msra.mxu1 %v903_v3  ;;  %v915_v15 = vld [vmem:[%s995_s26 + $0x38] sm:$0xff]  }
  0x15   : > { %836 = vmatprep.subr.bf16.mxu0 %v904_v6  ;;  %864 = vmatprep.subr.bf16.mxu1 %v904_v6 }
  0x18   : > { %837 = vmatpush3.bf16.msra.mxu0 %v904_v6  ;;  %872 = vmatpush3.bf16.msra.mxu1 %v904_v6 }
  0x19   : > { %838 = vmatprep.subr.bf16.mxu0 %v905_v7  ;;  %865 = vmatprep.subr.bf16.mxu1 %v905_v7 }
  0x1c   : > { %839 = vmatpush3.bf16.msra.mxu0 %v905_v7  ;;  %873 = vmatpush3.bf16.msra.mxu1 %v905_v7 }
  0x1d   : > { %840 = vmatprep.subr.bf16.mxu0 %v906_v8  ;;  %866 = vmatprep.subr.bf16.mxu1 %v906_v8 }
  0x20   : > { %841 = vmatpush3.bf16.msra.mxu0 %v906_v8  ;;  %874 = vmatpush3.bf16.msra.mxu1 %v906_v8 }
  0x21   : > { %842 = vmatprep.subr.bf16.mxu0 %v907_v9  ;;  %867 = vmatprep.subr.bf16.mxu1 %v907_v9 }
  0x24   : > { %843 = vmatpush3.bf16.msra.mxu0 %v907_v9  ;;  %875 = vmatpush3.bf16.msra.mxu1 %v907_v9 }
  0x27   : > { %845 = vmatmul.mubr.bf16.vlgmr.msra.gmra.mrb[0].mxu0 %v910_v10  ;;  %853 = vmatmul.mubr.bf16.vlgmr.msra.gmra.mrb[0].mxu1 %v911_v11 }
  0x28   : > { %848 = vmatprep.mubr.bf16.mxu0 %v912_v12  ;;  %856 = vmatprep.mubr.bf16.mxu1 %v913_v13 }
  0x2f   : > { %849 = vmatmul.mubr.bf16.gmra.mrb[4].mxu0 %v914_v14  ;;  %857 = vmatmul.mubr.bf16.gmra.mrb[4].mxu1 %v915_v15 }
  0xfa   : > { %v846_v17 = vpop.f32.mrb[0].mxu0  ;;  %v854_v18 = vpop.f32.mrb[0].mxu1 }
  0xfb   : > { %v490_v19 = vadd.f32 %v846_v17, %v1023_v16  ;;  %v498_v20 = vadd.f32 %v854_v18, %v1023_v16  ;;  %v425_v21 = vpop.f32.mrb[1].mxu0  ;;  %v457_v22 = vpop.f32.mrb[1].mxu1 }
  0xfc   : > { %v488_v23 = vadd.f32 %v1023_v16, %v425_v21  ;;  %v496_v24 = vadd.f32 %v1023_v16, %v457_v22  ;;  %v847_v25 = vpop.f32.mrb[2].mxu0  ;;  %v855_v26 = vpop.f32.mrb[2].mxu1 }
  0xfd   : > { %vm541_vm1 = vcmp.ge.f32.partialorder %v490_v19, 0.0  ;;  %v557_v27 = vmul.f32 0.2, %v490_v19  ;;  %vm549_vm2 = vcmp.ge.f32.partialorder %v498_v20, 0.0  ;;  %v565_v28 = vmul.f32 0.2, %v498_v20 }
  0xfe   : > { %vm539_vm3 = vcmp.ge.f32.partialorder %v488_v23, 0.0  ;;  %v555_v29 = vmul.f32 0.2, %v488_v23  ;;  %vm547_vm4 = vcmp.ge.f32.partialorder %v496_v24, 0.0  ;;  %v563_v30 = vmul.f32 0.2, %v496_v24 }
  0xff   : > { %v573_v31 = vsel %vm541_vm1, %v490_v19, %v557_v27  ;;  %v581_v32 = vsel %vm549_vm2, %v498_v20, %v565_v28  ;;  %v491_v33 = vadd.f32 %v847_v25, %v1023_v16  ;;  %v499_v34 = vadd.f32 %v855_v26, %v1023_v16  ;;  %v428_v35 = vpop.f32.mrb[3].mxu0  ;;  %v460_v36 = vpop.f32.mrb[3].mxu1 }
 0x100   : > { %v798_v37 = vpack.c.bf16 %v573_v31, %v573_v31  ;;  %v806_v38 = vpack.c.bf16 %v581_v32, %v581_v32  ;;  %v571_v39 = vsel %vm539_vm3, %v488_v23, %v555_v29  ;;  %v579_v40 = vsel %vm547_vm4, %v496_v24, %v563_v30 }
 0x101   : > { %v796_v41 = vpack.c.bf16 %v571_v39, %v571_v39  ;;  %v804_v42 = vpack.c.bf16 %v579_v40, %v579_v40  ;;  %vm542_vm5 = vcmp.ge.f32.partialorder %v491_v33, 0.0  ;;  %v558_v43 = vmul.f32 0.2, %v491_v33 }
 0x102   : > { %654 = vst.msk [vmem:[%s1034_s17 + $0x8] sm:$0xf] %vm651_vm0, %v798_v37  ;;  %662 = vst.msk [vmem:[%s1034_s17 + $0x28] sm:$0xf] %vm651_vm0, %v806_v38  ;;  %vm550_vm6 = vcmp.ge.f32.partialorder %v499_v34, 0.0  ;;  %v489_v45 = vadd.f32 %v1023_v16, %v428_v35  ;;  %v497_v46 = vadd.f32 %v1023_v16, %v460_v36  ;;  %v850_v47 = vpop.f32.mrb[4].mxu0 }
 0x103   : > { %v566_v44 = vmul.f32 0.2, %v499_v34  ;;  %v858_v48 = vpop.f32.mrb[4].mxu1  ;;  %652 = vst.msk [vmem:[%s1034_s17] sm:$0xf] %vm651_vm0, %v796_v41  ;;  %v574_v49 = vsel %vm542_vm5, %v491_v33, %v558_v43  ;;  %v494_v50 = vadd.f32 %v850_v47, %v1023_v16  ;;  %v441_v52 = vpop.f32.mrb[5].mxu0 }
 0x104   : > { %660 = vst.msk [vmem:[%s1034_s17 + $0x20] sm:$0xf] %vm651_vm0, %v804_v42  ;;  %v502_v51 = vadd.f32 %v858_v48, %v1023_v16  ;;  %v473_v53 = vpop.f32.mrb[5].mxu1  ;;  %v799_v54 = vpack.c.bf16 %v574_v49, %v574_v49  ;;  %vm540_vm7 = vcmp.ge.f32.partialorder %v489_v45, 0.0  ;;  %v556_v56 = vmul.f32 0.2, %v489_v45 }
 0x105   : > { %v582_v55 = vsel %vm550_vm6, %v499_v34, %v566_v44  ;;  %v851_v57 = vpop.f32.mrb[6].mxu0  ;;  %v859_v58 = vpop.f32.mrb[6].mxu1  ;;  %vm548_vm8 = vcmp.ge.f32.partialorder %v497_v46, 0.0  ;;  %v564_v60 = vmul.f32 0.2, %v497_v46  ;;  %vm545_vm9 = vcmp.ge.f32.partialorder %v494_v50, 0.0 }
 0x106   : > { %v807_v59 = vpack.c.bf16 %v582_v55, %v582_v55  ;;  %v444_v61 = vpop.f32.mrb[7].mxu0  ;;  %v476_v62 = vpop.f32.mrb[7].mxu1  ;;  %655 = vst.msk [vmem:[%s1034_s17 + $0xc] sm:$0xf] %vm651_vm0, %v799_v54  ;;  %v572_v63 = vsel %vm540_vm7, %v489_v45, %v556_v56  ;;  %v561_v0 = vmul.f32 0.2, %v494_v50  ;;  %v492_v4 = vadd.f32 %v1023_v16, %v441_v52 }
 0x107   : > { %vm553_vm10 = vcmp.ge.f32.partialorder %v502_v51, 0.0  ;;  %v569_v1 = vmul.f32 0.2, %v502_v51  ;;  %v797_v2 = vpack.c.bf16 %v572_v63, %v572_v63  ;;  %v580_v3 = vsel %vm548_vm8, %v497_v46, %v564_v60 }
 0x108   : > { %663 = vst.msk [vmem:[%s1034_s17 + $0x2c] sm:$0xf] %vm651_vm0, %v807_v59  ;;  %v500_v5 = vadd.f32 %v1023_v16, %v473_v53  ;;  %v805_v6 = vpack.c.bf16 %v580_v3, %v580_v3  ;;  %v577_v7 = vsel %vm545_vm9, %v494_v50, %v561_v0  ;;  %v495_v9 = vadd.f32 %v851_v57, %v1023_v16 }
 0x109   : > { %v585_v8 = vsel %vm553_vm10, %v502_v51, %v569_v1  ;;  %653 = vst.msk [vmem:[%s1034_s17 + $0x4] sm:$0xf] %vm651_vm0, %v797_v2  ;;  %v802_v10 = vpack.c.bf16 %v577_v7, %v577_v7  ;;  %vm543_vm11 = vcmp.ge.f32.partialorder %v492_v4, 0.0  ;;  %v559_v12 = vmul.f32 0.2, %v492_v4 }
 0x10a   : > { %v810_v11 = vpack.c.bf16 %v585_v8, %v585_v8  ;;  %661 = vst.msk [vmem:[%s1034_s17 + $0x24] sm:$0xf] %vm651_vm0, %v805_v6  ;;  %vm551_vm12 = vcmp.ge.f32.partialorder %v500_v5, 0.0  ;;  %v567_v13 = vmul.f32 0.2, %v500_v5  ;;  %vm546_vm13 = vcmp.ge.f32.partialorder %v495_v9, 0.0 }
 0x10b   : > { %v562_v14 = vmul.f32 0.2, %v495_v9  ;;  %658 = vst.msk [vmem:[%s1034_s17 + $0x18] sm:$0xf] %vm651_vm0, %v802_v10  ;;  %v575_v15 = vsel %vm543_vm11, %v492_v4, %v559_v12  ;;  %v503_v17 = vadd.f32 %v859_v58, %v1023_v16  ;;  %v493_v18 = vadd.f32 %v1023_v16, %v444_v61 }
 0x10c   : > { %666 = vst.msk [vmem:[%s1034_s17 + $0x38] sm:$0xf] %vm651_vm0, %v810_v11  ;;  %v501_v19 = vadd.f32 %v1023_v16, %v476_v62  ;;  %v800_v20 = vpack.c.bf16 %v575_v15, %v575_v15  ;;  %v583_v21 = vsel %vm551_vm12, %v500_v5, %v567_v13 }
 0x10d   : > { %v578_v22 = vsel %vm546_vm13, %v495_v9, %v562_v14  ;;  %v808_v23 = vpack.c.bf16 %v583_v21, %v583_v21  ;;  %vm554_vm14 = vcmp.ge.f32.partialorder %v503_v17, 0.0  ;;  %v570_v25 = vmul.f32 0.2, %v503_v17 }
 0x10e   : > { %v803_v24 = vpack.c.bf16 %v578_v22, %v578_v22  ;;  %656 = vst.msk [vmem:[%s1034_s17 + $0x10] sm:$0xf] %vm651_vm0, %v800_v20  ;;  %vm544_vm15 = vcmp.ge.f32.partialorder %v493_v18, 0.0  ;;  %v560_v26 = vmul.f32 0.2, %v493_v18  ;;  %vm552_vm1 = vcmp.ge.f32.partialorder %v501_v19, 0.0 }
 0x10f   : > { %v568_v27 = vmul.f32 0.2, %v501_v19  ;;  %664 = vst.msk [vmem:[%s1034_s17 + $0x30] sm:$0xf] %vm651_vm0, %v808_v23  ;;  %v586_v16 = vsel %vm554_vm14, %v503_v17, %v570_v25 }
 0x110   : > { %659 = vst.msk [vmem:[%s1034_s17 + $0x1c] sm:$0xf] %vm651_vm0, %v803_v24  ;;  %v811_v28 = vpack.c.bf16 %v586_v16, %v586_v16  ;;  %v576_v29 = vsel %vm544_vm15, %v493_v18, %v560_v26 }
 0x111   : > { %v584_v30 = vsel %vm552_vm1, %v501_v19, %v568_v27  ;;  %v801_v31 = vpack.c.bf16 %v576_v29, %v576_v29 }
 0x112   : > { %v809_v32 = vpack.c.bf16 %v584_v30, %v584_v30  ;;  %667 = vst.msk [vmem:[%s1034_s17 + $0x3c] sm:$0xf] %vm651_vm0, %v811_v28 }
 0x113   : > { %657 = vst.msk [vmem:[%s1034_s17 + $0x14] sm:$0xf] %vm651_vm0, %v801_v31 }
 0x114   : > { %665 = vst.msk [vmem:[%s1034_s17 + $0x34] sm:$0xf] %vm651_vm0, %v809_v32 }
 0x115 PF: > { %s13_s14 = sadd.s32 1, %s938_s14   ;;  %s1093_s12 = smov %s934_s13 }
 0x116   : > { %p10_p5 = scmp.ge.s32.totalorder %s13_s14, 4   ;;  %s1094_s13 = smov %s1096_s15 }
 0x118   :  { %12 = sbr.rel (!%p10_p5) target bundleno = 2 (0x2), region = 73 }

// kernel: _lambda_.6
= control target key start
LH: loop header
LB: loop body
LE: loop exit
PB: predicated region body
PF: predicated region fallthrough
CT: control target
= control target key end

     0   :  { %vm586_vm1 = vcmask 125952   ;;  %s993_s1 = inlined_call_operand.vmem [shape: bf16[512,128], index: 1, kind: input, shape index: {}]   ;;  %s994_s0 = inlined_call_operand.vmem [shape: bf16[56,512], index: 0, kind: input, shape index: {}]   ;;  %s995_s2 = inlined_call_operand.vmem [shape: f32[1,128], index: 2, kind: input, shape index: {}]   ;;  %s996_s3 = inlined_call_operand.vmem [shape: bf16[56,16], index: 3, kind: output, shape index: {}]  }
   0x1   :  { %v741_v0 = vld [vmem:[%s993_s1 + $0x40] sm:$0xff]   ;;  %v745_v4 = vld [vmem:[%s993_s1 + $0x48] sm:$0xff]   ;;  %v749_v8 = vld [vmem:[%s993_s1 + $0x50] sm:$0xff]  }
   0x2   :  { %v742_v1 = vld [vmem:[%s993_s1 + $0xc0] sm:$0xff]   ;;  %661 = vmatprep.subr.bf16.mxu0 %v741_v0  ;;  %v746_v5 = vld [vmem:[%s993_s1 + $0xc8] sm:$0xff]   ;;  %v750_v9 = vld [vmem:[%s993_s1 + $0xd0] sm:$0xff]  }
   0x3   :  { %v743_v2 = vld [vmem:[%s993_s1] sm:$0xff]   ;;  %701 = vmatprep.subr.bf16.mxu1 %v742_v1  ;;  %v747_v6 = vld [vmem:[%s993_s1 + $0x8] sm:$0xff]   ;;  %v751_v10 = vld [vmem:[%s993_s1 + $0x10] sm:$0xff]  }
   0x4   :  { %v744_v3 = vld [vmem:[%s993_s1 + $0x80] sm:$0xff]   ;;  %662 = vmatpush3.bf16.msra.mxu0 %v743_v2  ;;  %v748_v7 = vld [vmem:[%s993_s1 + $0x88] sm:$0xff]   ;;  %v752_v11 = vld [vmem:[%s993_s1 + $0x90] sm:$0xff]  }
   0x5   :  { %702 = vmatpush3.bf16.msra.mxu1 %v744_v3  ;;  %663 = vmatprep.subr.bf16.mxu0 %v745_v4  ;;  %v753_v12 = vld [vmem:[%s993_s1 + $0x58] sm:$0xff]   ;;  %v757_v16 = vld [vmem:[%s993_s1 + $0x60] sm:$0xff]   ;;  %v761_v20 = vld [vmem:[%s993_s1 + $0x68] sm:$0xff]  }
   0x6   :  { %703 = vmatprep.subr.bf16.mxu1 %v746_v5  ;;  %v754_v13 = vld [vmem:[%s993_s1 + $0xd8] sm:$0xff]   ;;  %v758_v17 = vld [vmem:[%s993_s1 + $0xe0] sm:$0xff]   ;;  %v762_v21 = vld [vmem:[%s993_s1 + $0xe8] sm:$0xff]  }
   0x7   :  { %v755_v14 = vld [vmem:[%s993_s1 + $0x18] sm:$0xff]   ;;  %v759_v18 = vld [vmem:[%s993_s1 + $0x20] sm:$0xff]   ;;  %v763_v22 = vld [vmem:[%s993_s1 + $0x28] sm:$0xff]  }
   0x8   :  { %664 = vmatpush3.bf16.msra.mxu0 %v747_v6  ;;  %v756_v15 = vld [vmem:[%s993_s1 + $0x98] sm:$0xff]   ;;  %v760_v19 = vld [vmem:[%s993_s1 + $0xa0] sm:$0xff]   ;;  %v764_v23 = vld [vmem:[%s993_s1 + $0xa8] sm:$0xff]  }
   0x9   :  { %704 = vmatpush3.bf16.msra.mxu1 %v748_v7  ;;  %665 = vmatprep.subr.bf16.mxu0 %v749_v8  ;;  %v765_v24 = vld [vmem:[%s993_s1 + $0x70] sm:$0xff]   ;;  %v769_v28 = vld [vmem:[%s993_s1 + $0x78] sm:$0xff]   ;;  %v52_v42 = vld [vmem:[%s994_s0 + $0x60] sm:$0xff] }
   0xa   :  { %705 = vmatprep.subr.bf16.mxu1 %v750_v9  ;;  %v766_v25 = vld [vmem:[%s993_s1 + $0xf0] sm:$0xff]   ;;  %v770_v29 = vld [vmem:[%s993_s1 + $0xf8] sm:$0xff]   ;;  %v53_v43 = vld [vmem:[%s994_s0 + $0x68] sm:$0xff]  ;;  %v612_v46 = vcombine.high %v52_v42, %v52_v42  ;;  %v611_v48 = vcombine.low %v52_v42, %v52_v42 }
   0xb   :  { %v767_v26 = vld [vmem:[%s993_s1 + $0x30] sm:$0xff]   ;;  %v771_v30 = vld [vmem:[%s993_s1 + $0x38] sm:$0xff]   ;;  %v614_v47 = vcombine.high %v53_v43, %v53_v43  ;;  %v613_v49 = vcombine.low %v53_v43, %v53_v43  ;;  %v956_v59 = vld [vmem:[%s995_s2] ss:$0 sm:$0xff] }
   0xc   :  { %666 = vmatpush3.bf16.msra.mxu0 %v751_v10  ;;  %v768_v27 = vld [vmem:[%s993_s1 + $0xb0] sm:$0xff]   ;;  %v772_v31 = vld [vmem:[%s993_s1 + $0xb8] sm:$0xff]  }
   0xd   :  { %706 = vmatpush3.bf16.msra.mxu1 %v752_v11  ;;  %667 = vmatprep.subr.bf16.mxu0 %v753_v12  ;;  %v773_v32 = vld [vmem:[%s994_s0] ss:$16 sps:$4 sm:$0xff]   ;;  %v775_v33 = vld [vmem:[%s994_s0 + $0x4] ss:$16 sps:$4 sm:$0xff]   ;;  %v776_v34 = vld [vmem:[%s994_s0 + $0x8] ss:$16 sps:$4 sm:$0xff]  }
   0xe   :  { %707 = vmatprep.subr.bf16.mxu1 %v754_v13  ;;  %v778_v35 = vld [vmem:[%s994_s0 + $0xc] ss:$16 sps:$4 sm:$0xff]   ;;  %416 = vmatprep.mubr.bf16.mxu0 %v775_v33  ;;  %v779_v36 = vld [vmem:[%s994_s0 + $0x24] ss:$16 sps:$4 sm:$0xff]   ;;  %v783_v38 = vld [vmem:[%s994_s0 + $0x20] ss:$16 sps:$4 sm:$0xff]  }
   0xf   :  { %480 = vmatprep.mubr.bf16.mxu1 %v778_v35  ;;  %v781_v37 = vld [vmem:[%s994_s0 + $0x2c] ss:$16 sps:$4 sm:$0xff]   ;;  %v784_v39 = vld [vmem:[%s994_s0 + $0x28] ss:$16 sps:$4 sm:$0xff]   ;;  %v785_v40 = vld [vmem:[%s994_s0 + $0x44] ss:$16 sps:$4 sm:$0xff]  }
  0x10   :  { %668 = vmatpush3.bf16.msra.mxu0 %v755_v14  ;;  %v787_v41 = vld [vmem:[%s994_s0 + $0x4c] ss:$16 sps:$4 sm:$0xff]   ;;  %v789_v44 = vld [vmem:[%s994_s0 + $0x40] ss:$16 sps:$4 sm:$0xff]   ;;  %v790_v45 = vld [vmem:[%s994_s0 + $0x48] ss:$16 sps:$4 sm:$0xff]  }
  0x11   :  { %708 = vmatpush3.bf16.msra.mxu1 %v756_v15  ;;  %669 = vmatprep.subr.bf16.mxu0 %v757_v16 }
  0x12   :  { %709 = vmatprep.subr.bf16.mxu1 %v758_v17 }
  0x14   :  { %670 = vmatpush3.bf16.msra.mxu0 %v759_v18 }
  0x15   :  { %710 = vmatpush3.bf16.msra.mxu1 %v760_v19  ;;  %671 = vmatprep.subr.bf16.mxu0 %v761_v20 }
  0x16   :  { %711 = vmatprep.subr.bf16.mxu1 %v762_v21 }
  0x18   :  { %672 = vmatpush3.bf16.msra.mxu0 %v763_v22 }
  0x19   :  { %712 = vmatpush3.bf16.msra.mxu1 %v764_v23  ;;  %673 = vmatprep.subr.bf16.mxu0 %v765_v24 }
  0x1a   :  { %713 = vmatprep.subr.bf16.mxu1 %v766_v25 }
  0x1c   :  { %674 = vmatpush3.bf16.msra.mxu0 %v767_v26 }
  0x1d   :  { %714 = vmatpush3.bf16.msra.mxu1 %v768_v27  ;;  %675 = vmatprep.subr.bf16.mxu0 %v769_v28 }
  0x1e   :  { %715 = vmatprep.subr.bf16.mxu1 %v770_v29 }
  0x20   :  { %676 = vmatpush3.bf16.msra.mxu0 %v771_v30 }
  0x21   :  { %716 = vmatpush3.bf16.msra.mxu1 %v772_v31 }
  0x23   :  { %417 = vmatmul.mubr.bf16.vlgmr.msra.gmra.mrb[0].mxu0 %v773_v32 }
  0x24   :  { %481 = vmatmul.mubr.bf16.vlgmr.msra.gmra.mrb[0].mxu1 %v776_v34  ;;  %424 = vmatprep.mubr.bf16.mxu0 %v779_v36 }
  0x25   :  { %488 = vmatprep.mubr.bf16.mxu1 %v781_v37 }
  0x2b   :  { %425 = vmatmul.mubr.bf16.gmra.mrb[4].mxu0 %v783_v38 }
  0x2c   :  { %489 = vmatmul.mubr.bf16.gmra.mrb[4].mxu1 %v784_v39  ;;  %432 = vmatprep.mubr.bf16.mxu0 %v785_v40 }
  0x2d   :  { %496 = vmatprep.mubr.bf16.mxu1 %v787_v41 }
  0x33   :  { %433 = vmatmul.mubr.bf16.gmra.mrb[8].mxu0 %v789_v44 }
  0x34   :  { %497 = vmatmul.mubr.bf16.gmra.mrb[8].mxu1 %v790_v45  ;;  %440 = vmatprep.mubr.bf16.mxu0 %v612_v46 }
  0x35   :  { %504 = vmatprep.mubr.bf16.mxu1 %v614_v47 }
  0x3b   :  { %441 = vmatmul.mubr.bf16.gmra.mrb[12].mxu0 %v611_v48 }
  0x3c   :  { %505 = vmatmul.mubr.bf16.gmra.mrb[12].mxu1 %v613_v49 }
  0xf6   :  { %v677_v50 = vpop.f32.mrb[0].mxu0 }
  0xf7   :  { %v717_v51 = vpop.f32.mrb[0].mxu1  ;;  %v678_v52 = vpop.f32.mrb[1].mxu0 }
  0xf8   :  { %v679_v53 = vadd.f32 %v678_v52, %v677_v50  ;;  %v718_v54 = vpop.f32.mrb[1].mxu1  ;;  %v680_v55 = vpop.f32.mrb[2].mxu0 }
  0xf9   :  { %v719_v56 = vadd.f32 %v718_v54, %v717_v51  ;;  %v720_v57 = vpop.f32.mrb[2].mxu1  ;;  %v681_v58 = vpop.f32.mrb[3].mxu0 }
  0xfa   :  { %v682_v60 = vadd.f32 %v681_v58, %v680_v55  ;;  %v721_v61 = vpop.f32.mrb[3].mxu1 }
  0xfb   :  { %v483_v62 = vadd.f32 %v719_v56, %v679_v53  ;;  %v722_v63 = vadd.f32 %v721_v61, %v720_v57 }
  0xfd   :  { %v512_v0 = vadd.f32 %v956_v59, %v483_v62  ;;  %v486_v1 = vadd.f32 %v722_v63, %v682_v60 }
  0xfe   :  { %v683_v2 = vpop.f32.mrb[4].mxu0 }
  0xff   :  { %vm536_vm0 = vcmp.ge.f32.partialorder %v512_v0, 0.0  ;;  %v543_v3 = vmul.f32 0.2, %v512_v0  ;;  %v513_v4 = vadd.f32 %v956_v59, %v486_v1  ;;  %v723_v5 = vpop.f32.mrb[4].mxu1  ;;  %v684_v6 = vpop.f32.mrb[5].mxu0 }
 0x100   :  { %v685_v7 = vadd.f32 %v684_v6, %v683_v2  ;;  %v724_v8 = vpop.f32.mrb[5].mxu1  ;;  %v686_v9 = vpop.f32.mrb[6].mxu0 }
 0x101   :  { %v550_v10 = vsel %vm536_vm0, %v512_v0, %v543_v3  ;;  %vm537_vm2 = vcmp.ge.f32.partialorder %v513_v4, 0.0  ;;  %v544_v11 = vmul.f32 0.2, %v513_v4  ;;  %v725_v12 = vadd.f32 %v724_v8, %v723_v5  ;;  %v726_v13 = vpop.f32.mrb[6].mxu1  ;;  %v687_v14 = vpop.f32.mrb[7].mxu0 }
 0x102   :  { %v654_v15 = vpack.c.bf16 %v550_v10, %v550_v10  ;;  %v688_v16 = vadd.f32 %v687_v14, %v686_v9  ;;  %v727_v17 = vpop.f32.mrb[7].mxu1 }
 0x103   :  { %v551_v18 = vsel %vm537_vm2, %v513_v4, %v544_v11  ;;  %v491_v19 = vadd.f32 %v725_v12, %v685_v7  ;;  %v728_v20 = vadd.f32 %v727_v17, %v726_v13 }
 0x104   :  { %587 = vst.msk [vmem:[%s996_s3] sm:$0xf] %vm586_vm1, %v654_v15  ;;  %v655_v21 = vpack.c.bf16 %v551_v18, %v551_v18 }
 0x105   :  { %v514_v22 = vadd.f32 %v956_v59, %v491_v19  ;;  %v494_v23 = vadd.f32 %v728_v20, %v688_v16 }
 0x106   :  { %588 = vst.msk [vmem:[%s996_s3 + $0x4] sm:$0xf] %vm586_vm1, %v655_v21  ;;  %v689_v24 = vpop.f32.mrb[8].mxu0 }
 0x107   :  { %vm538_vm3 = vcmp.ge.f32.partialorder %v514_v22, 0.0  ;;  %v545_v25 = vmul.f32 0.2, %v514_v22  ;;  %v515_v26 = vadd.f32 %v956_v59, %v494_v23  ;;  %v729_v27 = vpop.f32.mrb[8].mxu1  ;;  %v690_v28 = vpop.f32.mrb[9].mxu0 }
 0x108   :  { %v691_v29 = vadd.f32 %v690_v28, %v689_v24  ;;  %v730_v30 = vpop.f32.mrb[9].mxu1  ;;  %v692_v31 = vpop.f32.mrb[10].mxu0 }
 0x109   :  { %v552_v32 = vsel %vm538_vm3, %v514_v22, %v545_v25  ;;  %vm539_vm4 = vcmp.ge.f32.partialorder %v515_v26, 0.0  ;;  %v546_v33 = vmul.f32 0.2, %v515_v26  ;;  %v731_v34 = vadd.f32 %v730_v30, %v729_v27  ;;  %v732_v35 = vpop.f32.mrb[10].mxu1  ;;  %v693_v36 = vpop.f32.mrb[11].mxu0 }
 0x10a   :  { %v656_v37 = vpack.c.bf16 %v552_v32, %v552_v32  ;;  %v694_v38 = vadd.f32 %v693_v36, %v692_v31  ;;  %v733_v39 = vpop.f32.mrb[11].mxu1 }
 0x10b   :  { %v553_v40 = vsel %vm539_vm4, %v515_v26, %v546_v33  ;;  %v499_v41 = vadd.f32 %v731_v34, %v691_v29  ;;  %v734_v42 = vadd.f32 %v733_v39, %v732_v35 }
 0x10c   :  { %589 = vst.msk [vmem:[%s996_s3 + $0x8] sm:$0xf] %vm586_vm1, %v656_v37  ;;  %v657_v43 = vpack.c.bf16 %v553_v40, %v553_v40 }
 0x10d   :  { %v516_v44 = vadd.f32 %v956_v59, %v499_v41  ;;  %v502_v45 = vadd.f32 %v734_v42, %v694_v38 }
 0x10e   :  { %590 = vst.msk [vmem:[%s996_s3 + $0xc] sm:$0xf] %vm586_vm1, %v657_v43  ;;  %v695_v46 = vpop.f32.mrb[12].mxu0 }
 0x10f   :  { %vm540_vm5 = vcmp.ge.f32.partialorder %v516_v44, 0.0  ;;  %v547_v47 = vmul.f32 0.2, %v516_v44  ;;  %v517_v48 = vadd.f32 %v956_v59, %v502_v45  ;;  %v735_v49 = vpop.f32.mrb[12].mxu1  ;;  %v696_v50 = vpop.f32.mrb[13].mxu0 }
 0x110   :  { %v697_v51 = vadd.f32 %v696_v50, %v695_v46  ;;  %v736_v52 = vpop.f32.mrb[13].mxu1  ;;  %v698_v53 = vpop.f32.mrb[14].mxu0 }
 0x111   :  { %v554_v54 = vsel %vm540_vm5, %v516_v44, %v547_v47  ;;  %vm541_vm6 = vcmp.ge.f32.partialorder %v517_v48, 0.0  ;;  %v548_v55 = vmul.f32 0.2, %v517_v48  ;;  %v737_v56 = vadd.f32 %v736_v52, %v735_v49  ;;  %v738_v57 = vpop.f32.mrb[14].mxu1  ;;  %v699_v58 = vpop.f32.mrb[15].mxu0 }
 0x112   :  { %v658_v60 = vpack.c.bf16 %v554_v54, %v554_v54  ;;  %v739_v61 = vpop.f32.mrb[15].mxu1 }
 0x113   :  { %v555_v62 = vsel %vm541_vm6, %v517_v48, %v548_v55  ;;  %v507_v63 = vadd.f32 %v737_v56, %v697_v51 }
 0x114   :  { %591 = vst.msk [vmem:[%s996_s3 + $0x10] sm:$0xf] %vm586_vm1, %v658_v60  ;;  %v659_v0 = vpack.c.bf16 %v555_v62, %v555_v62 }
 0x115   :  { %v518_v1 = vadd.f32 %v956_v59, %v507_v63 }
 0x116   :  { %592 = vst.msk [vmem:[%s996_s3 + $0x14] sm:$0xf] %vm586_vm1, %v659_v0 }
 0x117   :  { %vm542_vm7 = vcmp.ge.f32.partialorder %v518_v1, 0.0  ;;  %v549_v2 = vmul.f32 0.2, %v518_v1 }
 0x119   :  { %v556_v3 = vsel %vm542_vm7, %v518_v1, %v549_v2 }
 0x11a   :  { %v660_v4 = vpack.c.bf16 %v556_v3, %v556_v3 }
 0x11c   :  { %593 = vst.msk [vmem:[%s996_s3 + $0x18] sm:$0xf] %vm586_vm1, %v660_v4 }

// kernel: _lambda_.7
= control target key start
LH: loop header
LB: loop body
LE: loop exit
PB: predicated region body
PF: predicated region fallthrough
CT: control target
= control target key end

     0   :  { %vm777_vm1 = vcmask 257024   ;;  %s1258_s1 = inlined_call_operand.vmem [shape: bf16[1024,128], index: 1, kind: input, shape index: {}]   ;;  %s1259_s0 = inlined_call_operand.vmem [shape: bf16[16,1024], index: 0, kind: input, shape index: {}]   ;;  %s1260_s2 = inlined_call_operand.vmem [shape: f32[1,128], index: 2, kind: input, shape index: {}]   ;;  %s1261_s3 = inlined_call_operand.vmem [shape: bf16[16,32], index: 3, kind: output, shape index: {}]  }
   0x1   :  { %v949_v0 = vld [vmem:[%s1258_s1 + $0x40] sm:$0xff]   ;;  %v953_v4 = vld [vmem:[%s1258_s1 + $0x48] sm:$0xff]   ;;  %v957_v8 = vld [vmem:[%s1258_s1 + $0x50] sm:$0xff]  }
   0x2   :  { %v950_v1 = vld [vmem:[%s1258_s1 + $0xc0] sm:$0xff]   ;;  %861 = vmatprep.subr.bf16.mxu0 %v949_v0  ;;  %v954_v5 = vld [vmem:[%s1258_s1 + $0xc8] sm:$0xff]   ;;  %v958_v9 = vld [vmem:[%s1258_s1 + $0xd0] sm:$0xff]  }
   0x3   :  { %v951_v2 = vld [vmem:[%s1258_s1] sm:$0xff]   ;;  %883 = vmatprep.subr.bf16.mxu1 %v950_v1  ;;  %v955_v6 = vld [vmem:[%s1258_s1 + $0x8] sm:$0xff]   ;;  %v959_v10 = vld [vmem:[%s1258_s1 + $0x10] sm:$0xff]  }
   0x4   :  { %v952_v3 = vld [vmem:[%s1258_s1 + $0x80] sm:$0xff]   ;;  %862 = vmatpush3.bf16.msra.mxu0 %v951_v2  ;;  %v956_v7 = vld [vmem:[%s1258_s1 + $0x88] sm:$0xff]   ;;  %v960_v11 = vld [vmem:[%s1258_s1 + $0x90] sm:$0xff]  }
   0x5   :  { %884 = vmatpush3.bf16.msra.mxu1 %v952_v3  ;;  %863 = vmatprep.subr.bf16.mxu0 %v953_v4  ;;  %v961_v12 = vld [vmem:[%s1258_s1 + $0x58] sm:$0xff]   ;;  %v965_v16 = vld [vmem:[%s1258_s1 + $0x60] sm:$0xff]   ;;  %v969_v20 = vld [vmem:[%s1258_s1 + $0x68] sm:$0xff]  }
   0x6   :  { %885 = vmatprep.subr.bf16.mxu1 %v954_v5  ;;  %v962_v13 = vld [vmem:[%s1258_s1 + $0xd8] sm:$0xff]   ;;  %v966_v17 = vld [vmem:[%s1258_s1 + $0xe0] sm:$0xff]   ;;  %v970_v21 = vld [vmem:[%s1258_s1 + $0xe8] sm:$0xff]  }
   0x7   :  { %v963_v14 = vld [vmem:[%s1258_s1 + $0x18] sm:$0xff]   ;;  %v967_v18 = vld [vmem:[%s1258_s1 + $0x20] sm:$0xff]   ;;  %v971_v22 = vld [vmem:[%s1258_s1 + $0x28] sm:$0xff]  }
   0x8   :  { %864 = vmatpush3.bf16.msra.mxu0 %v955_v6  ;;  %v964_v15 = vld [vmem:[%s1258_s1 + $0x98] sm:$0xff]   ;;  %v968_v19 = vld [vmem:[%s1258_s1 + $0xa0] sm:$0xff]   ;;  %v972_v23 = vld [vmem:[%s1258_s1 + $0xa8] sm:$0xff]  }
   0x9   :  { %886 = vmatpush3.bf16.msra.mxu1 %v956_v7  ;;  %865 = vmatprep.subr.bf16.mxu0 %v957_v8  ;;  %v973_v24 = vld [vmem:[%s1258_s1 + $0x70] sm:$0xff]   ;;  %v977_v28 = vld [vmem:[%s1258_s1 + $0x78] sm:$0xff]   ;;  %v30_v32 = vld [vmem:[%s1259_s0] sm:$0xff] }
   0xa   :  { %887 = vmatprep.subr.bf16.mxu1 %v958_v9  ;;  %v974_v25 = vld [vmem:[%s1258_s1 + $0xf0] sm:$0xff]   ;;  %v978_v29 = vld [vmem:[%s1258_s1 + $0xf8] sm:$0xff]   ;;  %v34_v33 = vld [vmem:[%s1259_s0 + $0x20] sm:$0xff] }
   0xb   :  { %v975_v26 = vld [vmem:[%s1258_s1 + $0x30] sm:$0xff]   ;;  %v979_v30 = vld [vmem:[%s1258_s1 + $0x38] sm:$0xff]   ;;  %v31_v34 = vld [vmem:[%s1259_s0 + $0x8] sm:$0xff]  ;;  %v785_v35 = vcombine.low %v30_v32, %v34_v33  ;;  %v786_v36 = vcombine.high %v30_v32, %v34_v33 }
   0xc   :  { %866 = vmatpush3.bf16.msra.mxu0 %v959_v10  ;;  %v976_v27 = vld [vmem:[%s1258_s1 + $0xb0] sm:$0xff]   ;;  %v980_v31 = vld [vmem:[%s1258_s1 + $0xb8] sm:$0xff]   ;;  %v35_v37 = vld [vmem:[%s1259_s0 + $0x28] sm:$0xff] }
   0xd   :  { %888 = vmatpush3.bf16.msra.mxu1 %v960_v11  ;;  %867 = vmatprep.subr.bf16.mxu0 %v961_v12  ;;  %v787_v38 = vcombine.low %v31_v34, %v35_v37  ;;  %v788_v39 = vcombine.high %v31_v34, %v35_v37  ;;  %v981_v40 = vld [vmem:[%s1258_s1 + $0x140] sm:$0xff]   ;;  %v985_v44 = vld [vmem:[%s1258_s1 + $0x148] sm:$0xff]   ;;  %v989_v48 = vld [vmem:[%s1258_s1 + $0x150] sm:$0xff]  }
   0xe   :  { %889 = vmatprep.subr.bf16.mxu1 %v962_v13  ;;  %622 = vmatprep.mubr.bf16.mxu0 %v786_v36  ;;  %v982_v41 = vld [vmem:[%s1258_s1 + $0x1c0] sm:$0xff]   ;;  %v986_v45 = vld [vmem:[%s1258_s1 + $0x1c8] sm:$0xff]   ;;  %v990_v49 = vld [vmem:[%s1258_s1 + $0x1d0] sm:$0xff]  }
   0xf   :  { %663 = vmatprep.mubr.bf16.mxu1 %v788_v39  ;;  %v983_v42 = vld [vmem:[%s1258_s1 + $0x100] sm:$0xff]   ;;  %v987_v46 = vld [vmem:[%s1258_s1 + $0x108] sm:$0xff]   ;;  %v991_v50 = vld [vmem:[%s1258_s1 + $0x110] sm:$0xff]  }
  0x10   :  { %868 = vmatpush3.bf16.msra.mxu0 %v963_v14  ;;  %v984_v43 = vld [vmem:[%s1258_s1 + $0x180] sm:$0xff]   ;;  %v988_v47 = vld [vmem:[%s1258_s1 + $0x188] sm:$0xff]   ;;  %v992_v51 = vld [vmem:[%s1258_s1 + $0x190] sm:$0xff]  }
  0x11   :  { %890 = vmatpush3.bf16.msra.mxu1 %v964_v15  ;;  %869 = vmatprep.subr.bf16.mxu0 %v965_v16  ;;  %v993_v52 = vld [vmem:[%s1258_s1 + $0x158] sm:$0xff]   ;;  %v997_v56 = vld [vmem:[%s1258_s1 + $0x160] sm:$0xff]   ;;  %v1001_v60 = vld [vmem:[%s1258_s1 + $0x168] sm:$0xff]  }
  0x12   :  { %891 = vmatprep.subr.bf16.mxu1 %v966_v17  ;;  %v994_v53 = vld [vmem:[%s1258_s1 + $0x1d8] sm:$0xff]   ;;  %v998_v57 = vld [vmem:[%s1258_s1 + $0x1e0] sm:$0xff]   ;;  %v1002_v61 = vld [vmem:[%s1258_s1 + $0x1e8] sm:$0xff]  }
  0x13   :  { %v995_v54 = vld [vmem:[%s1258_s1 + $0x118] sm:$0xff]   ;;  %v999_v58 = vld [vmem:[%s1258_s1 + $0x120] sm:$0xff]   ;;  %v1003_v62 = vld [vmem:[%s1258_s1 + $0x128] sm:$0xff]  }
  0x14   :  { %870 = vmatpush3.bf16.msra.mxu0 %v967_v18  ;;  %v996_v55 = vld [vmem:[%s1258_s1 + $0x198] sm:$0xff]   ;;  %v1000_v59 = vld [vmem:[%s1258_s1 + $0x1a0] sm:$0xff]   ;;  %v1004_v63 = vld [vmem:[%s1258_s1 + $0x1a8] sm:$0xff]  }
  0x15   :  { %892 = vmatpush3.bf16.msra.mxu1 %v968_v19  ;;  %871 = vmatprep.subr.bf16.mxu0 %v969_v20  ;;  %v1005_v0 = vld [vmem:[%s1258_s1 + $0x170] sm:$0xff]   ;;  %v1009_v4 = vld [vmem:[%s1258_s1 + $0x178] sm:$0xff]  }
  0x16   :  { %893 = vmatprep.subr.bf16.mxu1 %v970_v21  ;;  %v1006_v1 = vld [vmem:[%s1258_s1 + $0x1f0] sm:$0xff]   ;;  %v1010_v5 = vld [vmem:[%s1258_s1 + $0x1f8] sm:$0xff]  }
  0x17   :  { %v1007_v2 = vld [vmem:[%s1258_s1 + $0x130] sm:$0xff]   ;;  %v1011_v6 = vld [vmem:[%s1258_s1 + $0x138] sm:$0xff]  }
  0x18   :  { %872 = vmatpush3.bf16.msra.mxu0 %v971_v22  ;;  %v1008_v3 = vld [vmem:[%s1258_s1 + $0x1b0] sm:$0xff]   ;;  %v1012_v7 = vld [vmem:[%s1258_s1 + $0x1b8] sm:$0xff]  }
  0x19   :  { %894 = vmatpush3.bf16.msra.mxu1 %v972_v23  ;;  %873 = vmatprep.subr.bf16.mxu0 %v973_v24  ;;  %v32_v8 = vld [vmem:[%s1259_s0 + $0x10] sm:$0xff]  ;;  %v33_v12 = vld [vmem:[%s1259_s0 + $0x18] sm:$0xff] }
  0x1a   :  { %895 = vmatprep.subr.bf16.mxu1 %v974_v25  ;;  %v36_v9 = vld [vmem:[%s1259_s0 + $0x30] sm:$0xff]  ;;  %v37_v13 = vld [vmem:[%s1259_s0 + $0x38] sm:$0xff] }
  0x1b   :  { %v789_v10 = vcombine.low %v32_v8, %v36_v9  ;;  %v790_v11 = vcombine.high %v32_v8, %v36_v9  ;;  %v791_v14 = vcombine.low %v33_v12, %v37_v13  ;;  %v792_v15 = vcombine.high %v33_v12, %v37_v13 }
  0x1c   :  { %874 = vmatpush3.bf16.msra.mxu0 %v975_v26 }
  0x1d   :  { %896 = vmatpush3.bf16.msra.mxu1 %v976_v27  ;;  %875 = vmatprep.subr.bf16.mxu0 %v977_v28 }
  0x1e   :  { %897 = vmatprep.subr.bf16.mxu1 %v978_v29 }
  0x20   :  { %876 = vmatpush3.bf16.msra.mxu0 %v979_v30 }
  0x21   :  { %898 = vmatpush3.bf16.msra.mxu1 %v980_v31  ;;  %905 = vmatprep.subr.bf16.mxu0 %v981_v40 }
  0x22   :  { %927 = vmatprep.subr.bf16.mxu1 %v982_v41 }
  0x23   :  { %623 = vmatmul.mubr.bf16.vlgmr.msra.gmra.mrb[0].mxu0 %v785_v35 }
  0x24   :  { %664 = vmatmul.mubr.bf16.vlgmr.msra.gmra.mrb[0].mxu1 %v787_v38  ;;  %906 = vmatpush3.bf16.msra.mxu0 %v983_v42  ;;  %v784_v42 = vld [vmem:[%s1260_s2] ss:$0 sm:$0xff] }
  0x25   :  { %928 = vmatpush3.bf16.msra.mxu1 %v984_v43  ;;  %907 = vmatprep.subr.bf16.mxu0 %v985_v44 }
  0x26   :  { %929 = vmatprep.subr.bf16.mxu1 %v986_v45  ;;  %704 = vmatprep.mubr.bf16.mxu0 %v790_v11 }
  0x27   :  { %745 = vmatprep.mubr.bf16.mxu1 %v792_v15 }
  0x28   :  { %908 = vmatpush3.bf16.msra.mxu0 %v987_v46 }
  0x29   :  { %930 = vmatpush3.bf16.msra.mxu1 %v988_v47  ;;  %909 = vmatprep.subr.bf16.mxu0 %v989_v48 }
  0x2a   :  { %931 = vmatprep.subr.bf16.mxu1 %v990_v49 }
  0x2c   :  { %910 = vmatpush3.bf16.msra.mxu0 %v991_v50 }
  0x2d   :  { %932 = vmatpush3.bf16.msra.mxu1 %v992_v51  ;;  %911 = vmatprep.subr.bf16.mxu0 %v993_v52 }
  0x2e   :  { %933 = vmatprep.subr.bf16.mxu1 %v994_v53 }
  0x30   :  { %912 = vmatpush3.bf16.msra.mxu0 %v995_v54 }
  0x31   :  { %934 = vmatpush3.bf16.msra.mxu1 %v996_v55  ;;  %913 = vmatprep.subr.bf16.mxu0 %v997_v56 }
  0x32   :  { %935 = vmatprep.subr.bf16.mxu1 %v998_v57 }
  0x34   :  { %914 = vmatpush3.bf16.msra.mxu0 %v999_v58 }
  0x35   :  { %936 = vmatpush3.bf16.msra.mxu1 %v1000_v59  ;;  %915 = vmatprep.subr.bf16.mxu0 %v1001_v60 }
  0x36   :  { %937 = vmatprep.subr.bf16.mxu1 %v1002_v61 }
  0x38   :  { %916 = vmatpush3.bf16.msra.mxu0 %v1003_v62 }
  0x39   :  { %938 = vmatpush3.bf16.msra.mxu1 %v1004_v63  ;;  %917 = vmatprep.subr.bf16.mxu0 %v1005_v0 }
  0x3a   :  { %939 = vmatprep.subr.bf16.mxu1 %v1006_v1 }
  0x3c   :  { %918 = vmatpush3.bf16.msra.mxu0 %v1007_v2 }
  0x3d   :  { %940 = vmatpush3.bf16.msra.mxu1 %v1008_v3  ;;  %919 = vmatprep.subr.bf16.mxu0 %v1009_v4 }
  0x3e   :  { %941 = vmatprep.subr.bf16.mxu1 %v1010_v5 }
  0x40   :  { %920 = vmatpush3.bf16.msra.mxu0 %v1011_v6 }
  0x41   :  { %942 = vmatpush3.bf16.msra.mxu1 %v1012_v7 }
  0x43   :  { %705 = vmatmul.mubr.bf16.vlgmr.msra.gmra.mrb[4].mxu0 %v789_v10 }
  0x44   :  { %746 = vmatmul.mubr.bf16.vlgmr.msra.gmra.mrb[4].mxu1 %v791_v14 }
  0xf6   :  { %v877_v16 = vpop.f32.mrb[0].mxu0 }
  0xf7   :  { %v899_v17 = vpop.f32.mrb[0].mxu1  ;;  %v878_v18 = vpop.f32.mrb[1].mxu0 }
  0xf8   :  { %v879_v19 = vadd.f32 %v878_v18, %v877_v16  ;;  %v900_v20 = vpop.f32.mrb[1].mxu1  ;;  %v880_v21 = vpop.f32.mrb[2].mxu0 }
  0xf9   :  { %v901_v22 = vadd.f32 %v900_v20, %v899_v17  ;;  %v902_v23 = vpop.f32.mrb[2].mxu1  ;;  %v881_v24 = vpop.f32.mrb[3].mxu0 }
  0xfa   :  { %v882_v25 = vadd.f32 %v881_v24, %v880_v21  ;;  %v903_v26 = vpop.f32.mrb[3].mxu1 }
  0xfb   :  { %v666_v27 = vadd.f32 %v901_v22, %v879_v19  ;;  %v904_v28 = vadd.f32 %v903_v26, %v902_v23 }
  0xfd   :  { %v669_v29 = vadd.f32 %v904_v28, %v882_v25 }
 0x116   :  { %v921_v30 = vpop.f32.mrb[4].mxu0 }
 0x117   :  { %v943_v31 = vpop.f32.mrb[4].mxu1  ;;  %v922_v32 = vpop.f32.mrb[5].mxu0 }
 0x118   :  { %v923_v33 = vadd.f32 %v922_v32, %v921_v30  ;;  %v944_v34 = vpop.f32.mrb[5].mxu1  ;;  %v924_v35 = vpop.f32.mrb[6].mxu0 }
 0x119   :  { %v945_v36 = vadd.f32 %v944_v34, %v943_v31  ;;  %v946_v37 = vpop.f32.mrb[6].mxu1  ;;  %v925_v38 = vpop.f32.mrb[7].mxu0 }
 0x11a   :  { %v707_v39 = vadd.f32 %v923_v33, %v666_v27  ;;  %v926_v40 = vadd.f32 %v925_v38, %v924_v35  ;;  %v947_v41 = vpop.f32.mrb[7].mxu1 }
 0x11b   :  { %v948_v43 = vadd.f32 %v947_v41, %v946_v37 }
 0x11c   :  { %v748_v44 = vadd.f32 %v945_v36, %v707_v39  ;;  %v710_v45 = vadd.f32 %v926_v40, %v669_v29 }
 0x11e   :  { %v754_v46 = vadd.f32 %v784_v42, %v748_v44  ;;  %v751_v47 = vadd.f32 %v948_v43, %v710_v45 }
 0x120   :  { %vm763_vm0 = vcmp.ge.f32.partialorder %v754_v46, 0.0  ;;  %v765_v48 = vmul.f32 0.2, %v754_v46  ;;  %v755_v49 = vadd.f32 %v784_v42, %v751_v47 }
 0x122   :  { %v767_v50 = vsel %vm763_vm0, %v754_v46, %v765_v48  ;;  %vm764_vm2 = vcmp.ge.f32.partialorder %v755_v49, 0.0  ;;  %v766_v51 = vmul.f32 0.2, %v755_v49 }
 0x123   :  { %v859_v52 = vpack.c.bf16 %v767_v50, %v767_v50 }
 0x124   :  { %v768_v53 = vsel %vm764_vm2, %v755_v49, %v766_v51 }
 0x125   :  { %778 = vst.msk [vmem:[%s1261_s3] sm:$0xf] %vm777_vm1, %v859_v52  ;;  %v860_v54 = vpack.c.bf16 %v768_v53, %v768_v53 }
 0x127   :  { %779 = vst.msk [vmem:[%s1261_s3 + $0x4] sm:$0xf] %vm777_vm1, %v860_v54 }

// kernel: _lambda_.8
= control target key start
LH: loop header
LB: loop body
LE: loop exit
PB: predicated region body
PF: predicated region fallthrough
CT: control target
= control target key end

     0   :  { %vm2002_vm1 = vcmask 519168   ;;  %s3312_s1 = inlined_call_operand.vmem [shape: bf16[2048,128], index: 1, kind: input, shape index: {}]   ;;  %s3313_s0 = inlined_call_operand.vmem [shape: bf16[56,2048], index: 0, kind: input, shape index: {}]   ;;  %s3314_s2 = inlined_call_operand.vmem [shape: f32[1,128], index: 2, kind: input, shape index: {}]   ;;  %s3315_s3 = inlined_call_operand.vmem [shape: bf16[56,64], index: 3, kind: output, shape index: {}]  }
   0x1   :  { %v2541_v0 = vld [vmem:[%s3312_s1 + $0x40] sm:$0xff]   ;;  %v2545_v4 = vld [vmem:[%s3312_s1 + $0x48] sm:$0xff]   ;;  %v2549_v8 = vld [vmem:[%s3312_s1 + $0x50] sm:$0xff]  }
   0x2   :  { %v2542_v1 = vld [vmem:[%s3312_s1 + $0xc0] sm:$0xff]   ;;  %2221 = vmatprep.subr.bf16.mxu0 %v2541_v0  ;;  %v2546_v5 = vld [vmem:[%s3312_s1 + $0xc8] sm:$0xff]   ;;  %v2550_v9 = vld [vmem:[%s3312_s1 + $0xd0] sm:$0xff]  }
   0x3   :  { %v2543_v2 = vld [vmem:[%s3312_s1] sm:$0xff]   ;;  %2261 = vmatprep.subr.bf16.mxu1 %v2542_v1  ;;  %v2547_v6 = vld [vmem:[%s3312_s1 + $0x8] sm:$0xff]   ;;  %v2551_v10 = vld [vmem:[%s3312_s1 + $0x10] sm:$0xff]  }
   0x4   :  { %v2544_v3 = vld [vmem:[%s3312_s1 + $0x80] sm:$0xff]   ;;  %2222 = vmatpush3.bf16.msra.mxu0 %v2543_v2  ;;  %v2548_v7 = vld [vmem:[%s3312_s1 + $0x88] sm:$0xff]   ;;  %v2552_v11 = vld [vmem:[%s3312_s1 + $0x90] sm:$0xff]  }
   0x5   :  { %2262 = vmatpush3.bf16.msra.mxu1 %v2544_v3  ;;  %2223 = vmatprep.subr.bf16.mxu0 %v2545_v4  ;;  %v2553_v12 = vld [vmem:[%s3312_s1 + $0x58] sm:$0xff]   ;;  %v2557_v16 = vld [vmem:[%s3312_s1 + $0x60] sm:$0xff]   ;;  %v2561_v20 = vld [vmem:[%s3312_s1 + $0x68] sm:$0xff]  }
   0x6   :  { %2263 = vmatprep.subr.bf16.mxu1 %v2546_v5  ;;  %v2554_v13 = vld [vmem:[%s3312_s1 + $0xd8] sm:$0xff]   ;;  %v2558_v17 = vld [vmem:[%s3312_s1 + $0xe0] sm:$0xff]   ;;  %v2562_v21 = vld [vmem:[%s3312_s1 + $0xe8] sm:$0xff]  }
   0x7   :  { %v2555_v14 = vld [vmem:[%s3312_s1 + $0x18] sm:$0xff]   ;;  %v2559_v18 = vld [vmem:[%s3312_s1 + $0x20] sm:$0xff]   ;;  %v2563_v22 = vld [vmem:[%s3312_s1 + $0x28] sm:$0xff]  }
   0x8   :  { %2224 = vmatpush3.bf16.msra.mxu0 %v2547_v6  ;;  %v2556_v15 = vld [vmem:[%s3312_s1 + $0x98] sm:$0xff]   ;;  %v2560_v19 = vld [vmem:[%s3312_s1 + $0xa0] sm:$0xff]   ;;  %v2564_v23 = vld [vmem:[%s3312_s1 + $0xa8] sm:$0xff]  }
   0x9   :  { %2264 = vmatpush3.bf16.msra.mxu1 %v2548_v7  ;;  %2225 = vmatprep.subr.bf16.mxu0 %v2549_v8  ;;  %v2565_v24 = vld [vmem:[%s3312_s1 + $0x70] sm:$0xff]   ;;  %v2569_v28 = vld [vmem:[%s3312_s1 + $0x78] sm:$0xff]   ;;  %v40_v32 = vld [vmem:[%s3313_s0] sm:$0xff] }
   0xa   :  { %2265 = vmatprep.subr.bf16.mxu1 %v2550_v9  ;;  %v2566_v25 = vld [vmem:[%s3312_s1 + $0xf0] sm:$0xff]   ;;  %v2570_v29 = vld [vmem:[%s3312_s1 + $0xf8] sm:$0xff]   ;;  %v48_v33 = vld [vmem:[%s3313_s0 + $0x40] sm:$0xff] }
   0xb   :  { %v2567_v26 = vld [vmem:[%s3312_s1 + $0x30] sm:$0xff]   ;;  %v2571_v30 = vld [vmem:[%s3312_s1 + $0x38] sm:$0xff]   ;;  %v41_v34 = vld [vmem:[%s3313_s0 + $0x8] sm:$0xff]  ;;  %v2015_v35 = vcombine.low %v40_v32, %v48_v33  ;;  %v2016_v36 = vcombine.high %v40_v32, %v48_v33 }
   0xc   :  { %2226 = vmatpush3.bf16.msra.mxu0 %v2551_v10  ;;  %v2568_v27 = vld [vmem:[%s3312_s1 + $0xb0] sm:$0xff]   ;;  %v2572_v31 = vld [vmem:[%s3312_s1 + $0xb8] sm:$0xff]   ;;  %v49_v37 = vld [vmem:[%s3313_s0 + $0x48] sm:$0xff] }
   0xd   :  { %2266 = vmatpush3.bf16.msra.mxu1 %v2552_v11  ;;  %2227 = vmatprep.subr.bf16.mxu0 %v2553_v12  ;;  %v2017_v38 = vcombine.low %v41_v34, %v49_v37  ;;  %v2018_v39 = vcombine.high %v41_v34, %v49_v37  ;;  %v2573_v40 = vld [vmem:[%s3312_s1 + $0x140] sm:$0xff]   ;;  %v2577_v44 = vld [vmem:[%s3312_s1 + $0x148] sm:$0xff]   ;;  %v2581_v56 = vld [vmem:[%s3312_s1 + $0x150] sm:$0xff]  }
   0xe   :  { %2267 = vmatprep.subr.bf16.mxu1 %v2554_v13  ;;  %1448 = vmatprep.mubr.bf16.mxu0 %v2016_v36  ;;  %v2574_v41 = vld [vmem:[%s3312_s1 + $0x1c0] sm:$0xff]   ;;  %v2578_v45 = vld [vmem:[%s3312_s1 + $0x1c8] sm:$0xff]   ;;  %v2582_v57 = vld [vmem:[%s3312_s1 + $0x1d0] sm:$0xff]  }
   0xf   :  { %1512 = vmatprep.mubr.bf16.mxu1 %v2018_v39  ;;  %v2575_v42 = vld [vmem:[%s3312_s1 + $0x100] sm:$0xff]   ;;  %v2579_v46 = vld [vmem:[%s3312_s1 + $0x108] sm:$0xff]   ;;  %v2583_v58 = vld [vmem:[%s3312_s1 + $0x110] sm:$0xff]  }
  0x10   :  { %2228 = vmatpush3.bf16.msra.mxu0 %v2555_v14  ;;  %v2576_v43 = vld [vmem:[%s3312_s1 + $0x180] sm:$0xff]   ;;  %v2580_v47 = vld [vmem:[%s3312_s1 + $0x188] sm:$0xff]   ;;  %v2584_v59 = vld [vmem:[%s3312_s1 + $0x190] sm:$0xff]  }
  0x11   :  { %2268 = vmatpush3.bf16.msra.mxu1 %v2556_v15  ;;  %2229 = vmatprep.subr.bf16.mxu0 %v2557_v16  ;;  %v56_v48 = vld [vmem:[%s3313_s0 + $0x80] sm:$0xff]  ;;  %v57_v51 = vld [vmem:[%s3313_s0 + $0x88] sm:$0xff]  ;;  %v2585_v60 = vld [vmem:[%s3312_s1 + $0x158] sm:$0xff]  }
  0x12   :  { %2269 = vmatprep.subr.bf16.mxu1 %v2558_v17  ;;  %v64_v49 = vld [vmem:[%s3313_s0 + $0xc0] sm:$0xff]  ;;  %v65_v52 = vld [vmem:[%s3313_s0 + $0xc8] sm:$0xff]  ;;  %v2586_v61 = vld [vmem:[%s3312_s1 + $0x1d8] sm:$0xff]  }
  0x13   :  { %v2032_v50 = vcombine.high %v56_v48, %v64_v49  ;;  %v2031_v53 = vcombine.low %v56_v48, %v64_v49  ;;  %v2034_v54 = vcombine.high %v57_v51, %v65_v52  ;;  %v2033_v55 = vcombine.low %v57_v51, %v65_v52  ;;  %v2587_v62 = vld [vmem:[%s3312_s1 + $0x118] sm:$0xff]   ;;  %v72_v0 = vld [vmem:[%s3313_s0 + $0x100] sm:$0xff]  ;;  %v73_v2 = vld [vmem:[%s3313_s0 + $0x108] sm:$0xff] }
  0x14   :  { %2230 = vmatpush3.bf16.msra.mxu0 %v2559_v18  ;;  %v2588_v63 = vld [vmem:[%s3312_s1 + $0x198] sm:$0xff]   ;;  %v80_v1 = vld [vmem:[%s3313_s0 + $0x140] sm:$0xff]  ;;  %v81_v3 = vld [vmem:[%s3313_s0 + $0x148] sm:$0xff] }
  0x15   :  { %2270 = vmatpush3.bf16.msra.mxu1 %v2560_v19  ;;  %2231 = vmatprep.subr.bf16.mxu0 %v2561_v20  ;;  %v2048_v4 = vcombine.high %v72_v0, %v80_v1  ;;  %v2050_v5 = vcombine.high %v73_v2, %v81_v3  ;;  %v2047_v6 = vcombine.low %v72_v0, %v80_v1  ;;  %v2589_v8 = vld [vmem:[%s3312_s1 + $0x160] sm:$0xff]   ;;  %v2593_v12 = vld [vmem:[%s3312_s1 + $0x168] sm:$0xff]   ;;  %v43_v32 = vld [vmem:[%s3313_s0 + $0x18] sm:$0xff] }
  0x16   :  { %2271 = vmatprep.subr.bf16.mxu1 %v2562_v21  ;;  %v2049_v7 = vcombine.low %v73_v2, %v81_v3  ;;  %v2590_v9 = vld [vmem:[%s3312_s1 + $0x1e0] sm:$0xff]   ;;  %v2594_v13 = vld [vmem:[%s3312_s1 + $0x1e8] sm:$0xff]   ;;  %v2601_v21 = vld [vmem:[%s3312_s1 + $0x170] sm:$0xff]  }
  0x17   :  { %v2591_v10 = vld [vmem:[%s3312_s1 + $0x120] sm:$0xff]   ;;  %v2595_v14 = vld [vmem:[%s3312_s1 + $0x128] sm:$0xff]   ;;  %v51_v33 = vld [vmem:[%s3313_s0 + $0x58] sm:$0xff] }
  0x18   :  { %2232 = vmatpush3.bf16.msra.mxu0 %v2563_v22  ;;  %v2592_v11 = vld [vmem:[%s3312_s1 + $0x1a0] sm:$0xff]   ;;  %v2596_v15 = vld [vmem:[%s3312_s1 + $0x1a8] sm:$0xff]   ;;  %v2021_v36 = vcombine.low %v43_v32, %v51_v33  ;;  %v59_v48 = vld [vmem:[%s3313_s0 + $0x98] sm:$0xff] }
  0x19   :  { %2272 = vmatpush3.bf16.msra.mxu1 %v2564_v23  ;;  %2233 = vmatprep.subr.bf16.mxu0 %v2565_v24  ;;  %v88_v16 = vld [vmem:[%s3313_s0 + $0x180] sm:$0xff]  ;;  %v89_v17 = vld [vmem:[%s3313_s0 + $0x188] sm:$0xff]  ;;  %v2602_v23 = vld [vmem:[%s3312_s1 + $0x1f0] sm:$0xff]  }
  0x1a   :  { %2273 = vmatprep.subr.bf16.mxu1 %v2566_v25  ;;  %v2064_v18 = vcombine.high %v88_v16, %v88_v16  ;;  %v2066_v19 = vcombine.high %v89_v17, %v89_v17  ;;  %v2063_v20 = vcombine.low %v88_v16, %v88_v16  ;;  %v2065_v22 = vcombine.low %v89_v17, %v89_v17  ;;  %v2603_v24 = vld [vmem:[%s3312_s1 + $0x130] sm:$0xff]   ;;  %v2609_v37 = vld [vmem:[%s3312_s1 + $0x240] sm:$0xff]   ;;  %v75_v1 = vld [vmem:[%s3313_s0 + $0x118] sm:$0xff] }
  0x1b   :  { %v2604_v25 = vld [vmem:[%s3312_s1 + $0x1b0] sm:$0xff]   ;;  %v2610_v39 = vld [vmem:[%s3312_s1 + $0x2c0] sm:$0xff]   ;;  %v83_v2 = vld [vmem:[%s3313_s0 + $0x158] sm:$0xff] }
  0x1c   :  { %2234 = vmatpush3.bf16.msra.mxu0 %v2567_v26  ;;  %v2605_v26 = vld [vmem:[%s3312_s1 + $0x178] sm:$0xff]  }
  0x1d   :  { %2274 = vmatpush3.bf16.msra.mxu1 %v2568_v27  ;;  %2235 = vmatprep.subr.bf16.mxu0 %v2569_v28  ;;  %v2606_v27 = vld [vmem:[%s3312_s1 + $0x1f8] sm:$0xff]  }
  0x1e   :  { %2275 = vmatprep.subr.bf16.mxu1 %v2570_v29  ;;  %v2607_v28 = vld [vmem:[%s3312_s1 + $0x138] sm:$0xff]  }
  0x1f   :  { %v2608_v29 = vld [vmem:[%s3312_s1 + $0x1b8] sm:$0xff]  }
  0x20   :  { %2236 = vmatpush3.bf16.msra.mxu0 %v2571_v30  ;;  %v42_v30 = vld [vmem:[%s3313_s0 + $0x10] sm:$0xff]  ;;  %v91_v16 = vld [vmem:[%s3313_s0 + $0x198] sm:$0xff] }
  0x21   :  { %2276 = vmatpush3.bf16.msra.mxu1 %v2572_v31  ;;  %2301 = vmatprep.subr.bf16.mxu0 %v2573_v40  ;;  %v50_v31 = vld [vmem:[%s3313_s0 + $0x50] sm:$0xff]  ;;  %v2611_v40 = vld [vmem:[%s3312_s1 + $0x200] sm:$0xff]  }
  0x22   :  { %2341 = vmatprep.subr.bf16.mxu1 %v2574_v41  ;;  %v2019_v34 = vcombine.low %v42_v30, %v50_v31  ;;  %v2612_v41 = vld [vmem:[%s3312_s1 + $0x280] sm:$0xff]  }
  0x23   :  { %1449 = vmatmul.mubr.bf16.vlgmr.msra.gmra.mrb[0].mxu0 %v2015_v35  ;;  %v2020_v35 = vcombine.high %v42_v30, %v50_v31 }
  0x24   :  { %1513 = vmatmul.mubr.bf16.vlgmr.msra.gmra.mrb[0].mxu1 %v2017_v38  ;;  %2302 = vmatpush3.bf16.msra.mxu0 %v2575_v42  ;;  %v2022_v38 = vcombine.high %v43_v32, %v51_v33  ;;  %v2613_v42 = vld [vmem:[%s3312_s1 + $0x248] sm:$0xff]  }
  0x25   :  { %2342 = vmatpush3.bf16.msra.mxu1 %v2576_v43  ;;  %2303 = vmatprep.subr.bf16.mxu0 %v2577_v44  ;;  %v2614_v43 = vld [vmem:[%s3312_s1 + $0x2c8] sm:$0xff]  }
  0x26   :  { %2343 = vmatprep.subr.bf16.mxu1 %v2578_v45  ;;  %1456 = vmatprep.mubr.bf16.mxu0 %v2032_v50  ;;  %v2615_v44 = vld [vmem:[%s3312_s1 + $0x208] sm:$0xff]   ;;  %v67_v50 = vld [vmem:[%s3313_s0 + $0xd8] sm:$0xff] }
  0x27   :  { %1520 = vmatprep.mubr.bf16.mxu1 %v2034_v54  ;;  %v2616_v45 = vld [vmem:[%s3312_s1 + $0x288] sm:$0xff]   ;;  %v2038_v52 = vcombine.high %v59_v48, %v67_v50  ;;  %v2617_v54 = vld [vmem:[%s3312_s1 + $0x250] sm:$0xff]  }
  0x28   :  { %2304 = vmatpush3.bf16.msra.mxu0 %v2579_v46  ;;  %v58_v46 = vld [vmem:[%s3313_s0 + $0x90] sm:$0xff]  ;;  %v45_v32 = vld [vmem:[%s3313_s0 + $0x28] sm:$0xff] }
  0x29   :  { %2344 = vmatpush3.bf16.msra.mxu1 %v2580_v47  ;;  %2305 = vmatprep.subr.bf16.mxu0 %v2581_v56  ;;  %v66_v47 = vld [vmem:[%s3313_s0 + $0xd0] sm:$0xff]  ;;  %v53_v33 = vld [vmem:[%s3313_s0 + $0x68] sm:$0xff] }
  0x2a   :  { %2345 = vmatprep.subr.bf16.mxu1 %v2582_v57  ;;  %v2036_v49 = vcombine.high %v58_v46, %v66_v47  ;;  %v2035_v51 = vcombine.low %v58_v46, %v66_v47  ;;  %v2619_v56 = vld [vmem:[%s3312_s1 + $0x210] sm:$0xff]   ;;  %v61_v46 = vld [vmem:[%s3313_s0 + $0xa8] sm:$0xff] }
  0x2b   :  { %1457 = vmatmul.mubr.bf16.gmra.mrb[4].mxu0 %v2031_v53  ;;  %v2037_v53 = vcombine.low %v59_v48, %v67_v50  ;;  %v2620_v57 = vld [vmem:[%s3312_s1 + $0x290] sm:$0xff]   ;;  %v69_v47 = vld [vmem:[%s3313_s0 + $0xe8] sm:$0xff] }
  0x2c   :  { %1521 = vmatmul.mubr.bf16.gmra.mrb[4].mxu1 %v2033_v55  ;;  %2306 = vmatpush3.bf16.msra.mxu0 %v2583_v58  ;;  %v2618_v55 = vld [vmem:[%s3312_s1 + $0x2d0] sm:$0xff]   ;;  %v2621_v58 = vld [vmem:[%s3312_s1 + $0x258] sm:$0xff]  }
  0x2d   :  { %2346 = vmatpush3.bf16.msra.mxu1 %v2584_v59  ;;  %2307 = vmatprep.subr.bf16.mxu0 %v2585_v60  ;;  %v2622_v59 = vld [vmem:[%s3312_s1 + $0x2d8] sm:$0xff]  }
  0x2e   :  { %2347 = vmatprep.subr.bf16.mxu1 %v2586_v61  ;;  %1464 = vmatprep.mubr.bf16.mxu0 %v2048_v4  ;;  %v2623_v60 = vld [vmem:[%s3312_s1 + $0x218] sm:$0xff]   ;;  %v2054_v4 = vcombine.high %v75_v1, %v83_v2 }
  0x2f   :  { %1528 = vmatprep.mubr.bf16.mxu1 %v2050_v5  ;;  %v2624_v61 = vld [vmem:[%s3312_s1 + $0x298] sm:$0xff]   ;;  %v2053_v5 = vcombine.low %v75_v1, %v83_v2 }
  0x30   :  { %2308 = vmatpush3.bf16.msra.mxu0 %v2587_v62  ;;  %v74_v62 = vld [vmem:[%s3313_s0 + $0x110] sm:$0xff] }
  0x31   :  { %2348 = vmatpush3.bf16.msra.mxu1 %v2588_v63  ;;  %2309 = vmatprep.subr.bf16.mxu0 %v2589_v8  ;;  %v82_v63 = vld [vmem:[%s3313_s0 + $0x150] sm:$0xff]  ;;  %v2627_v8 = vld [vmem:[%s3312_s1 + $0x220] sm:$0xff]  }
  0x32   :  { %2349 = vmatprep.subr.bf16.mxu1 %v2590_v9  ;;  %v2052_v0 = vcombine.high %v74_v62, %v82_v63  ;;  %v2051_v3 = vcombine.low %v74_v62, %v82_v63  ;;  %v2628_v9 = vld [vmem:[%s3312_s1 + $0x2a0] sm:$0xff]   ;;  %v77_v62 = vld [vmem:[%s3313_s0 + $0x128] sm:$0xff] }
  0x33   :  { %1465 = vmatmul.mubr.bf16.gmra.mrb[8].mxu0 %v2047_v6  ;;  %v2625_v6 = vld [vmem:[%s3312_s1 + $0x260] sm:$0xff]  }
  0x34   :  { %1529 = vmatmul.mubr.bf16.gmra.mrb[8].mxu1 %v2049_v7  ;;  %2310 = vmatpush3.bf16.msra.mxu0 %v2591_v10  ;;  %v2626_v7 = vld [vmem:[%s3312_s1 + $0x2e0] sm:$0xff]   ;;  %v2629_v10 = vld [vmem:[%s3312_s1 + $0x268] sm:$0xff]  }
  0x35   :  { %2350 = vmatpush3.bf16.msra.mxu1 %v2592_v11  ;;  %2311 = vmatprep.subr.bf16.mxu0 %v2593_v12  ;;  %v2630_v11 = vld [vmem:[%s3312_s1 + $0x2e8] sm:$0xff]  }
  0x36   :  { %2351 = vmatprep.subr.bf16.mxu1 %v2594_v13  ;;  %1472 = vmatprep.mubr.bf16.mxu0 %v2064_v18  ;;  %v2631_v12 = vld [vmem:[%s3312_s1 + $0x228] sm:$0xff]   ;;  %v2070_v18 = vcombine.high %v91_v16, %v91_v16 }
  0x37   :  { %1536 = vmatprep.mubr.bf16.mxu1 %v2066_v19  ;;  %v2632_v13 = vld [vmem:[%s3312_s1 + $0x2a8] sm:$0xff]   ;;  %v2069_v19 = vcombine.low %v91_v16, %v91_v16 }
  0x38   :  { %2312 = vmatpush3.bf16.msra.mxu0 %v2595_v14  ;;  %v90_v14 = vld [vmem:[%s3313_s0 + $0x190] sm:$0xff] }
  0x39   :  { %2352 = vmatpush3.bf16.msra.mxu1 %v2596_v15  ;;  %2313 = vmatprep.subr.bf16.mxu0 %v2601_v21  ;;  %v2068_v15 = vcombine.high %v90_v14, %v90_v14  ;;  %v2067_v17 = vcombine.low %v90_v14, %v90_v14  ;;  %v2638_v21 = vld [vmem:[%s3312_s1 + $0x2f0] sm:$0xff]  }
  0x3a   :  { %2353 = vmatprep.subr.bf16.mxu1 %v2602_v23  ;;  %v2640_v23 = vld [vmem:[%s3312_s1 + $0x2b0] sm:$0xff]  }
  0x3b   :  { %1473 = vmatmul.mubr.bf16.gmra.mrb[12].mxu0 %v2063_v20  ;;  %v2637_v20 = vld [vmem:[%s3312_s1 + $0x270] sm:$0xff]  }
  0x3c   :  { %1537 = vmatmul.mubr.bf16.gmra.mrb[12].mxu1 %v2065_v22  ;;  %2314 = vmatpush3.bf16.msra.mxu0 %v2603_v24  ;;  %v2639_v22 = vld [vmem:[%s3312_s1 + $0x230] sm:$0xff]   ;;  %v2641_v24 = vld [vmem:[%s3312_s1 + $0x278] sm:$0xff]  }
  0x3d   :  { %2354 = vmatpush3.bf16.msra.mxu1 %v2604_v25  ;;  %2315 = vmatprep.subr.bf16.mxu0 %v2605_v26  ;;  %v2642_v25 = vld [vmem:[%s3312_s1 + $0x2f8] sm:$0xff]  }
  0x3e   :  { %2355 = vmatprep.subr.bf16.mxu1 %v2606_v27  ;;  %1576 = vmatprep.mubr.bf16.mxu0 %v2020_v35  ;;  %v2643_v26 = vld [vmem:[%s3312_s1 + $0x238] sm:$0xff]   ;;  %v2026_v35 = vcombine.high %v45_v32, %v53_v33 }
  0x3f   :  { %1640 = vmatprep.mubr.bf16.mxu1 %v2022_v38  ;;  %v2644_v27 = vld [vmem:[%s3312_s1 + $0x2b8] sm:$0xff]   ;;  %v2647_v38 = vld [vmem:[%s3312_s1 + $0x300] sm:$0xff]  }
  0x40   :  { %2316 = vmatpush3.bf16.msra.mxu0 %v2607_v28  ;;  %v44_v28 = vld [vmem:[%s3313_s0 + $0x20] sm:$0xff] }
  0x41   :  { %2356 = vmatpush3.bf16.msra.mxu1 %v2608_v29  ;;  %2381 = vmatprep.subr.bf16.mxu0 %v2609_v37  ;;  %v52_v29 = vld [vmem:[%s3313_s0 + $0x60] sm:$0xff] }
  0x42   :  { %2421 = vmatprep.subr.bf16.mxu1 %v2610_v39  ;;  %v2023_v30 = vcombine.low %v44_v28, %v52_v29  ;;  %v2024_v31 = vcombine.high %v44_v28, %v52_v29  ;;  %v2646_v37 = vld [vmem:[%s3312_s1 + $0x3c0] sm:$0xff]   ;;  %v47_v28 = vld [vmem:[%s3313_s0 + $0x38] sm:$0xff] }
  0x43   :  { %1577 = vmatmul.mubr.bf16.vlgmr.msra.gmra.mrb[16].mxu0 %v2019_v34  ;;  %v2025_v34 = vcombine.low %v45_v32, %v53_v33  ;;  %v2648_v39 = vld [vmem:[%s3312_s1 + $0x380] sm:$0xff]   ;;  %v62_v32 = vld [vmem:[%s3313_s0 + $0xb0] sm:$0xff] }
  0x44   :  { %1641 = vmatmul.mubr.bf16.vlgmr.msra.gmra.mrb[16].mxu1 %v2021_v36  ;;  %2382 = vmatpush3.bf16.msra.mxu0 %v2611_v40  ;;  %v2645_v36 = vld [vmem:[%s3312_s1 + $0x340] sm:$0xff]   ;;  %v2649_v40 = vld [vmem:[%s3312_s1 + $0x348] sm:$0xff]   ;;  %v70_v33 = vld [vmem:[%s3313_s0 + $0xf0] sm:$0xff] }
  0x45   :  { %2422 = vmatpush3.bf16.msra.mxu1 %v2612_v41  ;;  %2383 = vmatprep.subr.bf16.mxu0 %v2613_v42  ;;  %v2650_v41 = vld [vmem:[%s3312_s1 + $0x3c8] sm:$0xff]  }
  0x46   :  { %2423 = vmatprep.subr.bf16.mxu1 %v2614_v43  ;;  %1584 = vmatprep.mubr.bf16.mxu0 %v2036_v49  ;;  %v2651_v42 = vld [vmem:[%s3312_s1 + $0x308] sm:$0xff]   ;;  %v2042_v49 = vcombine.high %v61_v46, %v69_v47 }
  0x47   :  { %1648 = vmatprep.mubr.bf16.mxu1 %v2038_v52  ;;  %v2652_v43 = vld [vmem:[%s3312_s1 + $0x388] sm:$0xff]   ;;  %v2653_v52 = vld [vmem:[%s3312_s1 + $0x350] sm:$0xff]  }
  0x48   :  { %2384 = vmatpush3.bf16.msra.mxu0 %v2615_v44  ;;  %v60_v44 = vld [vmem:[%s3313_s0 + $0xa0] sm:$0xff] }
  0x49   :  { %2424 = vmatpush3.bf16.msra.mxu1 %v2616_v45  ;;  %2385 = vmatprep.subr.bf16.mxu0 %v2617_v54  ;;  %v68_v45 = vld [vmem:[%s3313_s0 + $0xe0] sm:$0xff]  ;;  %v2655_v54 = vld [vmem:[%s3312_s1 + $0x310] sm:$0xff]  }
  0x4a   :  { %2425 = vmatprep.subr.bf16.mxu1 %v2618_v55  ;;  %v2040_v48 = vcombine.high %v60_v44, %v68_v45  ;;  %v2039_v50 = vcombine.low %v60_v44, %v68_v45  ;;  %v2656_v55 = vld [vmem:[%s3312_s1 + $0x390] sm:$0xff]   ;;  %v2043_v44 = vcombine.low %v62_v32, %v70_v33 }
  0x4b   :  { %1585 = vmatmul.mubr.bf16.gmra.mrb[20].mxu0 %v2035_v51  ;;  %v2041_v51 = vcombine.low %v61_v46, %v69_v47 }
  0x4c   :  { %1649 = vmatmul.mubr.bf16.gmra.mrb[20].mxu1 %v2037_v53  ;;  %2386 = vmatpush3.bf16.msra.mxu0 %v2619_v56  ;;  %v2654_v53 = vld [vmem:[%s3312_s1 + $0x3d0] sm:$0xff]   ;;  %v2657_v56 = vld [vmem:[%s3312_s1 + $0x358] sm:$0xff]  }
  0x4d   :  { %2426 = vmatpush3.bf16.msra.mxu1 %v2620_v57  ;;  %2387 = vmatprep.subr.bf16.mxu0 %v2621_v58  ;;  %v2658_v57 = vld [vmem:[%s3312_s1 + $0x3d8] sm:$0xff]  }
  0x4e   :  { %2427 = vmatprep.subr.bf16.mxu1 %v2622_v59  ;;  %1592 = vmatprep.mubr.bf16.mxu0 %v2052_v0  ;;  %v2659_v58 = vld [vmem:[%s3312_s1 + $0x318] sm:$0xff]   ;;  %v85_v0 = vld [vmem:[%s3313_s0 + $0x168] sm:$0xff] }
  0x4f   :  { %1656 = vmatprep.mubr.bf16.mxu1 %v2054_v4  ;;  %v2660_v59 = vld [vmem:[%s3312_s1 + $0x398] sm:$0xff]   ;;  %v2058_v2 = vcombine.high %v77_v62, %v85_v0  ;;  %v2661_v4 = vld [vmem:[%s3312_s1 + $0x360] sm:$0xff]  }
  0x50   :  { %2388 = vmatpush3.bf16.msra.mxu0 %v2623_v60  ;;  %v76_v60 = vld [vmem:[%s3313_s0 + $0x120] sm:$0xff] }
  0x51   :  { %2428 = vmatpush3.bf16.msra.mxu1 %v2624_v61  ;;  %2389 = vmatprep.subr.bf16.mxu0 %v2625_v6  ;;  %v84_v61 = vld [vmem:[%s3313_s0 + $0x160] sm:$0xff] }
  0x52   :  { %2429 = vmatprep.subr.bf16.mxu1 %v2626_v7  ;;  %v2056_v63 = vcombine.high %v76_v60, %v84_v61  ;;  %v2055_v1 = vcombine.low %v76_v60, %v84_v61  ;;  %v2663_v6 = vld [vmem:[%s3312_s1 + $0x320] sm:$0xff]  }
  0x53   :  { %1593 = vmatmul.mubr.bf16.gmra.mrb[24].mxu0 %v2051_v3  ;;  %v2057_v3 = vcombine.low %v77_v62, %v85_v0  ;;  %v2664_v7 = vld [vmem:[%s3312_s1 + $0x3a0] sm:$0xff]  }
  0x54   :  { %1657 = vmatmul.mubr.bf16.gmra.mrb[24].mxu1 %v2053_v5  ;;  %2390 = vmatpush3.bf16.msra.mxu0 %v2627_v8  ;;  %v2662_v5 = vld [vmem:[%s3312_s1 + $0x3e0] sm:$0xff]   ;;  %v2665_v8 = vld [vmem:[%s3312_s1 + $0x368] sm:$0xff]  }
  0x55   :  { %2430 = vmatpush3.bf16.msra.mxu1 %v2628_v9  ;;  %2391 = vmatprep.subr.bf16.mxu0 %v2629_v10  ;;  %v2666_v9 = vld [vmem:[%s3312_s1 + $0x3e8] sm:$0xff]  }
  0x56   :  { %2431 = vmatprep.subr.bf16.mxu1 %v2630_v11  ;;  %1600 = vmatprep.mubr.bf16.mxu0 %v2068_v15  ;;  %v2667_v10 = vld [vmem:[%s3312_s1 + $0x328] sm:$0xff]  }
  0x57   :  { %1664 = vmatprep.mubr.bf16.mxu1 %v2070_v18  ;;  %v2668_v11 = vld [vmem:[%s3312_s1 + $0x3a8] sm:$0xff]   ;;  %v2673_v18 = vld [vmem:[%s3312_s1 + $0x370] sm:$0xff]  }
  0x58   :  { %2392 = vmatpush3.bf16.msra.mxu0 %v2631_v12  ;;  %v92_v12 = vld [vmem:[%s3313_s0 + $0x1a0] sm:$0xff] }
  0x59   :  { %2432 = vmatpush3.bf16.msra.mxu1 %v2632_v13  ;;  %2393 = vmatprep.subr.bf16.mxu0 %v2637_v20  ;;  %v93_v13 = vld [vmem:[%s3313_s0 + $0x1a8] sm:$0xff]  ;;  %v2072_v14 = vcombine.high %v92_v12, %v92_v12  ;;  %v2071_v16 = vcombine.low %v92_v12, %v92_v12  ;;  %v2675_v20 = vld [vmem:[%s3312_s1 + $0x330] sm:$0xff]  }
  0x5a   :  { %2433 = vmatprep.subr.bf16.mxu1 %v2638_v21  ;;  %v2074_v15 = vcombine.high %v93_v13, %v93_v13  ;;  %v2676_v21 = vld [vmem:[%s3312_s1 + $0x3b0] sm:$0xff]  }
  0x5b   :  { %1601 = vmatmul.mubr.bf16.gmra.mrb[28].mxu0 %v2067_v17  ;;  %v2073_v17 = vcombine.low %v93_v13, %v93_v13 }
  0x5c   :  { %1665 = vmatmul.mubr.bf16.gmra.mrb[28].mxu1 %v2069_v19  ;;  %2394 = vmatpush3.bf16.msra.mxu0 %v2639_v22  ;;  %v2674_v19 = vld [vmem:[%s3312_s1 + $0x3f0] sm:$0xff]   ;;  %v2677_v22 = vld [vmem:[%s3312_s1 + $0x378] sm:$0xff]  }
  0x5d   :  { %2434 = vmatpush3.bf16.msra.mxu1 %v2640_v23  ;;  %2395 = vmatprep.subr.bf16.mxu0 %v2641_v24  ;;  %v2678_v23 = vld [vmem:[%s3312_s1 + $0x3f8] sm:$0xff]  }
  0x5e   :  { %2435 = vmatprep.subr.bf16.mxu1 %v2642_v25  ;;  %1704 = vmatprep.mubr.bf16.mxu0 %v2024_v31  ;;  %v2679_v24 = vld [vmem:[%s3312_s1 + $0x338] sm:$0xff]  }
  0x5f   :  { %1768 = vmatprep.mubr.bf16.mxu1 %v2026_v35  ;;  %v2680_v25 = vld [vmem:[%s3312_s1 + $0x3b8] sm:$0xff]  }
  0x60   :  { %2396 = vmatpush3.bf16.msra.mxu0 %v2643_v26  ;;  %v46_v26 = vld [vmem:[%s3313_s0 + $0x30] sm:$0xff]  ;;  %v55_v31 = vld [vmem:[%s3313_s0 + $0x78] sm:$0xff] }
  0x61   :  { %2436 = vmatpush3.bf16.msra.mxu1 %v2644_v27  ;;  %2461 = vmatprep.subr.bf16.mxu0 %v2645_v36  ;;  %v54_v27 = vld [vmem:[%s3313_s0 + $0x70] sm:$0xff]  ;;  %v2030_v35 = vcombine.high %v47_v28, %v55_v31  ;;  %v2044_v36 = vcombine.high %v62_v32, %v70_v33 }
  0x62   :  { %2501 = vmatprep.subr.bf16.mxu1 %v2646_v37  ;;  %v2027_v29 = vcombine.low %v46_v26, %v54_v27  ;;  %v63_v37 = vld [vmem:[%s3313_s0 + $0xb8] sm:$0xff] }
  0x63   :  { %1705 = vmatmul.mubr.bf16.vlgmr.msra.gmra.mrb[32].mxu0 %v2023_v30  ;;  %v2028_v30 = vcombine.high %v46_v26, %v54_v27 }
  0x64   :  { %1769 = vmatmul.mubr.bf16.vlgmr.msra.gmra.mrb[32].mxu1 %v2025_v34  ;;  %2462 = vmatpush3.bf16.msra.mxu0 %v2647_v38  ;;  %v2029_v34 = vcombine.low %v47_v28, %v55_v31  ;;  %v71_v38 = vld [vmem:[%s3313_s0 + $0xf8] sm:$0xff] }
  0x65   :  { %2502 = vmatpush3.bf16.msra.mxu1 %v2648_v39  ;;  %2463 = vmatprep.subr.bf16.mxu0 %v2649_v40  ;;  %v2046_v39 = vcombine.high %v63_v37, %v71_v38  ;;  %v78_v40 = vld [vmem:[%s3313_s0 + $0x130] sm:$0xff]  ;;  %v2045_v45 = vcombine.low %v63_v37, %v71_v38 }
  0x66   :  { %2503 = vmatprep.subr.bf16.mxu1 %v2650_v41  ;;  %1712 = vmatprep.mubr.bf16.mxu0 %v2040_v48  ;;  %v86_v41 = vld [vmem:[%s3313_s0 + $0x170] sm:$0xff] }
  0x67   :  { %1776 = vmatprep.mubr.bf16.mxu1 %v2042_v49  ;;  %v2060_v46 = vcombine.high %v78_v40, %v86_v41  ;;  %v94_v48 = vld [vmem:[%s3313_s0 + $0x1b0] sm:$0xff]  ;;  %v95_v49 = vld [vmem:[%s3313_s0 + $0x1b8] sm:$0xff] }
  0x68   :  { %2464 = vmatpush3.bf16.msra.mxu0 %v2651_v42  ;;  %v79_v42 = vld [vmem:[%s3313_s0 + $0x138] sm:$0xff] }
  0x69   :  { %2504 = vmatpush3.bf16.msra.mxu1 %v2652_v43  ;;  %2465 = vmatprep.subr.bf16.mxu0 %v2653_v52  ;;  %v87_v43 = vld [vmem:[%s3313_s0 + $0x178] sm:$0xff]  ;;  %v2076_v52 = vcombine.high %v94_v48, %v94_v48 }
  0x6a   :  { %2505 = vmatprep.subr.bf16.mxu1 %v2654_v53  ;;  %v2062_v47 = vcombine.high %v79_v42, %v87_v43  ;;  %v2078_v53 = vcombine.high %v95_v49, %v95_v49 }
  0x6b   :  { %1713 = vmatmul.mubr.bf16.gmra.mrb[36].mxu0 %v2039_v50  ;;  %v2059_v50 = vcombine.low %v78_v40, %v86_v41 }
  0x6c   :  { %1777 = vmatmul.mubr.bf16.gmra.mrb[36].mxu1 %v2041_v51  ;;  %2466 = vmatpush3.bf16.msra.mxu0 %v2655_v54  ;;  %v2061_v51 = vcombine.low %v79_v42, %v87_v43  ;;  %v2075_v54 = vcombine.low %v94_v48, %v94_v48 }
  0x6d   :  { %2506 = vmatpush3.bf16.msra.mxu1 %v2656_v55  ;;  %2467 = vmatprep.subr.bf16.mxu0 %v2657_v56  ;;  %v2077_v55 = vcombine.low %v95_v49, %v95_v49 }
  0x6e   :  { %2507 = vmatprep.subr.bf16.mxu1 %v2658_v57  ;;  %1720 = vmatprep.mubr.bf16.mxu0 %v2056_v63 }
  0x6f   :  { %1784 = vmatprep.mubr.bf16.mxu1 %v2058_v2 }
  0x70   :  { %2468 = vmatpush3.bf16.msra.mxu0 %v2659_v58 }
  0x71   :  { %2508 = vmatpush3.bf16.msra.mxu1 %v2660_v59  ;;  %2469 = vmatprep.subr.bf16.mxu0 %v2661_v4 }
  0x72   :  { %2509 = vmatprep.subr.bf16.mxu1 %v2662_v5 }
  0x73   :  { %1721 = vmatmul.mubr.bf16.gmra.mrb[40].mxu0 %v2055_v1 }
  0x74   :  { %1785 = vmatmul.mubr.bf16.gmra.mrb[40].mxu1 %v2057_v3  ;;  %2470 = vmatpush3.bf16.msra.mxu0 %v2663_v6 }
  0x75   :  { %2510 = vmatpush3.bf16.msra.mxu1 %v2664_v7  ;;  %2471 = vmatprep.subr.bf16.mxu0 %v2665_v8 }
  0x76   :  { %2511 = vmatprep.subr.bf16.mxu1 %v2666_v9  ;;  %1728 = vmatprep.mubr.bf16.mxu0 %v2072_v14 }
  0x77   :  { %1792 = vmatprep.mubr.bf16.mxu1 %v2074_v15 }
  0x78   :  { %2472 = vmatpush3.bf16.msra.mxu0 %v2667_v10 }
  0x79   :  { %2512 = vmatpush3.bf16.msra.mxu1 %v2668_v11  ;;  %2473 = vmatprep.subr.bf16.mxu0 %v2673_v18 }
  0x7a   :  { %2513 = vmatprep.subr.bf16.mxu1 %v2674_v19 }
  0x7b   :  { %1729 = vmatmul.mubr.bf16.gmra.mrb[44].mxu0 %v2071_v16 }
  0x7c   :  { %1793 = vmatmul.mubr.bf16.gmra.mrb[44].mxu1 %v2073_v17  ;;  %2474 = vmatpush3.bf16.msra.mxu0 %v2675_v20 }
  0x7d   :  { %2514 = vmatpush3.bf16.msra.mxu1 %v2676_v21  ;;  %2475 = vmatprep.subr.bf16.mxu0 %v2677_v22 }
  0x7e   :  { %2515 = vmatprep.subr.bf16.mxu1 %v2678_v23  ;;  %1832 = vmatprep.mubr.bf16.mxu0 %v2028_v30 }
  0x7f   :  { %1896 = vmatprep.mubr.bf16.mxu1 %v2030_v35 }
  0x80   :  { %2476 = vmatpush3.bf16.msra.mxu0 %v2679_v24 }
  0x81   :  { %2516 = vmatpush3.bf16.msra.mxu1 %v2680_v25 }
  0x83   :  { %1833 = vmatmul.mubr.bf16.vlgmr.msra.gmra.mrb[48].mxu0 %v2027_v29 }
  0x84   :  { %1897 = vmatmul.mubr.bf16.vlgmr.msra.gmra.mrb[48].mxu1 %v2029_v34  ;;  %1840 = vmatprep.mubr.bf16.mxu0 %v2044_v36 }
  0x85   :  { %1904 = vmatprep.mubr.bf16.mxu1 %v2046_v39 }
  0x8b   :  { %1841 = vmatmul.mubr.bf16.gmra.mrb[52].mxu0 %v2043_v44 }
  0x8c   :  { %1905 = vmatmul.mubr.bf16.gmra.mrb[52].mxu1 %v2045_v45  ;;  %1848 = vmatprep.mubr.bf16.mxu0 %v2060_v46 }
  0x8d   :  { %1912 = vmatprep.mubr.bf16.mxu1 %v2062_v47 }
  0x93   :  { %1849 = vmatmul.mubr.bf16.gmra.mrb[56].mxu0 %v2059_v50 }
  0x94   :  { %1913 = vmatmul.mubr.bf16.gmra.mrb[56].mxu1 %v2061_v51  ;;  %1856 = vmatprep.mubr.bf16.mxu0 %v2076_v52 }
  0x95   :  { %1920 = vmatprep.mubr.bf16.mxu1 %v2078_v53 }
  0x9b   :  { %1857 = vmatmul.mubr.bf16.gmra.mrb[60].mxu0 %v2075_v54 }
  0x9c   :  { %1921 = vmatmul.mubr.bf16.gmra.mrb[60].mxu1 %v2077_v55 }
  0xf6   :  { %v2237_v56 = vpop.f32.mrb[0].mxu0 }
  0xf7   :  { %v2277_v57 = vpop.f32.mrb[0].mxu1  ;;  %v2238_v58 = vpop.f32.mrb[1].mxu0 }
  0xf8   :  { %v2239_v59 = vadd.f32 %v2238_v58, %v2237_v56  ;;  %v2278_v60 = vpop.f32.mrb[1].mxu1  ;;  %v2240_v61 = vpop.f32.mrb[2].mxu0 }
  0xf9   :  { %v2279_v62 = vadd.f32 %v2278_v60, %v2277_v57  ;;  %v2280_v63 = vpop.f32.mrb[2].mxu1  ;;  %v2241_v0 = vpop.f32.mrb[3].mxu0 }
  0xfa   :  { %v2242_v1 = vadd.f32 %v2241_v0, %v2240_v61  ;;  %v2281_v2 = vpop.f32.mrb[3].mxu1 }
  0xfb   :  { %v1515_v3 = vadd.f32 %v2279_v62, %v2239_v59  ;;  %v2282_v4 = vadd.f32 %v2281_v2, %v2280_v63 }
  0xfd   :  { %v1518_v5 = vadd.f32 %v2282_v4, %v2242_v1 }
  0xfe   :  { %v2243_v6 = vpop.f32.mrb[4].mxu0 }
  0xff   :  { %v2283_v7 = vpop.f32.mrb[4].mxu1  ;;  %v2244_v8 = vpop.f32.mrb[5].mxu0 }
 0x100   :  { %v2245_v9 = vadd.f32 %v2244_v8, %v2243_v6  ;;  %v2284_v10 = vpop.f32.mrb[5].mxu1  ;;  %v2246_v11 = vpop.f32.mrb[6].mxu0 }
 0x101   :  { %v2285_v12 = vadd.f32 %v2284_v10, %v2283_v7  ;;  %v2286_v13 = vpop.f32.mrb[6].mxu1  ;;  %v2247_v14 = vpop.f32.mrb[7].mxu0 }
 0x102   :  { %v2248_v15 = vadd.f32 %v2247_v14, %v2246_v11  ;;  %v2287_v16 = vpop.f32.mrb[7].mxu1 }
 0x103   :  { %v1523_v17 = vadd.f32 %v2285_v12, %v2245_v9  ;;  %v2288_v18 = vadd.f32 %v2287_v16, %v2286_v13 }
 0x105   :  { %v1526_v19 = vadd.f32 %v2288_v18, %v2248_v15 }
 0x106   :  { %v2249_v20 = vpop.f32.mrb[8].mxu0 }
 0x107   :  { %v2289_v21 = vpop.f32.mrb[8].mxu1  ;;  %v2250_v22 = vpop.f32.mrb[9].mxu0 }
 0x108   :  { %v2290_v23 = vpop.f32.mrb[9].mxu1  ;;  %v2251_v24 = vadd.f32 %v2250_v22, %v2249_v20  ;;  %v2252_v26 = vpop.f32.mrb[10].mxu0 }
 0x109   :  { %v2291_v25 = vadd.f32 %v2290_v23, %v2289_v21  ;;  %v2292_v27 = vpop.f32.mrb[10].mxu1  ;;  %v2253_v28 = vpop.f32.mrb[11].mxu0 }
 0x10a   :  { %v2293_v29 = vpop.f32.mrb[11].mxu1  ;;  %v2254_v31 = vadd.f32 %v2253_v28, %v2252_v26 }
 0x10b   :  { %v1531_v30 = vadd.f32 %v2291_v25, %v2251_v24  ;;  %v2294_v32 = vadd.f32 %v2293_v29, %v2292_v27 }
 0x10d   :  { %v1534_v33 = vadd.f32 %v2294_v32, %v2254_v31 }
 0x10e   :  { %v2255_v34 = vpop.f32.mrb[12].mxu0 }
 0x10f   :  { %v2295_v35 = vpop.f32.mrb[12].mxu1  ;;  %v2256_v36 = vpop.f32.mrb[13].mxu0 }
 0x110   :  { %v2296_v37 = vpop.f32.mrb[13].mxu1  ;;  %v2257_v38 = vadd.f32 %v2256_v36, %v2255_v34  ;;  %v2258_v40 = vpop.f32.mrb[14].mxu0 }
 0x111   :  { %v2297_v39 = vadd.f32 %v2296_v37, %v2295_v35  ;;  %v2298_v41 = vpop.f32.mrb[14].mxu1  ;;  %v2259_v42 = vpop.f32.mrb[15].mxu0 }
 0x112   :  { %v2299_v43 = vpop.f32.mrb[15].mxu1 }
 0x113   :  { %v1539_v44 = vadd.f32 %v2297_v39, %v2257_v38 }
 0x116   :  { %v2317_v45 = vpop.f32.mrb[16].mxu0 }
 0x117   :  { %v2357_v46 = vpop.f32.mrb[16].mxu1  ;;  %v2318_v47 = vpop.f32.mrb[17].mxu0 }
 0x118   :  { %v2319_v48 = vadd.f32 %v2318_v47, %v2317_v45  ;;  %v2358_v49 = vpop.f32.mrb[17].mxu1  ;;  %v2320_v50 = vpop.f32.mrb[18].mxu0 }
 0x119   :  { %v2359_v51 = vadd.f32 %v2358_v49, %v2357_v46  ;;  %v2360_v52 = vpop.f32.mrb[18].mxu1  ;;  %v2321_v53 = vpop.f32.mrb[19].mxu0 }
 0x11a   :  { %v1579_v54 = vadd.f32 %v2319_v48, %v1515_v3  ;;  %v2322_v55 = vadd.f32 %v2321_v53, %v2320_v50  ;;  %v2361_v56 = vpop.f32.mrb[19].mxu1 }
 0x11b   :  { %v2362_v57 = vadd.f32 %v2361_v56, %v2360_v52 }
 0x11c   :  { %v1643_v58 = vadd.f32 %v2359_v51, %v1579_v54  ;;  %v1582_v59 = vadd.f32 %v2322_v55, %v1518_v5 }
 0x11e   :  { %v1646_v60 = vadd.f32 %v2362_v57, %v1582_v59  ;;  %v2323_v61 = vpop.f32.mrb[20].mxu0 }
 0x11f   :  { %v2363_v62 = vpop.f32.mrb[20].mxu1  ;;  %v2324_v63 = vpop.f32.mrb[21].mxu0 }
 0x120   :  { %v2325_v0 = vadd.f32 %v2324_v63, %v2323_v61  ;;  %v2364_v1 = vpop.f32.mrb[21].mxu1  ;;  %v2326_v2 = vpop.f32.mrb[22].mxu0 }
 0x121   :  { %v2365_v4 = vadd.f32 %v2364_v1, %v2363_v62  ;;  %v2366_v6 = vpop.f32.mrb[22].mxu1  ;;  %v2327_v7 = vpop.f32.mrb[23].mxu0 }
 0x122   :  { %v1587_v8 = vadd.f32 %v2325_v0, %v1523_v17  ;;  %v2328_v9 = vadd.f32 %v2327_v7, %v2326_v2  ;;  %v2367_v10 = vpop.f32.mrb[23].mxu1 }
 0x123   :  { %v2368_v11 = vadd.f32 %v2367_v10, %v2366_v6 }
 0x124   :  { %v1651_v3 = vadd.f32 %v2365_v4, %v1587_v8  ;;  %v1590_v12 = vadd.f32 %v2328_v9, %v1526_v19 }
 0x126   :  { %v1654_v13 = vadd.f32 %v2368_v11, %v1590_v12  ;;  %v2329_v14 = vpop.f32.mrb[24].mxu0 }
 0x127   :  { %v2369_v15 = vpop.f32.mrb[24].mxu1  ;;  %v2330_v5 = vpop.f32.mrb[25].mxu0 }
 0x128   :  { %v2331_v16 = vadd.f32 %v2330_v5, %v2329_v14  ;;  %v2370_v18 = vpop.f32.mrb[25].mxu1  ;;  %v2332_v20 = vpop.f32.mrb[26].mxu0 }
 0x129   :  { %v2371_v21 = vadd.f32 %v2370_v18, %v2369_v15  ;;  %v2372_v22 = vpop.f32.mrb[26].mxu1  ;;  %v2333_v23 = vpop.f32.mrb[27].mxu0 }
 0x12a   :  { %v1595_v24 = vadd.f32 %v2331_v16, %v1531_v30  ;;  %v2334_v25 = vadd.f32 %v2333_v23, %v2332_v20  ;;  %v2373_v26 = vpop.f32.mrb[27].mxu1 }
 0x12b   :  { %v2374_v27 = vadd.f32 %v2373_v26, %v2372_v22 }
 0x12c   :  { %v1659_v17 = vadd.f32 %v2371_v21, %v1595_v24  ;;  %v1598_v28 = vadd.f32 %v2334_v25, %v1534_v33 }
 0x12e   :  { %v1662_v29 = vadd.f32 %v2374_v27, %v1598_v28  ;;  %v2335_v31 = vpop.f32.mrb[28].mxu0 }
 0x12f   :  { %v2375_v32 = vpop.f32.mrb[28].mxu1  ;;  %v2336_v19 = vpop.f32.mrb[29].mxu0 }
 0x130   :  { %v2337_v34 = vadd.f32 %v2336_v19, %v2335_v31  ;;  %v2376_v35 = vpop.f32.mrb[29].mxu1  ;;  %v2338_v36 = vpop.f32.mrb[30].mxu0 }
 0x131   :  { %v2377_v37 = vadd.f32 %v2376_v35, %v2375_v32  ;;  %v2378_v38 = vpop.f32.mrb[30].mxu1  ;;  %v2339_v39 = vpop.f32.mrb[31].mxu0 }
 0x132   :  { %v1603_v40 = vadd.f32 %v2337_v34, %v1539_v44  ;;  %v2379_v41 = vpop.f32.mrb[31].mxu1 }
 0x134   :  { %v1667_v42 = vadd.f32 %v2377_v37, %v1603_v40 }
 0x136   :  { %v2397_v43 = vpop.f32.mrb[32].mxu0 }
 0x137   :  { %v2437_v30 = vpop.f32.mrb[32].mxu1  ;;  %v2398_v45 = vpop.f32.mrb[33].mxu0 }
 0x138   :  { %v2399_v46 = vadd.f32 %v2398_v45, %v2397_v43  ;;  %v2438_v47 = vpop.f32.mrb[33].mxu1  ;;  %v2400_v48 = vpop.f32.mrb[34].mxu0 }
 0x139   :  { %v2439_v33 = vadd.f32 %v2438_v47, %v2437_v30  ;;  %v2440_v49 = vpop.f32.mrb[34].mxu1  ;;  %v2401_v50 = vpop.f32.mrb[35].mxu0 }
 0x13a   :  { %v1707_v51 = vadd.f32 %v2399_v46, %v1643_v58  ;;  %v2402_v52 = vadd.f32 %v2401_v50, %v2400_v48  ;;  %v2441_v53 = vpop.f32.mrb[35].mxu1 }
 0x13b   :  { %v2442_v54 = vadd.f32 %v2441_v53, %v2440_v49 }
 0x13c   :  { %v1771_v55 = vadd.f32 %v2439_v33, %v1707_v51  ;;  %v1710_v56 = vadd.f32 %v2402_v52, %v1646_v60  ;;  %v3270_v51 = vld [vmem:[%s3314_s2] ss:$0 sm:$0xff] }
 0x13e   :  { %v1774_v57 = vadd.f32 %v2442_v54, %v1710_v56  ;;  %v2403_v59 = vpop.f32.mrb[36].mxu0 }
 0x13f   :  { %v2443_v44 = vpop.f32.mrb[36].mxu1  ;;  %v2404_v61 = vpop.f32.mrb[37].mxu0 }
 0x140   :  { %v2444_v62 = vpop.f32.mrb[37].mxu1  ;;  %v2405_v63 = vadd.f32 %v2404_v61, %v2403_v59  ;;  %v2406_v1 = vpop.f32.mrb[38].mxu0 }
 0x141   :  { %v2445_v0 = vadd.f32 %v2444_v62, %v2443_v44  ;;  %v2446_v2 = vpop.f32.mrb[38].mxu1  ;;  %v2407_v4 = vpop.f32.mrb[39].mxu0 }
 0x142   :  { %v2447_v6 = vpop.f32.mrb[39].mxu1  ;;  %v1715_v7 = vadd.f32 %v2405_v63, %v1651_v3  ;;  %v2408_v8 = vadd.f32 %v2407_v4, %v2406_v1 }
 0x143   :  { %v2448_v9 = vadd.f32 %v2447_v6, %v2446_v2 }
 0x144   :  { %v3257_v58 = vadd.f32 %v2445_v0, %v1715_v7  ;;  %v1718_v10 = vadd.f32 %v2408_v8, %v1654_v13 }
 0x146   :  { %v3259_v11 = vadd.f32 %v2448_v9, %v1718_v10  ;;  %v2409_v60 = vpop.f32.mrb[40].mxu0 }
 0x147   :  { %v2449_v12 = vpop.f32.mrb[40].mxu1  ;;  %v2410_v14 = vpop.f32.mrb[41].mxu0 }
 0x148   :  { %v2411_v15 = vadd.f32 %v2410_v14, %v2409_v60  ;;  %v2450_v5 = vpop.f32.mrb[41].mxu1  ;;  %v2412_v16 = vpop.f32.mrb[42].mxu0 }
 0x149   :  { %v2451_v18 = vadd.f32 %v2450_v5, %v2449_v12  ;;  %v2452_v20 = vpop.f32.mrb[42].mxu1  ;;  %v2413_v21 = vpop.f32.mrb[43].mxu0 }
 0x14a   :  { %v1723_v22 = vadd.f32 %v2411_v15, %v1659_v17  ;;  %v2414_v23 = vadd.f32 %v2413_v21, %v2412_v16  ;;  %v2453_v24 = vpop.f32.mrb[43].mxu1 }
 0x14b   :  { %v2454_v3 = vadd.f32 %v2453_v24, %v2452_v20 }
 0x14c   :  { %v3261_v25 = vadd.f32 %v2451_v18, %v1723_v22  ;;  %v1726_v26 = vadd.f32 %v2414_v23, %v1662_v29 }
 0x14e   :  { %v3263_v27 = vadd.f32 %v2454_v3, %v1726_v26  ;;  %v2415_v13 = vpop.f32.mrb[44].mxu0 }
 0x14f   :  { %v2455_v28 = vpop.f32.mrb[44].mxu1  ;;  %v2416_v31 = vpop.f32.mrb[45].mxu0 }
 0x150   :  { %v2456_v32 = vpop.f32.mrb[45].mxu1  ;;  %v2417_v19 = vadd.f32 %v2416_v31, %v2415_v13  ;;  %v2418_v35 = vpop.f32.mrb[46].mxu0 }
 0x151   :  { %v2457_v34 = vadd.f32 %v2456_v32, %v2455_v28  ;;  %v2458_v36 = vpop.f32.mrb[46].mxu1  ;;  %v2419_v37 = vpop.f32.mrb[47].mxu0 }
 0x152   :  { %v2459_v38 = vpop.f32.mrb[47].mxu1  ;;  %v1731_v39 = vadd.f32 %v2417_v19, %v1667_v42 }
 0x154   :  { %v3265_v17 = vadd.f32 %v2457_v34, %v1731_v39 }
 0x156   :  { %v2477_v40 = vpop.f32.mrb[48].mxu0 }
 0x157   :  { %v2517_v41 = vpop.f32.mrb[48].mxu1  ;;  %v2478_v43 = vpop.f32.mrb[49].mxu0 }
 0x158   :  { %v2479_v30 = vadd.f32 %v2478_v43, %v2477_v40  ;;  %v2518_v29 = vpop.f32.mrb[49].mxu1  ;;  %v2480_v45 = vpop.f32.mrb[50].mxu0 }
 0x159   :  { %v2519_v46 = vadd.f32 %v2518_v29, %v2517_v41  ;;  %v2520_v47 = vpop.f32.mrb[50].mxu1  ;;  %v2481_v48 = vpop.f32.mrb[51].mxu0 }
 0x15a   :  { %v1835_v33 = vadd.f32 %v2479_v30, %v1771_v55  ;;  %v2482_v49 = vadd.f32 %v2481_v48, %v2480_v45  ;;  %v2521_v50 = vpop.f32.mrb[51].mxu1 }
 0x15b   :  { %v2522_v42 = vadd.f32 %v2521_v50, %v2520_v47 }
 0x15c   :  { %v1899_v52 = vadd.f32 %v2519_v46, %v1835_v33  ;;  %v1838_v53 = vadd.f32 %v2482_v49, %v1774_v57 }
 0x15e   :  { %v1928_v54 = vadd.f32 %v3270_v51, %v1899_v52  ;;  %v1902_v56 = vadd.f32 %v2522_v42, %v1838_v53  ;;  %v2483_v59 = vpop.f32.mrb[52].mxu0 }
 0x15f   :  { %v2523_v44 = vpop.f32.mrb[52].mxu1  ;;  %v2484_v61 = vpop.f32.mrb[53].mxu0 }
 0x160   :  { %vm1952_vm0 = vcmp.ge.f32.partialorder %v1928_v54, 0.0  ;;  %v1959_v62 = vmul.f32 0.2, %v1928_v54  ;;  %v1929_v55 = vadd.f32 %v3270_v51, %v1902_v56  ;;  %v2485_v63 = vadd.f32 %v2484_v61, %v2483_v59  ;;  %v2524_v0 = vpop.f32.mrb[53].mxu1  ;;  %v2486_v1 = vpop.f32.mrb[54].mxu0 }
 0x161   :  { %v2525_v2 = vadd.f32 %v2524_v0, %v2523_v44  ;;  %v2526_v4 = vpop.f32.mrb[54].mxu1  ;;  %v2487_v6 = vpop.f32.mrb[55].mxu0 }
 0x162   :  { %v1966_v7 = vsel %vm1952_vm0, %v1928_v54, %v1959_v62  ;;  %vm1953_vm2 = vcmp.ge.f32.partialorder %v1929_v55, 0.0  ;;  %v1960_v57 = vmul.f32 0.2, %v1929_v55  ;;  %v1843_v8 = vadd.f32 %v2485_v63, %v3257_v58  ;;  %v2527_v9 = vpop.f32.mrb[55].mxu1 }
 0x163   :  { %v2214_v10 = vpack.c.bf16 %v1966_v7, %v1966_v7  ;;  %v2488_v60 = vadd.f32 %v2487_v6, %v2486_v1  ;;  %v2528_v12 = vadd.f32 %v2527_v9, %v2526_v4 }
 0x164   :  { %v1967_v14 = vsel %vm1953_vm2, %v1929_v55, %v1960_v57  ;;  %v1907_v15 = vadd.f32 %v2525_v2, %v1843_v8 }
 0x165   :  { %2003 = vst.msk [vmem:[%s3315_s3] sm:$0xf] %vm2002_vm1, %v2214_v10  ;;  %v2215_v5 = vpack.c.bf16 %v1967_v14, %v1967_v14  ;;  %v1846_v16 = vadd.f32 %v2488_v60, %v3259_v11 }
 0x166   :  { %v1930_v18 = vadd.f32 %v3270_v51, %v1907_v15  ;;  %v2489_v20 = vpop.f32.mrb[56].mxu0 }
 0x167   :  { %2004 = vst.msk [vmem:[%s3315_s3 + $0x4] sm:$0xf] %vm2002_vm1, %v2215_v5  ;;  %v1910_v58 = vadd.f32 %v2528_v12, %v1846_v16  ;;  %v2529_v21 = vpop.f32.mrb[56].mxu1  ;;  %v2490_v22 = vpop.f32.mrb[57].mxu0 }
 0x168   :  { %vm1954_vm3 = vcmp.ge.f32.partialorder %v1930_v18, 0.0  ;;  %v1961_v23 = vmul.f32 0.2, %v1930_v18  ;;  %v2491_v24 = vadd.f32 %v2490_v22, %v2489_v20  ;;  %v2530_v3 = vpop.f32.mrb[57].mxu1  ;;  %v2492_v26 = vpop.f32.mrb[58].mxu0 }
 0x169   :  { %v1931_v13 = vadd.f32 %v3270_v51, %v1910_v58  ;;  %v2531_v28 = vadd.f32 %v2530_v3, %v2529_v21  ;;  %v2532_v11 = vpop.f32.mrb[58].mxu1  ;;  %v2493_v31 = vpop.f32.mrb[59].mxu0 }
 0x16a   :  { %v1968_v32 = vsel %vm1954_vm3, %v1930_v18, %v1961_v23  ;;  %v1851_v19 = vadd.f32 %v2491_v24, %v3261_v25  ;;  %v2494_v34 = vadd.f32 %v2493_v31, %v2492_v26  ;;  %v2533_v35 = vpop.f32.mrb[59].mxu1 }
 0x16b   :  { %v2216_v36 = vpack.c.bf16 %v1968_v32, %v1968_v32  ;;  %vm1955_vm4 = vcmp.ge.f32.partialorder %v1931_v13, 0.0  ;;  %v1962_v37 = vmul.f32 0.2, %v1931_v13  ;;  %v2534_v38 = vadd.f32 %v2533_v35, %v2532_v11 }
 0x16c   :  { %v1915_v39 = vadd.f32 %v2531_v28, %v1851_v19  ;;  %v1854_v40 = vadd.f32 %v2494_v34, %v3263_v27 }
 0x16d   :  { %2005 = vst.msk [vmem:[%s3315_s3 + $0x8] sm:$0xf] %vm2002_vm1, %v2216_v36  ;;  %v1969_v41 = vsel %vm1955_vm4, %v1931_v13, %v1962_v37 }
 0x16e   :  { %v2217_v43 = vpack.c.bf16 %v1969_v41, %v1969_v41  ;;  %v1932_v30 = vadd.f32 %v3270_v51, %v1915_v39  ;;  %v1918_v29 = vadd.f32 %v2534_v38, %v1854_v40  ;;  %v2495_v25 = vpop.f32.mrb[60].mxu0 }
 0x16f   :  { %v2535_v45 = vpop.f32.mrb[60].mxu1  ;;  %v2496_v46 = vpop.f32.mrb[61].mxu0 }
 0x170   :  { %2006 = vst.msk [vmem:[%s3315_s3 + $0xc] sm:$0xf] %vm2002_vm1, %v2217_v43  ;;  %vm1956_vm5 = vcmp.ge.f32.partialorder %v1932_v30, 0.0  ;;  %v1963_v27 = vmul.f32 0.2, %v1932_v30  ;;  %v1933_v47 = vadd.f32 %v3270_v51, %v1918_v29  ;;  %v2497_v48 = vadd.f32 %v2496_v46, %v2495_v25  ;;  %v2536_v33 = vpop.f32.mrb[61].mxu1 }
 0x171   :  { %v2498_v49 = vpop.f32.mrb[62].mxu0  ;;  %v2537_v50 = vadd.f32 %v2536_v33, %v2535_v45  ;;  %v2538_v42 = vpop.f32.mrb[62].mxu1 }
 0x172   :  { %v2499_v52 = vpop.f32.mrb[63].mxu0  ;;  %v1970_v53 = vsel %vm1956_vm5, %v1932_v30, %v1963_v27  ;;  %vm1957_vm6 = vcmp.ge.f32.partialorder %v1933_v47, 0.0  ;;  %v1964_v54 = vmul.f32 0.2, %v1933_v47  ;;  %v1859_v56 = vadd.f32 %v2497_v48, %v3265_v17  ;;  %v2539_v59 = vpop.f32.mrb[63].mxu1 }
 0x173   :  { %v2218_v44 = vpack.c.bf16 %v1970_v53, %v1970_v53 }
 0x174   :  { %v1971_v61 = vsel %vm1957_vm6, %v1933_v47, %v1964_v54  ;;  %v1923_v62 = vadd.f32 %v2537_v50, %v1859_v56 }
 0x175   :  { %2007 = vst.msk [vmem:[%s3315_s3 + $0x10] sm:$0xf] %vm2002_vm1, %v2218_v44  ;;  %v2219_v55 = vpack.c.bf16 %v1971_v61, %v1971_v61 }
 0x176   :  { %v1934_v63 = vadd.f32 %v3270_v51, %v1923_v62 }
 0x177   :  { %2008 = vst.msk [vmem:[%s3315_s3 + $0x14] sm:$0xf] %vm2002_vm1, %v2219_v55 }
 0x178   :  { %vm1958_vm7 = vcmp.ge.f32.partialorder %v1934_v63, 0.0  ;;  %v1965_v0 = vmul.f32 0.2, %v1934_v63 }
 0x17a   :  { %v1972_v17 = vsel %vm1958_vm7, %v1934_v63, %v1965_v0 }
 0x17b   :  { %v2220_v1 = vpack.c.bf16 %v1972_v17, %v1972_v17 }
 0x17d   :  { %2009 = vst.msk [vmem:[%s3315_s3 + $0x18] sm:$0xf] %vm2002_vm1, %v2220_v1 }

// kernel: _lambda_.9
= control target key start
LH: loop header
LB: loop body
LE: loop exit
PB: predicated region body
PF: predicated region fallthrough
CT: control target
= control target key end

     0   :  { %vm5309_vm0 = vcmask 3072   ;;  %s9384_s1 = inlined_call_operand.vmem [shape: bf16[4096,128], index: 1, kind: input, shape index: {}]   ;;  %s9385_s0 = inlined_call_operand.vmem [shape: bf16[128,4096], index: 0, kind: input, shape index: {}]   ;;  %s9386_s2 = inlined_call_operand.vmem [shape: f32[1,128], index: 2, kind: input, shape index: {}]   ;;  %s9387_s3 = inlined_call_operand.vmem [shape: bf16[128,1], index: 3, kind: output, shape index: {}]  }
   0x1   :  { %v6899_v0 = vld [vmem:[%s9384_s1 + $0x40] sm:$0xff]   ;;  %v6903_v4 = vld [vmem:[%s9384_s1 + $0x48] sm:$0xff]   ;;  %v6907_v8 = vld [vmem:[%s9384_s1 + $0x50] sm:$0xff]  }
   0x2   :  { %v6900_v1 = vld [vmem:[%s9384_s1 + $0xc0] sm:$0xff]   ;;  %5875 = vmatprep.subr.bf16.mxu0 %v6899_v0  ;;  %v6904_v5 = vld [vmem:[%s9384_s1 + $0xc8] sm:$0xff]   ;;  %v6908_v9 = vld [vmem:[%s9384_s1 + $0xd0] sm:$0xff]  }
   0x3   :  { %v6901_v2 = vld [vmem:[%s9384_s1] sm:$0xff]   ;;  %5939 = vmatprep.subr.bf16.mxu1 %v6900_v1  ;;  %v6905_v6 = vld [vmem:[%s9384_s1 + $0x8] sm:$0xff]   ;;  %v6909_v10 = vld [vmem:[%s9384_s1 + $0x10] sm:$0xff]  }
   0x4   :  { %v6902_v3 = vld [vmem:[%s9384_s1 + $0x80] sm:$0xff]   ;;  %5876 = vmatpush3.bf16.msra.mxu0 %v6901_v2  ;;  %v6906_v7 = vld [vmem:[%s9384_s1 + $0x88] sm:$0xff]   ;;  %v6910_v11 = vld [vmem:[%s9384_s1 + $0x90] sm:$0xff]  }
   0x5   :  { %5940 = vmatpush3.bf16.msra.mxu1 %v6902_v3  ;;  %5877 = vmatprep.subr.bf16.mxu0 %v6903_v4  ;;  %v6911_v12 = vld [vmem:[%s9384_s1 + $0x58] sm:$0xff]   ;;  %v6915_v16 = vld [vmem:[%s9384_s1 + $0x60] sm:$0xff]   ;;  %v6919_v20 = vld [vmem:[%s9384_s1 + $0x68] sm:$0xff]  }
   0x6   :  { %5941 = vmatprep.subr.bf16.mxu1 %v6904_v5  ;;  %v6912_v13 = vld [vmem:[%s9384_s1 + $0xd8] sm:$0xff]   ;;  %v6916_v17 = vld [vmem:[%s9384_s1 + $0xe0] sm:$0xff]   ;;  %v6920_v21 = vld [vmem:[%s9384_s1 + $0xe8] sm:$0xff]  }
   0x7   :  { %v6913_v14 = vld [vmem:[%s9384_s1 + $0x18] sm:$0xff]   ;;  %v6917_v18 = vld [vmem:[%s9384_s1 + $0x20] sm:$0xff]   ;;  %v6921_v22 = vld [vmem:[%s9384_s1 + $0x28] sm:$0xff]  }
   0x8   :  { %5878 = vmatpush3.bf16.msra.mxu0 %v6905_v6  ;;  %v6914_v15 = vld [vmem:[%s9384_s1 + $0x98] sm:$0xff]   ;;  %v6918_v19 = vld [vmem:[%s9384_s1 + $0xa0] sm:$0xff]   ;;  %v6922_v23 = vld [vmem:[%s9384_s1 + $0xa8] sm:$0xff]  }
   0x9   :  { %5942 = vmatpush3.bf16.msra.mxu1 %v6906_v7  ;;  %5879 = vmatprep.subr.bf16.mxu0 %v6907_v8  ;;  %v6923_v24 = vld [vmem:[%s9384_s1 + $0x70] sm:$0xff]   ;;  %v6927_v28 = vld [vmem:[%s9384_s1 + $0x78] sm:$0xff]   ;;  %v58_v32 = vld [vmem:[%s9385_s0] sm:$0xff] }
   0xa   :  { %5943 = vmatprep.subr.bf16.mxu1 %v6908_v9  ;;  %v6924_v25 = vld [vmem:[%s9384_s1 + $0xf0] sm:$0xff]   ;;  %v6928_v29 = vld [vmem:[%s9384_s1 + $0xf8] sm:$0xff]   ;;  %v74_v33 = vld [vmem:[%s9385_s0 + $0x80] sm:$0xff] }
   0xb   :  { %v6925_v26 = vld [vmem:[%s9384_s1 + $0x30] sm:$0xff]   ;;  %v6929_v30 = vld [vmem:[%s9384_s1 + $0x38] sm:$0xff]   ;;  %v59_v34 = vld [vmem:[%s9385_s0 + $0x8] sm:$0xff]  ;;  %v5331_v35 = vcombine.low %v58_v32, %v74_v33  ;;  %v5332_v36 = vcombine.high %v58_v32, %v74_v33 }
   0xc   :  { %5880 = vmatpush3.bf16.msra.mxu0 %v6909_v10  ;;  %v6926_v27 = vld [vmem:[%s9384_s1 + $0xb0] sm:$0xff]   ;;  %v6930_v31 = vld [vmem:[%s9384_s1 + $0xb8] sm:$0xff]   ;;  %v75_v37 = vld [vmem:[%s9385_s0 + $0x88] sm:$0xff] }
   0xd   :  { %5944 = vmatpush3.bf16.msra.mxu1 %v6910_v11  ;;  %5881 = vmatprep.subr.bf16.mxu0 %v6911_v12  ;;  %v5333_v38 = vcombine.low %v59_v34, %v75_v37  ;;  %v5334_v39 = vcombine.high %v59_v34, %v75_v37  ;;  %v6931_v40 = vld [vmem:[%s9384_s1 + $0x140] sm:$0xff]   ;;  %v91_v47 = vld [vmem:[%s9385_s0 + $0x108] sm:$0xff]  ;;  %v6939_v62 = vld [vmem:[%s9384_s1 + $0x150] sm:$0xff]  }
   0xe   :  { %5945 = vmatprep.subr.bf16.mxu1 %v6912_v13  ;;  %3674 = vmatprep.mubr.bf16.mxu0 %v5332_v36  ;;  %v6932_v41 = vld [vmem:[%s9384_s1 + $0x100] sm:$0xff]   ;;  %v107_v48 = vld [vmem:[%s9385_s0 + $0x188] sm:$0xff]  ;;  %v6940_v63 = vld [vmem:[%s9384_s1 + $0x110] sm:$0xff]  }
   0xf   :  { %3771 = vmatprep.mubr.bf16.mxu1 %v5334_v39  ;;  %v6933_v42 = vld [vmem:[%s9384_s1 + $0x1c0] sm:$0xff]   ;;  %v5366_v49 = vcombine.high %v91_v47, %v107_v48  ;;  %v6935_v50 = vld [vmem:[%s9384_s1 + $0x148] sm:$0xff]   ;;  %v5365_v53 = vcombine.low %v91_v47, %v107_v48  ;;  %v6941_v0 = vld [vmem:[%s9384_s1 + $0x1d0] sm:$0xff]  }
  0x10   :  { %5882 = vmatpush3.bf16.msra.mxu0 %v6913_v14  ;;  %v6934_v43 = vld [vmem:[%s9384_s1 + $0x180] sm:$0xff]   ;;  %v6936_v52 = vld [vmem:[%s9384_s1 + $0x108] sm:$0xff]   ;;  %v6942_v1 = vld [vmem:[%s9384_s1 + $0x190] sm:$0xff]  }
  0x11   :  { %5946 = vmatpush3.bf16.msra.mxu1 %v6914_v15  ;;  %5883 = vmatprep.subr.bf16.mxu0 %v6915_v16  ;;  %v90_v44 = vld [vmem:[%s9385_s0 + $0x100] sm:$0xff]  ;;  %v6937_v54 = vld [vmem:[%s9384_s1 + $0x1c8] sm:$0xff]   ;;  %v6943_v10 = vld [vmem:[%s9384_s1 + $0x158] sm:$0xff]  }
  0x12   :  { %5947 = vmatprep.subr.bf16.mxu1 %v6916_v17  ;;  %v106_v45 = vld [vmem:[%s9385_s0 + $0x180] sm:$0xff]  ;;  %v6938_v55 = vld [vmem:[%s9384_s1 + $0x188] sm:$0xff]   ;;  %v6944_v11 = vld [vmem:[%s9384_s1 + $0x118] sm:$0xff]  }
  0x13   :  { %v5364_v46 = vcombine.high %v90_v44, %v106_v45  ;;  %v5363_v51 = vcombine.low %v90_v44, %v106_v45  ;;  %v122_v56 = vld [vmem:[%s9385_s0 + $0x200] sm:$0xff]  ;;  %v123_v58 = vld [vmem:[%s9385_s0 + $0x208] sm:$0xff]  ;;  %v6945_v12 = vld [vmem:[%s9384_s1 + $0x1d8] sm:$0xff]  }
  0x14   :  { %5884 = vmatpush3.bf16.msra.mxu0 %v6917_v18  ;;  %v138_v57 = vld [vmem:[%s9385_s0 + $0x280] sm:$0xff]  ;;  %v139_v59 = vld [vmem:[%s9385_s0 + $0x288] sm:$0xff]  ;;  %v6946_v13 = vld [vmem:[%s9384_s1 + $0x198] sm:$0xff]  }
  0x15   :  { %5948 = vmatpush3.bf16.msra.mxu1 %v6918_v19  ;;  %5885 = vmatprep.subr.bf16.mxu0 %v6919_v20  ;;  %v5396_v60 = vcombine.high %v122_v56, %v138_v57  ;;  %v5398_v61 = vcombine.high %v123_v58, %v139_v59  ;;  %v5395_v2 = vcombine.low %v122_v56, %v138_v57  ;;  %v154_v3 = vld [vmem:[%s9385_s0 + $0x300] sm:$0xff]  ;;  %v155_v5 = vld [vmem:[%s9385_s0 + $0x308] sm:$0xff]  ;;  %v6956_v39 = vld [vmem:[%s9384_s1 + $0x130] sm:$0xff]  }
  0x16   :  { %5949 = vmatprep.subr.bf16.mxu1 %v6920_v21  ;;  %v170_v4 = vld [vmem:[%s9385_s0 + $0x380] sm:$0xff]  ;;  %v5397_v6 = vcombine.low %v123_v58, %v139_v59  ;;  %v171_v8 = vld [vmem:[%s9385_s0 + $0x388] sm:$0xff]  ;;  %v6960_v48 = vld [vmem:[%s9384_s1 + $0x138] sm:$0xff]  }
  0x17   :  { %v5428_v7 = vcombine.high %v154_v3, %v170_v4  ;;  %v5430_v9 = vcombine.high %v155_v5, %v171_v8  ;;  %v186_v14 = vld [vmem:[%s9385_s0 + $0x400] sm:$0xff]  ;;  %v187_v16 = vld [vmem:[%s9385_s0 + $0x408] sm:$0xff]  ;;  %v5427_v19 = vcombine.low %v154_v3, %v170_v4  ;;  %v5429_v21 = vcombine.low %v155_v5, %v171_v8  ;;  %v77_v3 = vld [vmem:[%s9385_s0 + $0x98] sm:$0xff] }
  0x18   :  { %5886 = vmatpush3.bf16.msra.mxu0 %v6921_v22  ;;  %v202_v15 = vld [vmem:[%s9385_s0 + $0x480] sm:$0xff]  ;;  %v203_v17 = vld [vmem:[%s9385_s0 + $0x488] sm:$0xff]  ;;  %v92_v8 = vld [vmem:[%s9385_s0 + $0x110] sm:$0xff] }
  0x19   :  { %5950 = vmatpush3.bf16.msra.mxu1 %v6922_v23  ;;  %5887 = vmatprep.subr.bf16.mxu0 %v6923_v24  ;;  %v6947_v18 = vld [vmem:[%s9384_s1 + $0x160] sm:$0xff]   ;;  %v5460_v22 = vcombine.high %v186_v14, %v202_v15  ;;  %v5462_v24 = vcombine.high %v187_v16, %v203_v17  ;;  %v6953_v32 = vld [vmem:[%s9384_s1 + $0x1e8] sm:$0xff]   ;;  %v5459_v34 = vcombine.low %v186_v14, %v202_v15 }
  0x1a   :  { %5951 = vmatprep.subr.bf16.mxu1 %v6924_v25  ;;  %v6948_v20 = vld [vmem:[%s9384_s1 + $0x120] sm:$0xff]   ;;  %v6954_v33 = vld [vmem:[%s9384_s1 + $0x1a8] sm:$0xff]  }
  0x1b   :  { %v6949_v23 = vld [vmem:[%s9384_s1 + $0x1e0] sm:$0xff]   ;;  %v251_v44 = vld [vmem:[%s9385_s0 + $0x608] sm:$0xff] }
  0x1c   :  { %5888 = vmatpush3.bf16.msra.mxu0 %v6925_v26  ;;  %v6950_v25 = vld [vmem:[%s9384_s1 + $0x1a0] sm:$0xff]   ;;  %v267_v45 = vld [vmem:[%s9385_s0 + $0x688] sm:$0xff] }
  0x1d   :  { %5952 = vmatpush3.bf16.msra.mxu1 %v6926_v27  ;;  %5889 = vmatprep.subr.bf16.mxu0 %v6927_v28  ;;  %v218_v26 = vld [vmem:[%s9385_s0 + $0x500] sm:$0xff]  ;;  %v6951_v28 = vld [vmem:[%s9384_s1 + $0x168] sm:$0xff]  }
  0x1e   :  { %5953 = vmatprep.subr.bf16.mxu1 %v6928_v29  ;;  %v234_v27 = vld [vmem:[%s9385_s0 + $0x580] sm:$0xff]  ;;  %v219_v29 = vld [vmem:[%s9385_s0 + $0x508] sm:$0xff] }
  0x1f   :  { %v5492_v36 = vcombine.high %v218_v26, %v234_v27  ;;  %v5491_v47 = vcombine.low %v218_v26, %v234_v27  ;;  %v6963_v56 = vld [vmem:[%s9384_s1 + $0x240] sm:$0xff]   ;;  %v283_v57 = vld [vmem:[%s9385_s0 + $0x708] sm:$0xff]  ;;  %v6971_v26 = vld [vmem:[%s9384_s1 + $0x250] sm:$0xff]  }
  0x20   :  { %5890 = vmatpush3.bf16.msra.mxu0 %v6929_v30  ;;  %v235_v30 = vld [vmem:[%s9385_s0 + $0x588] sm:$0xff]  ;;  %v6965_v58 = vld [vmem:[%s9384_s1 + $0x2c0] sm:$0xff]   ;;  %v6973_v27 = vld [vmem:[%s9384_s1 + $0x2d0] sm:$0xff]  }
  0x21   :  { %5954 = vmatpush3.bf16.msra.mxu1 %v6930_v31  ;;  %6003 = vmatprep.subr.bf16.mxu0 %v6931_v40  ;;  %v6952_v31 = vld [vmem:[%s9384_s1 + $0x128] sm:$0xff]   ;;  %v5494_v37 = vcombine.high %v219_v29, %v235_v30  ;;  %v6957_v40 = vld [vmem:[%s9384_s1 + $0x1f0] sm:$0xff]   ;;  %v6966_v15 = vld [vmem:[%s9384_s1 + $0x280] sm:$0xff]  }
  0x22   :  { %6067 = vmatprep.subr.bf16.mxu1 %v6933_v42  ;;  %v266_v42 = vld [vmem:[%s9385_s0 + $0x680] sm:$0xff]  ;;  %v299_v59 = vld [vmem:[%s9385_s0 + $0x788] sm:$0xff] }
  0x23   :  { %3675 = vmatmul.mubr.bf16.vlgmr.msra.gmra.mrb[0].mxu0 %v5331_v35  ;;  %v5461_v35 = vcombine.low %v187_v16, %v203_v17  ;;  %v5557_v5 = vcombine.low %v283_v57, %v299_v59  ;;  %v6967_v17 = vld [vmem:[%s9384_s1 + $0x248] sm:$0xff]  }
  0x24   :  { %3772 = vmatmul.mubr.bf16.vlgmr.msra.gmra.mrb[0].mxu1 %v5333_v38  ;;  %6004 = vmatpush3.bf16.msra.mxu0 %v6932_v41  ;;  %v6955_v38 = vld [vmem:[%s9384_s1 + $0x170] sm:$0xff]   ;;  %v250_v41 = vld [vmem:[%s9385_s0 + $0x600] sm:$0xff] }
  0x25   :  { %6068 = vmatpush3.bf16.msra.mxu1 %v6934_v43  ;;  %3682 = vmatprep.mubr.bf16.mxu0 %v5364_v46  ;;  %v6958_v43 = vld [vmem:[%s9384_s1 + $0x1b0] sm:$0xff]   ;;  %v6959_v46 = vld [vmem:[%s9384_s1 + $0x178] sm:$0xff]  }
  0x26   :  { %3779 = vmatprep.mubr.bf16.mxu1 %v5366_v49  ;;  %6005 = vmatprep.subr.bf16.mxu0 %v6935_v50  ;;  %v5493_v49 = vcombine.low %v219_v29, %v235_v30  ;;  %v5524_v50 = vcombine.high %v250_v41, %v266_v42 }
  0x27   :  { %6069 = vmatprep.subr.bf16.mxu1 %v6937_v54  ;;  %v282_v54 = vld [vmem:[%s9385_s0 + $0x700] sm:$0xff] }
  0x28   :  { %6006 = vmatpush3.bf16.msra.mxu0 %v6936_v52  ;;  %v5526_v52 = vcombine.high %v251_v44, %v267_v45 }
  0x29   :  { %6070 = vmatpush3.bf16.msra.mxu1 %v6938_v55  ;;  %6007 = vmatprep.subr.bf16.mxu0 %v6939_v62  ;;  %v298_v55 = vld [vmem:[%s9385_s0 + $0x780] sm:$0xff] }
  0x2a   :  { %6071 = vmatprep.subr.bf16.mxu1 %v6941_v0  ;;  %v5556_v62 = vcombine.high %v282_v54, %v298_v55  ;;  %v60_v0 = vld [vmem:[%s9385_s0 + $0x10] sm:$0xff]  ;;  %v5555_v4 = vcombine.low %v282_v54, %v298_v55  ;;  %v189_v54 = vld [vmem:[%s9385_s0 + $0x418] sm:$0xff] }
  0x2b   :  { %3683 = vmatmul.mubr.bf16.gmra.mrb[4].mxu0 %v5363_v51  ;;  %v6961_v51 = vld [vmem:[%s9384_s1 + $0x1f8] sm:$0xff]  }
  0x2c   :  { %3780 = vmatmul.mubr.bf16.gmra.mrb[4].mxu1 %v5365_v53  ;;  %3690 = vmatprep.mubr.bf16.mxu0 %v5396_v60  ;;  %v6962_v53 = vld [vmem:[%s9384_s1 + $0x1b8] sm:$0xff]   ;;  %v5523_v60 = vcombine.low %v250_v41, %v266_v42  ;;  %v6979_v42 = vld [vmem:[%s9384_s1 + $0x260] sm:$0xff]  }
  0x2d   :  { %3787 = vmatprep.mubr.bf16.mxu1 %v5398_v61  ;;  %6008 = vmatpush3.bf16.msra.mxu0 %v6940_v63  ;;  %v5525_v61 = vcombine.low %v251_v44, %v267_v45  ;;  %v5558_v63 = vcombine.high %v283_v57, %v299_v59  ;;  %v6978_v41 = vld [vmem:[%s9384_s1 + $0x298] sm:$0xff]   ;;  %v6981_v44 = vld [vmem:[%s9384_s1 + $0x2e0] sm:$0xff]   ;;  %v6986_v57 = vld [vmem:[%s9384_s1 + $0x2a8] sm:$0xff]  }
  0x2e   :  { %6072 = vmatpush3.bf16.msra.mxu1 %v6942_v1  ;;  %6009 = vmatprep.subr.bf16.mxu0 %v6943_v10  ;;  %v76_v1 = vld [vmem:[%s9385_s0 + $0x90] sm:$0xff]  ;;  %v205_v55 = vld [vmem:[%s9385_s0 + $0x498] sm:$0xff] }
  0x2f   :  { %6073 = vmatprep.subr.bf16.mxu1 %v6945_v12  ;;  %v5335_v10 = vcombine.low %v60_v0, %v76_v1  ;;  %v93_v12 = vld [vmem:[%s9385_s0 + $0x118] sm:$0xff] }
  0x31   :  { %6010 = vmatpush3.bf16.msra.mxu0 %v6944_v11  ;;  %v6964_v11 = vld [vmem:[%s9384_s1 + $0x200] sm:$0xff]  }
  0x32   :  { %6074 = vmatpush3.bf16.msra.mxu1 %v6946_v13  ;;  %6011 = vmatprep.subr.bf16.mxu0 %v6947_v18  ;;  %v109_v13 = vld [vmem:[%s9385_s0 + $0x198] sm:$0xff] }
  0x33   :  { %3691 = vmatmul.mubr.bf16.gmra.mrb[8].mxu0 %v5395_v2  ;;  %6075 = vmatprep.subr.bf16.mxu1 %v6949_v23  ;;  %v61_v2 = vld [vmem:[%s9385_s0 + $0x18] sm:$0xff]  ;;  %v5370_v18 = vcombine.high %v93_v12, %v109_v13  ;;  %v140_v23 = vld [vmem:[%s9385_s0 + $0x290] sm:$0xff]  ;;  %v5369_v29 = vcombine.low %v93_v12, %v109_v13  ;;  %v6997_v12 = vld [vmem:[%s9384_s1 + $0x3c0] sm:$0xff]   ;;  %v5465_v13 = vcombine.low %v189_v54, %v205_v55 }
  0x34   :  { %3788 = vmatmul.mubr.bf16.gmra.mrb[8].mxu1 %v5397_v6  ;;  %3698 = vmatprep.mubr.bf16.mxu0 %v5428_v7  ;;  %v5336_v6 = vcombine.high %v60_v0, %v76_v1  ;;  %v5338_v7 = vcombine.high %v61_v2, %v77_v3  ;;  %v5337_v14 = vcombine.low %v61_v2, %v77_v3  ;;  %v6988_v0 = vld [vmem:[%s9384_s1 + $0x230] sm:$0xff]   ;;  %v6991_v2 = vld [vmem:[%s9384_s1 + $0x278] sm:$0xff]  }
  0x35   :  { %3795 = vmatprep.mubr.bf16.mxu1 %v5430_v9  ;;  %6012 = vmatpush3.bf16.msra.mxu0 %v6948_v20  ;;  %v108_v9 = vld [vmem:[%s9385_s0 + $0x190] sm:$0xff]  ;;  %v6969_v20 = vld [vmem:[%s9384_s1 + $0x2c8] sm:$0xff]  }
  0x36   :  { %6076 = vmatpush3.bf16.msra.mxu1 %v6950_v25  ;;  %6013 = vmatprep.subr.bf16.mxu0 %v6951_v28  ;;  %v5368_v16 = vcombine.high %v92_v8, %v108_v9  ;;  %v141_v25 = vld [vmem:[%s9385_s0 + $0x298] sm:$0xff]  ;;  %v5367_v28 = vcombine.low %v92_v8, %v108_v9  ;;  %v6990_v1 = vld [vmem:[%s9384_s1 + $0x2b0] sm:$0xff]  }
  0x37   :  { %6077 = vmatprep.subr.bf16.mxu1 %v6953_v32  ;;  %v6972_v32 = vld [vmem:[%s9384_s1 + $0x210] sm:$0xff]   ;;  %v6992_v8 = vld [vmem:[%s9384_s1 + $0x238] sm:$0xff]  }
  0x38   :  { %v220_v3 = vld [vmem:[%s9385_s0 + $0x510] sm:$0xff]  ;;  %v6994_v9 = vld [vmem:[%s9384_s1 + $0x2b8] sm:$0xff]  }
  0x39   :  { %6014 = vmatpush3.bf16.msra.mxu0 %v6952_v31 }
  0x3a   :  { %6078 = vmatpush3.bf16.msra.mxu1 %v6954_v33  ;;  %6015 = vmatprep.subr.bf16.mxu0 %v6955_v38  ;;  %v6974_v33 = vld [vmem:[%s9384_s1 + $0x290] sm:$0xff]   ;;  %v157_v38 = vld [vmem:[%s9385_s0 + $0x318] sm:$0xff] }
  0x3b   :  { %3699 = vmatmul.mubr.bf16.gmra.mrb[12].mxu0 %v5427_v19  ;;  %6079 = vmatprep.subr.bf16.mxu1 %v6957_v40  ;;  %v6968_v19 = vld [vmem:[%s9384_s1 + $0x208] sm:$0xff]   ;;  %v6976_v40 = vld [vmem:[%s9384_s1 + $0x218] sm:$0xff]  }
  0x3c   :  { %3796 = vmatmul.mubr.bf16.gmra.mrb[12].mxu1 %v5429_v21  ;;  %3706 = vmatprep.mubr.bf16.mxu0 %v5460_v22  ;;  %v6970_v21 = vld [vmem:[%s9384_s1 + $0x288] sm:$0xff]   ;;  %v124_v22 = vld [vmem:[%s9385_s0 + $0x210] sm:$0xff] }
  0x3d   :  { %3803 = vmatprep.mubr.bf16.mxu1 %v5462_v24  ;;  %6016 = vmatpush3.bf16.msra.mxu0 %v6956_v39  ;;  %v125_v24 = vld [vmem:[%s9385_s0 + $0x218] sm:$0xff]  ;;  %v5400_v30 = vcombine.high %v124_v22, %v140_v23 }
  0x3e   :  { %6080 = vmatpush3.bf16.msra.mxu1 %v6958_v43  ;;  %6017 = vmatprep.subr.bf16.mxu0 %v6959_v46  ;;  %v5402_v31 = vcombine.high %v125_v24, %v141_v25  ;;  %v173_v39 = vld [vmem:[%s9385_s0 + $0x398] sm:$0xff]  ;;  %v5399_v43 = vcombine.low %v124_v22, %v140_v23  ;;  %v5401_v45 = vcombine.low %v125_v24, %v141_v25  ;;  %v284_v24 = vld [vmem:[%s9385_s0 + $0x710] sm:$0xff] }
  0x3f   :  { %6081 = vmatprep.subr.bf16.mxu1 %v6961_v51  ;;  %v188_v51 = vld [vmem:[%s9385_s0 + $0x410] sm:$0xff] }
  0x40   :  { %v300_v25 = vld [vmem:[%s9385_s0 + $0x790] sm:$0xff] }
  0x41   :  { %6018 = vmatpush3.bf16.msra.mxu0 %v6960_v48  ;;  %v5434_v48 = vcombine.high %v157_v38, %v173_v39 }
  0x42   :  { %6082 = vmatpush3.bf16.msra.mxu1 %v6962_v53  ;;  %6131 = vmatprep.subr.bf16.mxu0 %v6963_v56  ;;  %v204_v53 = vld [vmem:[%s9385_s0 + $0x490] sm:$0xff]  ;;  %v6984_v56 = vld [vmem:[%s9384_s1 + $0x228] sm:$0xff]  }
  0x43   :  { %3707 = vmatmul.mubr.bf16.gmra.mrb[16].mxu0 %v5459_v34  ;;  %6195 = vmatprep.subr.bf16.mxu1 %v6965_v58  ;;  %v6975_v34 = vld [vmem:[%s9384_s1 + $0x258] sm:$0xff]   ;;  %v6987_v58 = vld [vmem:[%s9384_s1 + $0x270] sm:$0xff]  }
  0x44   :  { %3804 = vmatmul.mubr.bf16.gmra.mrb[16].mxu1 %v5461_v35  ;;  %3714 = vmatprep.mubr.bf16.mxu0 %v5492_v36  ;;  %v156_v35 = vld [vmem:[%s9385_s0 + $0x310] sm:$0xff] }
  0x45   :  { %3811 = vmatprep.mubr.bf16.mxu1 %v5494_v37  ;;  %v172_v36 = vld [vmem:[%s9385_s0 + $0x390] sm:$0xff]  ;;  %v6977_v37 = vld [vmem:[%s9384_s1 + $0x2d8] sm:$0xff]  }
  0x46   :  { %v5432_v46 = vcombine.high %v156_v35, %v172_v36  ;;  %v5431_v59 = vcombine.low %v156_v35, %v172_v36  ;;  %v79_v35 = vld [vmem:[%s9385_s0 + $0xa8] sm:$0xff]  ;;  %v5559_v36 = vcombine.low %v284_v24, %v300_v25 }
  0x4b   :  { %3715 = vmatmul.mubr.bf16.gmra.mrb[20].mxu0 %v5491_v47  ;;  %v6980_v47 = vld [vmem:[%s9384_s1 + $0x220] sm:$0xff]  }
  0x4c   :  { %3812 = vmatmul.mubr.bf16.gmra.mrb[20].mxu1 %v5493_v49  ;;  %3722 = vmatprep.mubr.bf16.mxu0 %v5524_v50  ;;  %v6982_v49 = vld [vmem:[%s9384_s1 + $0x2a0] sm:$0xff]   ;;  %v6983_v50 = vld [vmem:[%s9384_s1 + $0x268] sm:$0xff]  }
  0x4d   :  { %3819 = vmatprep.mubr.bf16.mxu1 %v5526_v52  ;;  %v6985_v52 = vld [vmem:[%s9384_s1 + $0x2e8] sm:$0xff]  }
  0x53   :  { %3723 = vmatmul.mubr.bf16.gmra.mrb[24].mxu0 %v5523_v60  ;;  %v6989_v60 = vld [vmem:[%s9384_s1 + $0x2f0] sm:$0xff]  }
  0x54   :  { %3820 = vmatmul.mubr.bf16.gmra.mrb[24].mxu1 %v5525_v61  ;;  %3730 = vmatprep.mubr.bf16.mxu0 %v5556_v62  ;;  %v5433_v61 = vcombine.low %v157_v38, %v173_v39  ;;  %v5464_v62 = vcombine.high %v188_v51, %v204_v53 }
  0x55   :  { %3827 = vmatprep.mubr.bf16.mxu1 %v5558_v63  ;;  %v5466_v63 = vcombine.high %v189_v54, %v205_v55  ;;  %v126_v54 = vld [vmem:[%s9385_s0 + $0x220] sm:$0xff] }
  0x56   :  { %v142_v55 = vld [vmem:[%s9385_s0 + $0x2a0] sm:$0xff] }
  0x5b   :  { %3731 = vmatmul.mubr.bf16.gmra.mrb[28].mxu0 %v5555_v4  ;;  %v236_v4 = vld [vmem:[%s9385_s0 + $0x590] sm:$0xff] }
  0x5c   :  { %3828 = vmatmul.mubr.bf16.gmra.mrb[28].mxu1 %v5557_v5  ;;  %3868 = vmatprep.mubr.bf16.mxu0 %v5336_v6  ;;  %v6993_v5 = vld [vmem:[%s9384_s1 + $0x2f8] sm:$0xff]  }
  0x5d   :  { %3965 = vmatprep.mubr.bf16.mxu1 %v5338_v7  ;;  %v221_v6 = vld [vmem:[%s9385_s0 + $0x518] sm:$0xff] }
  0x5e   :  { %v237_v7 = vld [vmem:[%s9385_s0 + $0x598] sm:$0xff] }
  0x63   :  { %3869 = vmatmul.mubr.bf16.vlgmr.msra.gmra.mrb[32].mxu0 %v5335_v10  ;;  %v6995_v10 = vld [vmem:[%s9384_s1 + $0x340] sm:$0xff]  }
  0x64   :  { %3966 = vmatmul.mubr.bf16.vlgmr.msra.gmra.mrb[32].mxu1 %v5337_v14  ;;  %6132 = vmatpush3.bf16.msra.mxu0 %v6964_v11  ;;  %v5463_v11 = vcombine.low %v188_v51, %v204_v53  ;;  %v5496_v14 = vcombine.high %v220_v3, %v236_v4  ;;  %v7000_v51 = vld [vmem:[%s9384_s1 + $0x308] sm:$0xff]  }
  0x65   :  { %6196 = vmatpush3.bf16.msra.mxu1 %v6966_v15  ;;  %3876 = vmatprep.mubr.bf16.mxu0 %v5368_v16  ;;  %v5498_v15 = vcombine.high %v221_v6, %v237_v7  ;;  %v252_v16 = vld [vmem:[%s9385_s0 + $0x610] sm:$0xff]  ;;  %v7002_v53 = vld [vmem:[%s9384_s1 + $0x388] sm:$0xff]  }
  0x66   :  { %3973 = vmatprep.mubr.bf16.mxu1 %v5370_v18  ;;  %6133 = vmatprep.subr.bf16.mxu0 %v6967_v17  ;;  %v268_v17 = vld [vmem:[%s9385_s0 + $0x690] sm:$0xff]  ;;  %v253_v18 = vld [vmem:[%s9385_s0 + $0x618] sm:$0xff] }
  0x67   :  { %6197 = vmatprep.subr.bf16.mxu1 %v6969_v20  ;;  %v5495_v20 = vcombine.low %v220_v3, %v236_v4  ;;  %v5528_v22 = vcombine.high %v252_v16, %v268_v17  ;;  %v158_v3 = vld [vmem:[%s9385_s0 + $0x320] sm:$0xff] }
  0x68   :  { %6134 = vmatpush3.bf16.msra.mxu0 %v6968_v19  ;;  %v269_v19 = vld [vmem:[%s9385_s0 + $0x698] sm:$0xff]  ;;  %v174_v4 = vld [vmem:[%s9385_s0 + $0x3a0] sm:$0xff] }
  0x69   :  { %6198 = vmatpush3.bf16.msra.mxu1 %v6970_v21  ;;  %6135 = vmatprep.subr.bf16.mxu0 %v6971_v26  ;;  %v5497_v21 = vcombine.low %v221_v6, %v237_v7  ;;  %v5530_v23 = vcombine.high %v253_v18, %v269_v19  ;;  %v285_v26 = vld [vmem:[%s9385_s0 + $0x718] sm:$0xff]  ;;  %v159_v6 = vld [vmem:[%s9385_s0 + $0x328] sm:$0xff] }
  0x6a   :  { %6199 = vmatprep.subr.bf16.mxu1 %v6973_v27  ;;  %v301_v27 = vld [vmem:[%s9385_s0 + $0x798] sm:$0xff]  ;;  %v175_v7 = vld [vmem:[%s9385_s0 + $0x3a8] sm:$0xff] }
  0x6b   :  { %3877 = vmatmul.mubr.bf16.gmra.mrb[36].mxu0 %v5367_v28  ;;  %v5527_v28 = vcombine.low %v252_v16, %v268_v17  ;;  %v5438_v16 = vcombine.high %v159_v6, %v175_v7  ;;  %v7014_v17 = vld [vmem:[%s9384_s1 + $0x3a0] sm:$0xff]  }
  0x6c   :  { %3974 = vmatmul.mubr.bf16.gmra.mrb[36].mxu1 %v5369_v29  ;;  %3884 = vmatprep.mubr.bf16.mxu0 %v5400_v30  ;;  %v5529_v29 = vcombine.low %v253_v18, %v269_v19  ;;  %v5560_v30 = vcombine.high %v284_v24, %v300_v25  ;;  %v7015_v18 = vld [vmem:[%s9384_s1 + $0x368] sm:$0xff]   ;;  %v190_v19 = vld [vmem:[%s9385_s0 + $0x420] sm:$0xff] }
  0x6d   :  { %3981 = vmatprep.mubr.bf16.mxu1 %v5402_v31  ;;  %6136 = vmatpush3.bf16.msra.mxu0 %v6972_v32  ;;  %v5562_v31 = vcombine.high %v285_v26, %v301_v27  ;;  %v62_v32 = vld [vmem:[%s9385_s0 + $0x20] sm:$0xff]  ;;  %v7016_v24 = vld [vmem:[%s9384_s1 + $0x328] sm:$0xff]  }
  0x6e   :  { %6200 = vmatpush3.bf16.msra.mxu1 %v6974_v33  ;;  %6137 = vmatprep.subr.bf16.mxu0 %v6975_v34  ;;  %v78_v33 = vld [vmem:[%s9385_s0 + $0xa0] sm:$0xff]  ;;  %v63_v34 = vld [vmem:[%s9385_s0 + $0x28] sm:$0xff] }
  0x6f   :  { %6201 = vmatprep.subr.bf16.mxu1 %v6977_v37  ;;  %v5561_v37 = vcombine.low %v285_v26, %v301_v27  ;;  %v5340_v38 = vcombine.high %v62_v32, %v78_v33  ;;  %v5342_v39 = vcombine.high %v63_v34, %v79_v35  ;;  %v7018_v25 = vld [vmem:[%s9384_s1 + $0x3a8] sm:$0xff]   ;;  %v7019_v26 = vld [vmem:[%s9384_s1 + $0x370] sm:$0xff]   ;;  %v5435_v27 = vcombine.low %v158_v3, %v174_v4 }
  0x71   :  { %6138 = vmatpush3.bf16.msra.mxu0 %v6976_v40  ;;  %v94_v40 = vld [vmem:[%s9385_s0 + $0x120] sm:$0xff] }
  0x72   :  { %6202 = vmatpush3.bf16.msra.mxu1 %v6978_v41  ;;  %6139 = vmatprep.subr.bf16.mxu0 %v6979_v42  ;;  %v110_v41 = vld [vmem:[%s9385_s0 + $0x1a0] sm:$0xff]  ;;  %v5339_v42 = vcombine.low %v62_v32, %v78_v33  ;;  %v7020_v32 = vld [vmem:[%s9384_s1 + $0x330] sm:$0xff]  }
  0x73   :  { %3885 = vmatmul.mubr.bf16.gmra.mrb[40].mxu0 %v5399_v43  ;;  %6203 = vmatprep.subr.bf16.mxu1 %v6981_v44  ;;  %v6996_v43 = vld [vmem:[%s9384_s1 + $0x300] sm:$0xff]   ;;  %v95_v44 = vld [vmem:[%s9385_s0 + $0x128] sm:$0xff]  ;;  %v7022_v33 = vld [vmem:[%s9384_s1 + $0x3b0] sm:$0xff]  }
  0x74   :  { %3982 = vmatmul.mubr.bf16.gmra.mrb[40].mxu1 %v5401_v45  ;;  %3892 = vmatprep.mubr.bf16.mxu0 %v5432_v46  ;;  %v111_v45 = vld [vmem:[%s9385_s0 + $0x1a8] sm:$0xff]  ;;  %v5341_v46 = vcombine.low %v63_v34, %v79_v35  ;;  %v7023_v34 = vld [vmem:[%s9384_s1 + $0x378] sm:$0xff]   ;;  %v222_v35 = vld [vmem:[%s9385_s0 + $0x520] sm:$0xff] }
  0x75   :  { %3989 = vmatprep.mubr.bf16.mxu1 %v5434_v48  ;;  %6140 = vmatpush3.bf16.msra.mxu0 %v6980_v47  ;;  %v6998_v47 = vld [vmem:[%s9384_s1 + $0x380] sm:$0xff]   ;;  %v5372_v48 = vcombine.high %v94_v40, %v110_v41 }
  0x76   :  { %6204 = vmatpush3.bf16.msra.mxu1 %v6982_v49  ;;  %6141 = vmatprep.subr.bf16.mxu0 %v6983_v50  ;;  %v6999_v49 = vld [vmem:[%s9384_s1 + $0x348] sm:$0xff]   ;;  %v5374_v50 = vcombine.high %v95_v44, %v111_v45 }
  0x77   :  { %6205 = vmatprep.subr.bf16.mxu1 %v6985_v52  ;;  %v7001_v52 = vld [vmem:[%s9384_s1 + $0x3c8] sm:$0xff]  }
  0x79   :  { %6142 = vmatpush3.bf16.msra.mxu0 %v6984_v56  ;;  %v127_v56 = vld [vmem:[%s9385_s0 + $0x228] sm:$0xff] }
  0x7a   :  { %6206 = vmatpush3.bf16.msra.mxu1 %v6986_v57  ;;  %6143 = vmatprep.subr.bf16.mxu0 %v6987_v58  ;;  %v143_v57 = vld [vmem:[%s9385_s0 + $0x2a8] sm:$0xff]  ;;  %v7003_v58 = vld [vmem:[%s9384_s1 + $0x350] sm:$0xff]  }
  0x7b   :  { %3893 = vmatmul.mubr.bf16.gmra.mrb[44].mxu0 %v5431_v59  ;;  %6207 = vmatprep.subr.bf16.mxu1 %v6989_v60  ;;  %v7005_v59 = vld [vmem:[%s9384_s1 + $0x3d0] sm:$0xff]   ;;  %v5371_v60 = vcombine.low %v94_v40, %v110_v41  ;;  %v7024_v40 = vld [vmem:[%s9384_s1 + $0x338] sm:$0xff]  }
  0x7c   :  { %3990 = vmatmul.mubr.bf16.gmra.mrb[44].mxu1 %v5433_v61  ;;  %3900 = vmatprep.mubr.bf16.mxu0 %v5464_v62  ;;  %v5373_v61 = vcombine.low %v95_v44, %v111_v45  ;;  %v5404_v62 = vcombine.high %v126_v54, %v142_v55  ;;  %v7026_v41 = vld [vmem:[%s9384_s1 + $0x3b8] sm:$0xff]   ;;  %v7029_v44 = vld [vmem:[%s9384_s1 + $0x4c0] sm:$0xff]  }
  0x7d   :  { %3997 = vmatprep.mubr.bf16.mxu1 %v5466_v63  ;;  %6144 = vmatpush3.bf16.msra.mxu0 %v6988_v0  ;;  %v5406_v63 = vcombine.high %v127_v56, %v143_v57  ;;  %v7004_v0 = vld [vmem:[%s9384_s1 + $0x310] sm:$0xff]  }
  0x7e   :  { %6208 = vmatpush3.bf16.msra.mxu1 %v6990_v1  ;;  %6145 = vmatprep.subr.bf16.mxu0 %v6991_v2  ;;  %v7006_v1 = vld [vmem:[%s9384_s1 + $0x390] sm:$0xff]   ;;  %v7007_v2 = vld [vmem:[%s9384_s1 + $0x358] sm:$0xff]  }
  0x7f   :  { %6209 = vmatprep.subr.bf16.mxu1 %v6993_v5  ;;  %v7009_v5 = vld [vmem:[%s9384_s1 + $0x3d8] sm:$0xff]  }
  0x81   :  { %6146 = vmatpush3.bf16.msra.mxu0 %v6992_v8  ;;  %v7008_v8 = vld [vmem:[%s9384_s1 + $0x318] sm:$0xff]  }
  0x82   :  { %6210 = vmatpush3.bf16.msra.mxu1 %v6994_v9  ;;  %6259 = vmatprep.subr.bf16.mxu0 %v6995_v10  ;;  %v7010_v9 = vld [vmem:[%s9384_s1 + $0x398] sm:$0xff]   ;;  %v7011_v10 = vld [vmem:[%s9384_s1 + $0x360] sm:$0xff]  }
  0x83   :  { %3901 = vmatmul.mubr.bf16.gmra.mrb[48].mxu0 %v5463_v11  ;;  %6323 = vmatprep.subr.bf16.mxu1 %v6997_v12  ;;  %v5403_v11 = vcombine.low %v126_v54, %v142_v55  ;;  %v7013_v12 = vld [vmem:[%s9384_s1 + $0x3e0] sm:$0xff]  }
  0x84   :  { %3998 = vmatmul.mubr.bf16.gmra.mrb[48].mxu1 %v5465_v13  ;;  %3908 = vmatprep.mubr.bf16.mxu0 %v5496_v14  ;;  %v5405_v13 = vcombine.low %v127_v56, %v143_v57  ;;  %v5436_v14 = vcombine.high %v158_v3, %v174_v4  ;;  %v286_v56 = vld [vmem:[%s9385_s0 + $0x720] sm:$0xff]  ;;  %v81_v3 = vld [vmem:[%s9385_s0 + $0xb8] sm:$0xff] }
  0x85   :  { %4005 = vmatprep.mubr.bf16.mxu1 %v5498_v15  ;;  %v7012_v15 = vld [vmem:[%s9384_s1 + $0x320] sm:$0xff]  }
  0x86   :  { %v302_v57 = vld [vmem:[%s9385_s0 + $0x7a0] sm:$0xff] }
  0x87   :  { %v5563_v4 = vcombine.low %v286_v56, %v302_v57 }
  0x8b   :  { %3909 = vmatmul.mubr.bf16.gmra.mrb[52].mxu0 %v5495_v20  ;;  %v7017_v20 = vld [vmem:[%s9384_s1 + $0x3e8] sm:$0xff]  }
  0x8c   :  { %4006 = vmatmul.mubr.bf16.gmra.mrb[52].mxu1 %v5497_v21  ;;  %3916 = vmatprep.mubr.bf16.mxu0 %v5528_v22  ;;  %v206_v21 = vld [vmem:[%s9385_s0 + $0x4a0] sm:$0xff]  ;;  %v191_v22 = vld [vmem:[%s9385_s0 + $0x428] sm:$0xff] }
  0x8d   :  { %4013 = vmatprep.mubr.bf16.mxu1 %v5530_v23  ;;  %v207_v23 = vld [vmem:[%s9385_s0 + $0x4a8] sm:$0xff] }
  0x8e   :  { %v5469_v45 = vcombine.low %v191_v22, %v207_v23 }
  0x93   :  { %3917 = vmatmul.mubr.bf16.gmra.mrb[56].mxu0 %v5527_v28  ;;  %v7021_v28 = vld [vmem:[%s9384_s1 + $0x3f0] sm:$0xff]  }
  0x94   :  { %4014 = vmatmul.mubr.bf16.gmra.mrb[56].mxu1 %v5529_v29  ;;  %3924 = vmatprep.mubr.bf16.mxu0 %v5560_v30  ;;  %v5437_v29 = vcombine.low %v159_v6, %v175_v7  ;;  %v5468_v30 = vcombine.high %v190_v19, %v206_v21 }
  0x95   :  { %4021 = vmatprep.mubr.bf16.mxu1 %v5562_v31  ;;  %v5470_v31 = vcombine.high %v191_v22, %v207_v23  ;;  %v128_v22 = vld [vmem:[%s9385_s0 + $0x230] sm:$0xff] }
  0x96   :  { %v144_v23 = vld [vmem:[%s9385_s0 + $0x2b0] sm:$0xff] }
  0x9b   :  { %3925 = vmatmul.mubr.bf16.gmra.mrb[60].mxu0 %v5559_v36  ;;  %v238_v36 = vld [vmem:[%s9385_s0 + $0x5a0] sm:$0xff] }
  0x9c   :  { %4022 = vmatmul.mubr.bf16.gmra.mrb[60].mxu1 %v5561_v37  ;;  %4062 = vmatprep.mubr.bf16.mxu0 %v5340_v38  ;;  %v7025_v37 = vld [vmem:[%s9384_s1 + $0x3f8] sm:$0xff]   ;;  %v223_v38 = vld [vmem:[%s9385_s0 + $0x528] sm:$0xff] }
  0x9d   :  { %4159 = vmatprep.mubr.bf16.mxu1 %v5342_v39  ;;  %v239_v39 = vld [vmem:[%s9385_s0 + $0x5a8] sm:$0xff] }
  0xa3   :  { %4063 = vmatmul.mubr.bf16.vlgmr.msra.gmra.mrb[64].mxu0 %v5339_v42  ;;  %v7027_v42 = vld [vmem:[%s9384_s1 + $0x440] sm:$0xff]  }
  0xa4   :  { %4160 = vmatmul.mubr.bf16.vlgmr.msra.gmra.mrb[64].mxu1 %v5341_v46  ;;  %6260 = vmatpush3.bf16.msra.mxu0 %v6996_v43  ;;  %v5467_v43 = vcombine.low %v190_v19, %v206_v21  ;;  %v5500_v46 = vcombine.high %v222_v35, %v238_v36  ;;  %v7032_v19 = vld [vmem:[%s9384_s1 + $0x408] sm:$0xff]  }
  0xa5   :  { %6324 = vmatpush3.bf16.msra.mxu1 %v6998_v47  ;;  %4070 = vmatprep.mubr.bf16.mxu0 %v5372_v48  ;;  %v5502_v47 = vcombine.high %v223_v38, %v239_v39  ;;  %v254_v48 = vld [vmem:[%s9385_s0 + $0x620] sm:$0xff]  ;;  %v7034_v21 = vld [vmem:[%s9384_s1 + $0x488] sm:$0xff]  }
  0xa6   :  { %4167 = vmatprep.mubr.bf16.mxu1 %v5374_v50  ;;  %6261 = vmatprep.subr.bf16.mxu0 %v6999_v49  ;;  %v270_v49 = vld [vmem:[%s9385_s0 + $0x6a0] sm:$0xff]  ;;  %v255_v50 = vld [vmem:[%s9385_s0 + $0x628] sm:$0xff] }
  0xa7   :  { %6325 = vmatprep.subr.bf16.mxu1 %v7001_v52  ;;  %v5499_v52 = vcombine.low %v222_v35, %v238_v36  ;;  %v5532_v54 = vcombine.high %v254_v48, %v270_v49  ;;  %v7925_v35 = vld [vmem:[%s9385_s0 + $0x330] sm:$0xff] }
  0xa8   :  { %6262 = vmatpush3.bf16.msra.mxu0 %v7000_v51  ;;  %v271_v51 = vld [vmem:[%s9385_s0 + $0x6a8] sm:$0xff]  ;;  %v7930_v36 = vld [vmem:[%s9385_s0 + $0x3b0] sm:$0xff] }
  0xa9   :  { %6326 = vmatpush3.bf16.msra.mxu1 %v7002_v53  ;;  %6263 = vmatprep.subr.bf16.mxu0 %v7003_v58  ;;  %v5501_v53 = vcombine.low %v223_v38, %v239_v39  ;;  %v5534_v55 = vcombine.high %v255_v50, %v271_v51  ;;  %v287_v58 = vld [vmem:[%s9385_s0 + $0x728] sm:$0xff]  ;;  %v7938_v38 = vld [vmem:[%s9385_s0 + $0x338] sm:$0xff] }
  0xaa   :  { %6327 = vmatprep.subr.bf16.mxu1 %v7005_v59  ;;  %v303_v59 = vld [vmem:[%s9385_s0 + $0x7a8] sm:$0xff]  ;;  %v7943_v39 = vld [vmem:[%s9385_s0 + $0x3b8] sm:$0xff] }
  0xab   :  { %4071 = vmatmul.mubr.bf16.gmra.mrb[68].mxu0 %v5371_v60  ;;  %v5531_v60 = vcombine.low %v254_v48, %v270_v49  ;;  %v5442_v48 = vcombine.high %v7938_v38, %v7943_v39  ;;  %v7046_v49 = vld [vmem:[%s9384_s1 + $0x4a0] sm:$0xff]  }
  0xac   :  { %4168 = vmatmul.mubr.bf16.gmra.mrb[68].mxu1 %v5373_v61  ;;  %4078 = vmatprep.mubr.bf16.mxu0 %v5404_v62  ;;  %v5533_v61 = vcombine.low %v255_v50, %v271_v51  ;;  %v5564_v62 = vcombine.high %v286_v56, %v302_v57  ;;  %v7047_v50 = vld [vmem:[%s9384_s1 + $0x468] sm:$0xff]   ;;  %v7973_v51 = vld [vmem:[%s9385_s0 + $0x430] sm:$0xff] }
  0xad   :  { %4175 = vmatprep.mubr.bf16.mxu1 %v5406_v63  ;;  %6264 = vmatpush3.bf16.msra.mxu0 %v7004_v0  ;;  %v5566_v63 = vcombine.high %v287_v58, %v303_v59  ;;  %v64_v0 = vld [vmem:[%s9385_s0 + $0x30] sm:$0xff]  ;;  %v7048_v56 = vld [vmem:[%s9384_s1 + $0x428] sm:$0xff]  }
  0xae   :  { %6328 = vmatpush3.bf16.msra.mxu1 %v7006_v1  ;;  %6265 = vmatprep.subr.bf16.mxu0 %v7007_v2  ;;  %v80_v1 = vld [vmem:[%s9385_s0 + $0xb0] sm:$0xff]  ;;  %v65_v2 = vld [vmem:[%s9385_s0 + $0x38] sm:$0xff]  ;;  %v7050_v57 = vld [vmem:[%s9384_s1 + $0x4a8] sm:$0xff]  }
  0xaf   :  { %6329 = vmatprep.subr.bf16.mxu1 %v7009_v5  ;;  %v5565_v5 = vcombine.low %v287_v58, %v303_v59  ;;  %v5344_v6 = vcombine.high %v64_v0, %v80_v1  ;;  %v5346_v7 = vcombine.high %v65_v2, %v81_v3  ;;  %v7051_v59 = vld [vmem:[%s9384_s1 + $0x470] sm:$0xff]  }
  0xb1   :  { %6266 = vmatpush3.bf16.msra.mxu0 %v7008_v8  ;;  %v96_v8 = vld [vmem:[%s9385_s0 + $0x130] sm:$0xff] }
  0xb2   :  { %6330 = vmatpush3.bf16.msra.mxu1 %v7010_v9  ;;  %6267 = vmatprep.subr.bf16.mxu0 %v7011_v10  ;;  %v112_v9 = vld [vmem:[%s9385_s0 + $0x1b0] sm:$0xff]  ;;  %v5343_v10 = vcombine.low %v64_v0, %v80_v1 }
  0xb3   :  { %4079 = vmatmul.mubr.bf16.gmra.mrb[72].mxu0 %v5403_v11  ;;  %6331 = vmatprep.subr.bf16.mxu1 %v7013_v12  ;;  %v7028_v11 = vld [vmem:[%s9384_s1 + $0x400] sm:$0xff]   ;;  %v97_v12 = vld [vmem:[%s9385_s0 + $0x138] sm:$0xff]  ;;  %v7053_v0 = vld [vmem:[%s9384_s1 + $0x4f0] sm:$0xff]  }
  0xb4   :  { %4176 = vmatmul.mubr.bf16.gmra.mrb[72].mxu1 %v5405_v13  ;;  %4086 = vmatprep.mubr.bf16.mxu0 %v5436_v14  ;;  %v113_v13 = vld [vmem:[%s9385_s0 + $0x1b8] sm:$0xff]  ;;  %v5345_v14 = vcombine.low %v65_v2, %v81_v3 }
  0xb5   :  { %4183 = vmatprep.mubr.bf16.mxu1 %v5438_v16  ;;  %6268 = vmatpush3.bf16.msra.mxu0 %v7012_v15  ;;  %v7030_v15 = vld [vmem:[%s9384_s1 + $0x480] sm:$0xff]   ;;  %v5376_v16 = vcombine.high %v96_v8, %v112_v9 }
  0xb6   :  { %6332 = vmatpush3.bf16.msra.mxu1 %v7014_v17  ;;  %6269 = vmatprep.subr.bf16.mxu0 %v7015_v18  ;;  %v7031_v17 = vld [vmem:[%s9384_s1 + $0x448] sm:$0xff]   ;;  %v5378_v18 = vcombine.high %v97_v12, %v113_v13 }
  0xb7   :  { %6333 = vmatprep.subr.bf16.mxu1 %v7017_v20  ;;  %v7033_v20 = vld [vmem:[%s9384_s1 + $0x4c8] sm:$0xff]  }
  0xb9   :  { %6270 = vmatpush3.bf16.msra.mxu0 %v7016_v24  ;;  %v129_v24 = vld [vmem:[%s9385_s0 + $0x238] sm:$0xff] }
  0xba   :  { %6334 = vmatpush3.bf16.msra.mxu1 %v7018_v25  ;;  %6271 = vmatprep.subr.bf16.mxu0 %v7019_v26  ;;  %v145_v25 = vld [vmem:[%s9385_s0 + $0x2b8] sm:$0xff]  ;;  %v7035_v26 = vld [vmem:[%s9384_s1 + $0x450] sm:$0xff]  }
  0xbb   :  { %4087 = vmatmul.mubr.bf16.gmra.mrb[76].mxu0 %v5435_v27  ;;  %6335 = vmatprep.subr.bf16.mxu1 %v7021_v28  ;;  %v7037_v27 = vld [vmem:[%s9384_s1 + $0x4d0] sm:$0xff]   ;;  %v5375_v28 = vcombine.low %v96_v8, %v112_v9 }
  0xbc   :  { %4184 = vmatmul.mubr.bf16.gmra.mrb[76].mxu1 %v5437_v29  ;;  %4094 = vmatprep.mubr.bf16.mxu0 %v5468_v30  ;;  %v5377_v29 = vcombine.low %v97_v12, %v113_v13  ;;  %v5408_v30 = vcombine.high %v128_v22, %v144_v23  ;;  %v7054_v12 = vld [vmem:[%s9384_s1 + $0x4b0] sm:$0xff]   ;;  %v7055_v13 = vld [vmem:[%s9384_s1 + $0x478] sm:$0xff]  }
  0xbd   :  { %4191 = vmatprep.mubr.bf16.mxu1 %v5470_v31  ;;  %6272 = vmatpush3.bf16.msra.mxu0 %v7020_v32  ;;  %v5410_v31 = vcombine.high %v129_v24, %v145_v25  ;;  %v7036_v32 = vld [vmem:[%s9384_s1 + $0x410] sm:$0xff]  }
  0xbe   :  { %6336 = vmatpush3.bf16.msra.mxu1 %v7022_v33  ;;  %6273 = vmatprep.subr.bf16.mxu0 %v7023_v34  ;;  %v7038_v33 = vld [vmem:[%s9384_s1 + $0x490] sm:$0xff]   ;;  %v7039_v34 = vld [vmem:[%s9384_s1 + $0x458] sm:$0xff]  }
  0xbf   :  { %6337 = vmatprep.subr.bf16.mxu1 %v7025_v37  ;;  %v7041_v37 = vld [vmem:[%s9384_s1 + $0x4d8] sm:$0xff]  }
  0xc1   :  { %6274 = vmatpush3.bf16.msra.mxu0 %v7024_v40  ;;  %v7040_v40 = vld [vmem:[%s9384_s1 + $0x418] sm:$0xff]  }
  0xc2   :  { %6338 = vmatpush3.bf16.msra.mxu1 %v7026_v41  ;;  %6387 = vmatprep.subr.bf16.mxu0 %v7027_v42  ;;  %v7042_v41 = vld [vmem:[%s9384_s1 + $0x498] sm:$0xff]   ;;  %v7043_v42 = vld [vmem:[%s9384_s1 + $0x460] sm:$0xff]  }
  0xc3   :  { %4095 = vmatmul.mubr.bf16.gmra.mrb[80].mxu0 %v5467_v43  ;;  %6451 = vmatprep.subr.bf16.mxu1 %v7029_v44  ;;  %v5407_v43 = vcombine.low %v128_v22, %v144_v23  ;;  %v7045_v44 = vld [vmem:[%s9384_s1 + $0x4e0] sm:$0xff]   ;;  %v7058_v23 = vld [vmem:[%s9384_s1 + $0x4b8] sm:$0xff]  }
  0xc4   :  { %4192 = vmatmul.mubr.bf16.gmra.mrb[80].mxu1 %v5469_v45  ;;  %4102 = vmatprep.mubr.bf16.mxu0 %v5500_v46  ;;  %v5409_v45 = vcombine.low %v129_v24, %v145_v25  ;;  %v5440_v46 = vcombine.high %v7925_v35, %v7930_v36  ;;  %v7059_v25 = vld [vmem:[%s9384_s1 + $0x540] sm:$0xff]  }
  0xc5   :  { %4199 = vmatprep.mubr.bf16.mxu1 %v5502_v47  ;;  %v7044_v47 = vld [vmem:[%s9384_s1 + $0x420] sm:$0xff]  }
  0xcb   :  { %4103 = vmatmul.mubr.bf16.gmra.mrb[84].mxu0 %v5499_v52  ;;  %v7049_v52 = vld [vmem:[%s9384_s1 + $0x4e8] sm:$0xff]  }
  0xcc   :  { %4200 = vmatmul.mubr.bf16.gmra.mrb[84].mxu1 %v5501_v53  ;;  %4110 = vmatprep.mubr.bf16.mxu0 %v5532_v54  ;;  %v7981_v53 = vld [vmem:[%s9385_s0 + $0x4b0] sm:$0xff]  ;;  %v7986_v54 = vld [vmem:[%s9385_s0 + $0x438] sm:$0xff] }
  0xcd   :  { %4207 = vmatprep.mubr.bf16.mxu1 %v5534_v55  ;;  %v7991_v55 = vld [vmem:[%s9385_s0 + $0x4b8] sm:$0xff] }
  0xce   :  { %v5474_v9 = vcombine.high %v7986_v54, %v7991_v55 }
  0xd3   :  { %4111 = vmatmul.mubr.bf16.gmra.mrb[88].mxu0 %v5531_v60 }
  0xd4   :  { %4208 = vmatmul.mubr.bf16.gmra.mrb[88].mxu1 %v5533_v61  ;;  %4118 = vmatprep.mubr.bf16.mxu0 %v5564_v62  ;;  %v5439_v62 = vcombine.low %v7925_v35, %v7930_v36 }
  0xd5   :  { %4215 = vmatprep.mubr.bf16.mxu1 %v5566_v63  ;;  %v7052_v63 = vld [vmem:[%s9384_s1 + $0x430] sm:$0xff]  }
  0xdb   :  { %4119 = vmatmul.mubr.bf16.gmra.mrb[92].mxu0 %v5563_v4  ;;  %v5441_v4 = vcombine.low %v7938_v38, %v7943_v39 }
  0xdc   :  { %4216 = vmatmul.mubr.bf16.gmra.mrb[92].mxu1 %v5565_v5  ;;  %4256 = vmatprep.mubr.bf16.mxu0 %v5344_v6  ;;  %v5472_v5 = vcombine.high %v7973_v51, %v7981_v53 }
  0xdd   :  { %4353 = vmatprep.mubr.bf16.mxu1 %v5346_v7 }
  0xe3   :  { %4257 = vmatmul.mubr.bf16.vlgmr.msra.gmra.mrb[96].mxu0 %v5343_v10 }
  0xe4   :  { %4354 = vmatmul.mubr.bf16.vlgmr.msra.gmra.mrb[96].mxu1 %v5345_v14  ;;  %6388 = vmatpush3.bf16.msra.mxu0 %v7028_v11 }
  0xe5   :  { %6452 = vmatpush3.bf16.msra.mxu1 %v7030_v15  ;;  %4264 = vmatprep.mubr.bf16.mxu0 %v5376_v16  ;;  %v8027_v16 = vld [vmem:[%s9385_s0 + $0x530] sm:$0xff] }
  0xe6   :  { %4361 = vmatprep.mubr.bf16.mxu1 %v5378_v18  ;;  %6389 = vmatprep.subr.bf16.mxu0 %v7031_v17  ;;  %v8032_v17 = vld [vmem:[%s9385_s0 + $0x5b0] sm:$0xff]  ;;  %v7057_v18 = vld [vmem:[%s9384_s1 + $0x4f8] sm:$0xff]  }
  0xe7   :  { %6453 = vmatprep.subr.bf16.mxu1 %v7033_v20  ;;  %v241_v20 = vld [vmem:[%s9385_s0 + $0x5b8] sm:$0xff] }
  0xe8   :  { %6390 = vmatpush3.bf16.msra.mxu0 %v7032_v19  ;;  %v225_v19 = vld [vmem:[%s9385_s0 + $0x538] sm:$0xff] }
  0xe9   :  { %6454 = vmatpush3.bf16.msra.mxu1 %v7034_v21  ;;  %6391 = vmatprep.subr.bf16.mxu0 %v7035_v26  ;;  %v7056_v21 = vld [vmem:[%s9384_s1 + $0x438] sm:$0xff]   ;;  %v5506_v38 = vcombine.high %v225_v19, %v241_v20 }
  0xea   :  { %6455 = vmatprep.subr.bf16.mxu1 %v7037_v27 }
  0xeb   :  { %4265 = vmatmul.mubr.bf16.gmra.mrb[100].mxu0 %v5375_v28  ;;  %v5471_v28 = vcombine.low %v7973_v51, %v7981_v53  ;;  %v5503_v51 = vcombine.low %v8027_v16, %v8032_v17 }
  0xec   :  { %4362 = vmatmul.mubr.bf16.gmra.mrb[100].mxu1 %v5377_v29  ;;  %4272 = vmatprep.mubr.bf16.mxu0 %v5408_v30  ;;  %v7061_v29 = vld [vmem:[%s9384_s1 + $0x5c0] sm:$0xff]  }
  0xed   :  { %4369 = vmatprep.mubr.bf16.mxu1 %v5410_v31  ;;  %6392 = vmatpush3.bf16.msra.mxu0 %v7036_v32 }
  0xee   :  { %6456 = vmatpush3.bf16.msra.mxu1 %v7038_v33  ;;  %6393 = vmatprep.subr.bf16.mxu0 %v7039_v34  ;;  %v5473_v33 = vcombine.low %v7986_v54, %v7991_v55  ;;  %v5504_v34 = vcombine.high %v8027_v16, %v8032_v17  ;;  %v5505_v55 = vcombine.low %v225_v19, %v241_v20 }
  0xef   :  { %6457 = vmatprep.subr.bf16.mxu1 %v7041_v37 }
  0xf1   :  { %6394 = vmatpush3.bf16.msra.mxu0 %v7040_v40 }
  0xf2   :  { %6458 = vmatpush3.bf16.msra.mxu1 %v7042_v41  ;;  %6395 = vmatprep.subr.bf16.mxu0 %v7043_v42 }
  0xf3   :  { %4273 = vmatmul.mubr.bf16.gmra.mrb[104].mxu0 %v5407_v43  ;;  %6459 = vmatprep.subr.bf16.mxu1 %v7045_v44  ;;  %v256_v44 = vld [vmem:[%s9385_s0 + $0x630] sm:$0xff] }
  0xf4   :  { %4370 = vmatmul.mubr.bf16.gmra.mrb[104].mxu1 %v5409_v45  ;;  %4280 = vmatprep.mubr.bf16.mxu0 %v5440_v46  ;;  %v272_v45 = vld [vmem:[%s9385_s0 + $0x6b0] sm:$0xff] }
  0xf5   :  { %4377 = vmatprep.mubr.bf16.mxu1 %v5442_v48  ;;  %6396 = vmatpush3.bf16.msra.mxu0 %v7044_v47  ;;  %v257_v47 = vld [vmem:[%s9385_s0 + $0x638] sm:$0xff] }
  0xf6   :  { %v5891_v58 = vpop.f32.mrb[0].mxu0  ;;  %6460 = vmatpush3.bf16.msra.mxu1 %v7046_v49  ;;  %6397 = vmatprep.subr.bf16.mxu0 %v7047_v50  ;;  %v273_v48 = vld [vmem:[%s9385_s0 + $0x6b8] sm:$0xff] }
  0xf7   :  { %v5955_v60 = vpop.f32.mrb[0].mxu1  ;;  %v5892_v61 = vpop.f32.mrb[1].mxu0  ;;  %6461 = vmatprep.subr.bf16.mxu1 %v7049_v52 }
  0xf8   :  { %v5893_v1 = vadd.f32 %v5892_v61, %v5891_v58  ;;  %v5956_v2 = vpop.f32.mrb[1].mxu1  ;;  %v5894_v3 = vpop.f32.mrb[2].mxu0 }
  0xf9   :  { %v5957_v6 = vadd.f32 %v5956_v2, %v5955_v60  ;;  %v5958_v7 = vpop.f32.mrb[2].mxu1  ;;  %v5895_v8 = vpop.f32.mrb[3].mxu0  ;;  %6398 = vmatpush3.bf16.msra.mxu0 %v7048_v56  ;;  %v5536_v56 = vcombine.high %v256_v44, %v272_v45  ;;  %v5538_v60 = vcombine.high %v257_v47, %v273_v48  ;;  %v304_v2 = vld [vmem:[%s9385_s0 + $0x7b0] sm:$0xff] }
  0xfa   :  { %v5896_v10 = vadd.f32 %v5895_v8, %v5894_v3  ;;  %v5959_v11 = vpop.f32.mrb[3].mxu1  ;;  %6462 = vmatpush3.bf16.msra.mxu1 %v7050_v57  ;;  %6399 = vmatprep.subr.bf16.mxu0 %v7051_v59 }
  0xfb   :  { %v8022_v14 = vadd.f32 %v5957_v6, %v5893_v1  ;;  %v5960_v15 = vadd.f32 %v5959_v11, %v5958_v7  ;;  %4281 = vmatmul.mubr.bf16.gmra.mrb[108].mxu0 %v5439_v62  ;;  %6463 = vmatprep.subr.bf16.mxu1 %v7053_v0  ;;  %v288_v1 = vld [vmem:[%s9385_s0 + $0x730] sm:$0xff]  ;;  %v305_v6 = vld [vmem:[%s9385_s0 + $0x7b8] sm:$0xff] }
  0xfc   :  { %4378 = vmatmul.mubr.bf16.gmra.mrb[108].mxu1 %v5441_v4  ;;  %4288 = vmatprep.mubr.bf16.mxu0 %v5472_v5  ;;  %v289_v4 = vld [vmem:[%s9385_s0 + $0x738] sm:$0xff] }
  0xfd   :  { %v8046_v22 = vadd.f32 %v5960_v15, %v5896_v10  ;;  %4385 = vmatprep.mubr.bf16.mxu1 %v5474_v9  ;;  %6400 = vmatpush3.bf16.msra.mxu0 %v7052_v63  ;;  %v5535_v9 = vcombine.low %v256_v44, %v272_v45  ;;  %v5568_v15 = vcombine.high %v288_v1, %v304_v2 }
  0xfe   :  { %v5897_v24 = vpop.f32.mrb[4].mxu0  ;;  %6464 = vmatpush3.bf16.msra.mxu1 %v7054_v12  ;;  %6401 = vmatprep.subr.bf16.mxu0 %v7055_v13  ;;  %v5537_v13 = vcombine.low %v257_v47, %v273_v48  ;;  %v5570_v19 = vcombine.high %v289_v4, %v305_v6 }
  0xff   :  { %v5961_v26 = vpop.f32.mrb[4].mxu1  ;;  %v5898_v27 = vpop.f32.mrb[5].mxu0  ;;  %6465 = vmatprep.subr.bf16.mxu1 %v7057_v18 }
 0x100   :  { %v5899_v30 = vadd.f32 %v5898_v27, %v5897_v24  ;;  %v5962_v31 = vpop.f32.mrb[5].mxu1  ;;  %v5900_v32 = vpop.f32.mrb[6].mxu0  ;;  %v82_v27 = vld [vmem:[%s9385_s0 + $0xc0] sm:$0xff] }
 0x101   :  { %v5963_v35 = vadd.f32 %v5962_v31, %v5961_v26  ;;  %v5964_v36 = vpop.f32.mrb[6].mxu1  ;;  %v5901_v37 = vpop.f32.mrb[7].mxu0  ;;  %6402 = vmatpush3.bf16.msra.mxu0 %v7056_v21 }
 0x102   :  { %v5902_v39 = vadd.f32 %v5901_v37, %v5900_v32  ;;  %v5965_v40 = vpop.f32.mrb[7].mxu1  ;;  %6466 = vmatpush3.bf16.msra.mxu1 %v7058_v23  ;;  %6515 = vmatprep.subr.bf16.mxu0 %v7059_v25  ;;  %v66_v25 = vld [vmem:[%s9385_s0 + $0x40] sm:$0xff]  ;;  %v5569_v37 = vcombine.low %v289_v4, %v305_v6 }
 0x103   :  { %v8063_v41 = vadd.f32 %v5963_v35, %v5899_v30  ;;  %v5966_v42 = vadd.f32 %v5965_v40, %v5964_v36  ;;  %4289 = vmatmul.mubr.bf16.gmra.mrb[112].mxu0 %v5471_v28  ;;  %6579 = vmatprep.subr.bf16.mxu1 %v7061_v29  ;;  %v67_v29 = vld [vmem:[%s9385_s0 + $0x48] sm:$0xff]  ;;  %v7062_v4 = vld [vmem:[%s9384_s1 + $0x580] sm:$0xff]  }
 0x104   :  { %4386 = vmatmul.mubr.bf16.gmra.mrb[112].mxu1 %v5473_v33  ;;  %4296 = vmatprep.mubr.bf16.mxu0 %v5504_v34  ;;  %v83_v30 = vld [vmem:[%s9385_s0 + $0xc8] sm:$0xff]  ;;  %v5567_v33 = vcombine.low %v288_v1, %v304_v2 }
 0x105   :  { %v8065_v43 = vadd.f32 %v5966_v42, %v5902_v39  ;;  %4393 = vmatprep.mubr.bf16.mxu1 %v5506_v38  ;;  %v5348_v38 = vcombine.high %v66_v25, %v82_v27  ;;  %v5350_v44 = vcombine.high %v67_v29, %v83_v30 }
 0x106   :  { %v5903_v46 = vpop.f32.mrb[8].mxu0 }
 0x107   :  { %v5967_v49 = vpop.f32.mrb[8].mxu1  ;;  %v5904_v50 = vpop.f32.mrb[9].mxu0 }
 0x108   :  { %v5905_v52 = vadd.f32 %v5904_v50, %v5903_v46  ;;  %v5968_v53 = vpop.f32.mrb[9].mxu1  ;;  %v5906_v54 = vpop.f32.mrb[10].mxu0  ;;  %v8120_v50 = vld [vmem:[%s9385_s0 + $0x140] sm:$0xff] }
 0x109   :  { %v5969_v57 = vadd.f32 %v5968_v53, %v5967_v49  ;;  %v5970_v58 = vpop.f32.mrb[10].mxu1  ;;  %v5907_v59 = vpop.f32.mrb[11].mxu0  ;;  %v8128_v53 = vld [vmem:[%s9385_s0 + $0x1c0] sm:$0xff] }
 0x10a   :  { %v5908_v61 = vadd.f32 %v5907_v59, %v5906_v54  ;;  %v5971_v62 = vpop.f32.mrb[11].mxu1 }
 0x10b   :  { %v8081_v63 = vadd.f32 %v5969_v57, %v5905_v52  ;;  %v5972_v0 = vadd.f32 %v5971_v62, %v5970_v58  ;;  %4297 = vmatmul.mubr.bf16.gmra.mrb[116].mxu0 %v5503_v51  ;;  %v7060_v52 = vld [vmem:[%s9384_s1 + $0x500] sm:$0xff]   ;;  %v8133_v57 = vld [vmem:[%s9385_s0 + $0x148] sm:$0xff]  ;;  %v5349_v62 = vcombine.low %v67_v29, %v83_v30  ;;  %v5379_v29 = vcombine.low %v8120_v50, %v8128_v53 }
 0x10c   :  { %4394 = vmatmul.mubr.bf16.gmra.mrb[116].mxu1 %v5505_v55  ;;  %4304 = vmatprep.mubr.bf16.mxu0 %v5536_v56  ;;  %v5347_v56 = vcombine.low %v66_v25, %v82_v27  ;;  %v8138_v58 = vld [vmem:[%s9385_s0 + $0x1c8] sm:$0xff]  ;;  %v7069_v25 = vld [vmem:[%s9384_s1 + $0x5d0] sm:$0xff]  }
 0x10d   :  { %v8089_v3 = vadd.f32 %v5972_v0, %v5908_v61  ;;  %4401 = vmatprep.mubr.bf16.mxu1 %v5538_v60 }
 0x10e   :  { %v5909_v5 = vpop.f32.mrb[12].mxu0 }
 0x10f   :  { %v5973_v7 = vpop.f32.mrb[12].mxu1  ;;  %v5910_v8 = vpop.f32.mrb[13].mxu0 }
 0x110   :  { %v5911_v10 = vadd.f32 %v5910_v8, %v5909_v5  ;;  %v5974_v11 = vpop.f32.mrb[13].mxu1  ;;  %v5912_v12 = vpop.f32.mrb[14].mxu0  ;;  %v5380_v5 = vcombine.high %v8120_v50, %v8128_v53  ;;  %v5382_v8 = vcombine.high %v8133_v57, %v8138_v58  ;;  %v7072_v53 = vld [vmem:[%s9384_s1 + $0x518] sm:$0xff]  }
 0x111   :  { %v5975_v16 = vadd.f32 %v5974_v11, %v5973_v7  ;;  %v5976_v17 = vpop.f32.mrb[14].mxu1  ;;  %v5913_v18 = vpop.f32.mrb[15].mxu0  ;;  %v7065_v11 = vld [vmem:[%s9384_s1 + $0x5c8] sm:$0xff]  }
 0x112   :  { %v5914_v20 = vadd.f32 %v5913_v18, %v5912_v12  ;;  %v5977_v21 = vpop.f32.mrb[15].mxu1  ;;  %v7067_v18 = vld [vmem:[%s9384_s1 + $0x550] sm:$0xff]  }
 0x113   :  { %v8097_v23 = vadd.f32 %v5975_v16, %v5911_v10  ;;  %v5978_v24 = vadd.f32 %v5977_v21, %v5976_v17  ;;  %4305 = vmatmul.mubr.bf16.gmra.mrb[120].mxu0 %v5535_v9  ;;  %v7063_v9 = vld [vmem:[%s9384_s1 + $0x548] sm:$0xff]   ;;  %v8164_v16 = vld [vmem:[%s9385_s0 + $0x240] sm:$0xff] }
 0x114   :  { %4402 = vmatmul.mubr.bf16.gmra.mrb[120].mxu1 %v5537_v13  ;;  %4312 = vmatprep.mubr.bf16.mxu0 %v5568_v15  ;;  %v7064_v10 = vld [vmem:[%s9384_s1 + $0x508] sm:$0xff]   ;;  %v8169_v17 = vld [vmem:[%s9385_s0 + $0x2c0] sm:$0xff] }
 0x115   :  { %v8102_v26 = vadd.f32 %v5978_v24, %v5914_v20  ;;  %4409 = vmatprep.mubr.bf16.mxu1 %v5570_v19  ;;  %v7066_v15 = vld [vmem:[%s9384_s1 + $0x588] sm:$0xff]  }
 0x116   :  { %v5915_v28 = vpop.f32.mrb[16].mxu0  ;;  %v8179_v21 = vld [vmem:[%s9385_s0 + $0x248] sm:$0xff] }
 0x117   :  { %v5979_v31 = vpop.f32.mrb[16].mxu1  ;;  %v5916_v32 = vpop.f32.mrb[17].mxu0  ;;  %v8184_v24 = vld [vmem:[%s9385_s0 + $0x2c8] sm:$0xff] }
 0x118   :  { %v5917_v34 = vadd.f32 %v5916_v32, %v5915_v28  ;;  %v5980_v35 = vpop.f32.mrb[17].mxu1  ;;  %v5918_v36 = vpop.f32.mrb[18].mxu0 }
 0x119   :  { %v5981_v39 = vadd.f32 %v5980_v35, %v5979_v31  ;;  %v5982_v40 = vpop.f32.mrb[18].mxu1  ;;  %v5919_v42 = vpop.f32.mrb[19].mxu0  ;;  %v7068_v35 = vld [vmem:[%s9384_s1 + $0x510] sm:$0xff]  }
 0x11a   :  { %v5920_v45 = vadd.f32 %v5919_v42, %v5918_v36  ;;  %v5983_v46 = vpop.f32.mrb[19].mxu1  ;;  %v7071_v42 = vld [vmem:[%s9384_s1 + $0x558] sm:$0xff]  }
 0x11b   :  { %v8113_v47 = vadd.f32 %v5981_v39, %v5917_v34  ;;  %v5984_v48 = vadd.f32 %v5983_v46, %v5982_v40  ;;  %4313 = vmatmul.mubr.bf16.gmra.mrb[124].mxu0 %v5567_v33  ;;  %v5381_v33 = vcombine.low %v8133_v57, %v8138_v58  ;;  %v5412_v34 = vcombine.high %v8164_v16, %v8169_v17  ;;  %v7070_v40 = vld [vmem:[%s9384_s1 + $0x590] sm:$0xff]   ;;  %v7073_v46 = vld [vmem:[%s9384_s1 + $0x5d8] sm:$0xff]   ;;  %v8234_v57 = vld [vmem:[%s9385_s0 + $0x3c8] sm:$0xff] }
 0x11c   :  { %4410 = vmatmul.mubr.bf16.gmra.mrb[124].mxu1 %v5569_v37  ;;  %4450 = vmatprep.mubr.bf16.mxu0 %v5348_v38  ;;  %v5414_v39 = vcombine.high %v8179_v21, %v8184_v24  ;;  %v7074_v58 = vld [vmem:[%s9384_s1 + $0x598] sm:$0xff]  }
 0x11d   :  { %v8115_v49 = vadd.f32 %v5984_v48, %v5920_v45  ;;  %4547 = vmatprep.mubr.bf16.mxu1 %v5350_v44 }
 0x11e   :  { %v5921_v51 = vpop.f32.mrb[20].mxu0 }
 0x11f   :  { %v5985_v54 = vpop.f32.mrb[20].mxu1  ;;  %v5922_v55 = vpop.f32.mrb[21].mxu0 }
 0x120   :  { %v5923_v59 = vadd.f32 %v5922_v55, %v5921_v51  ;;  %v5986_v60 = vpop.f32.mrb[21].mxu1  ;;  %v5924_v61 = vpop.f32.mrb[22].mxu0  ;;  %v8214_v51 = vld [vmem:[%s9385_s0 + $0x340] sm:$0xff] }
 0x121   :  { %v5987_v0 = vadd.f32 %v5986_v60, %v5985_v54  ;;  %v5988_v1 = vpop.f32.mrb[22].mxu1  ;;  %v5925_v2 = vpop.f32.mrb[23].mxu0  ;;  %v8227_v54 = vld [vmem:[%s9385_s0 + $0x348] sm:$0xff] }
 0x122   :  { %v5926_v6 = vadd.f32 %v5925_v2, %v5924_v61  ;;  %v5989_v7 = vpop.f32.mrb[23].mxu1 }
 0x123   :  { %v8156_v12 = vadd.f32 %v5987_v0, %v5923_v59  ;;  %v5990_v13 = vadd.f32 %v5989_v7, %v5988_v1  ;;  %4451 = vmatmul.mubr.bf16.vlgmr.msra.gmra.mrb[128].mxu0 %v5347_v56  ;;  %v7075_v59 = vld [vmem:[%s9384_s1 + $0x560] sm:$0xff]  }
 0x124   :  { %4548 = vmatmul.mubr.bf16.vlgmr.msra.gmra.mrb[128].mxu1 %v5349_v62  ;;  %6516 = vmatpush3.bf16.msra.mxu0 %v7060_v52  ;;  %v8219_v52 = vld [vmem:[%s9385_s0 + $0x3c0] sm:$0xff]  ;;  %v5411_v62 = vcombine.low %v8164_v16, %v8169_v17 }
 0x125   :  { %v8174_v19 = vadd.f32 %v5990_v13, %v5926_v6  ;;  %6580 = vmatpush3.bf16.msra.mxu1 %v7062_v4  ;;  %4458 = vmatprep.mubr.bf16.mxu0 %v5380_v5  ;;  %v7077_v0 = vld [vmem:[%s9384_s1 + $0x5e0] sm:$0xff]   ;;  %v5413_v5 = vcombine.low %v8179_v21, %v8184_v24  ;;  %v5444_v6 = vcombine.high %v8214_v51, %v8219_v52 }
 0x126   :  { %v5927_v20 = vpop.f32.mrb[24].mxu0  ;;  %4555 = vmatprep.mubr.bf16.mxu1 %v5382_v8  ;;  %6517 = vmatprep.subr.bf16.mxu0 %v7063_v9  ;;  %v7076_v7 = vld [vmem:[%s9384_s1 + $0x520] sm:$0xff]  }
 0x127   :  { %v5991_v27 = vpop.f32.mrb[24].mxu1  ;;  %v5928_v28 = vpop.f32.mrb[25].mxu0  ;;  %6581 = vmatprep.subr.bf16.mxu1 %v7065_v11  ;;  %v5446_v11 = vcombine.high %v8227_v54, %v8234_v57  ;;  %v7078_v13 = vld [vmem:[%s9384_s1 + $0x5a0] sm:$0xff]  }
 0x128   :  { %v5929_v30 = vadd.f32 %v5928_v28, %v5927_v20  ;;  %v5992_v31 = vpop.f32.mrb[25].mxu1  ;;  %v5930_v32 = vpop.f32.mrb[26].mxu0  ;;  %6518 = vmatpush3.bf16.msra.mxu0 %v7064_v10  ;;  %v8270_v24 = vld [vmem:[%s9385_s0 + $0x440] sm:$0xff]  ;;  %v8283_v28 = vld [vmem:[%s9385_s0 + $0x448] sm:$0xff] }
 0x129   :  { %v5993_v36 = vadd.f32 %v5992_v31, %v5991_v27  ;;  %v5994_v37 = vpop.f32.mrb[26].mxu1  ;;  %v5931_v38 = vpop.f32.mrb[27].mxu0  ;;  %6582 = vmatpush3.bf16.msra.mxu1 %v7066_v15  ;;  %6519 = vmatprep.subr.bf16.mxu0 %v7067_v18  ;;  %v7079_v15 = vld [vmem:[%s9384_s1 + $0x568] sm:$0xff]  }
 0x12a   :  { %v5932_v44 = vadd.f32 %v5931_v38, %v5930_v32  ;;  %v5995_v45 = vpop.f32.mrb[27].mxu1  ;;  %6583 = vmatprep.subr.bf16.mxu1 %v7069_v25  ;;  %v7081_v18 = vld [vmem:[%s9384_s1 + $0x5e8] sm:$0xff]   ;;  %v8275_v25 = vld [vmem:[%s9385_s0 + $0x4c0] sm:$0xff] }
 0x12b   :  { %v8209_v48 = vadd.f32 %v5993_v36, %v5929_v30  ;;  %v5996_v50 = vadd.f32 %v5995_v45, %v5994_v37  ;;  %4459 = vmatmul.mubr.bf16.gmra.mrb[132].mxu0 %v5379_v29  ;;  %v7080_v27 = vld [vmem:[%s9384_s1 + $0x528] sm:$0xff]   ;;  %v5443_v36 = vcombine.low %v8214_v51, %v8219_v52  ;;  %v7085_v37 = vld [vmem:[%s9384_s1 + $0x5f0] sm:$0xff]  }
 0x12c   :  { %4556 = vmatmul.mubr.bf16.gmra.mrb[132].mxu1 %v5381_v33  ;;  %4466 = vmatprep.mubr.bf16.mxu0 %v5412_v34  ;;  %v8290_v31 = vld [vmem:[%s9385_s0 + $0x4c8] sm:$0xff]  ;;  %v7083_v33 = vld [vmem:[%s9384_s1 + $0x570] sm:$0xff]  }
 0x12d   :  { %v8229_v55 = vadd.f32 %v5996_v50, %v5932_v44  ;;  %4563 = vmatprep.mubr.bf16.mxu1 %v5414_v39  ;;  %6520 = vmatpush3.bf16.msra.mxu0 %v7068_v35  ;;  %v7082_v32 = vld [vmem:[%s9384_s1 + $0x5a8] sm:$0xff]   ;;  %v5476_v44 = vcombine.high %v8270_v24, %v8275_v25  ;;  %v7084_v45 = vld [vmem:[%s9384_s1 + $0x530] sm:$0xff]   ;;  %v5478_v52 = vcombine.high %v8283_v28, %v8290_v31 }
 0x12e   :  { %v5933_v56 = vpop.f32.mrb[28].mxu0  ;;  %6584 = vmatpush3.bf16.msra.mxu1 %v7070_v40  ;;  %6521 = vmatprep.subr.bf16.mxu0 %v7071_v42  ;;  %v5445_v42 = vcombine.low %v8227_v54, %v8234_v57  ;;  %v7087_v54 = vld [vmem:[%s9384_s1 + $0x578] sm:$0xff]  }
 0x12f   :  { %v5997_v60 = vpop.f32.mrb[28].mxu1  ;;  %v5934_v61 = vpop.f32.mrb[29].mxu0  ;;  %6585 = vmatprep.subr.bf16.mxu1 %v7073_v46 }
 0x130   :  { %v5935_v1 = vadd.f32 %v5934_v61, %v5933_v56  ;;  %v5998_v2 = vpop.f32.mrb[29].mxu1  ;;  %v5936_v4 = vpop.f32.mrb[30].mxu0  ;;  %v8325_v61 = vld [vmem:[%s9385_s0 + $0x540] sm:$0xff] }
 0x131   :  { %v5999_v8 = vadd.f32 %v5998_v2, %v5997_v60  ;;  %v6000_v9 = vpop.f32.mrb[30].mxu1  ;;  %v5937_v10 = vpop.f32.mrb[31].mxu0  ;;  %6522 = vmatpush3.bf16.msra.mxu0 %v7072_v53  ;;  %v7086_v53 = vld [vmem:[%s9384_s1 + $0x5b0] sm:$0xff]   ;;  %v8341_v2 = vld [vmem:[%s9385_s0 + $0x548] sm:$0xff] }
 0x132   :  { %v5938_v16 = vadd.f32 %v5937_v10, %v5936_v4  ;;  %v6001_v17 = vpop.f32.mrb[31].mxu1  ;;  %6586 = vmatpush3.bf16.msra.mxu1 %v7074_v58  ;;  %6523 = vmatprep.subr.bf16.mxu0 %v7075_v59  ;;  %v7089_v59 = vld [vmem:[%s9384_s1 + $0x5f8] sm:$0xff]   ;;  %v5475_v10 = vcombine.low %v8270_v24, %v8275_v25 }
 0x133   :  { %v8265_v20 = vadd.f32 %v5999_v8, %v5935_v1  ;;  %v6002_v21 = vadd.f32 %v6001_v17, %v6000_v9  ;;  %4467 = vmatmul.mubr.bf16.gmra.mrb[136].mxu0 %v5411_v62  ;;  %6587 = vmatprep.subr.bf16.mxu1 %v7077_v0  ;;  %v8330_v62 = vld [vmem:[%s9385_s0 + $0x5c0] sm:$0xff]  ;;  %v5477_v17 = vcombine.low %v8283_v28, %v8290_v31 }
 0x134   :  { %4564 = vmatmul.mubr.bf16.gmra.mrb[136].mxu1 %v5413_v5  ;;  %4474 = vmatprep.mubr.bf16.mxu0 %v5444_v6  ;;  %v243_v6 = vld [vmem:[%s9385_s0 + $0x5c8] sm:$0xff]  ;;  %v258_v28 = vld [vmem:[%s9385_s0 + $0x640] sm:$0xff] }
 0x135   :  { %v8285_v29 = vadd.f32 %v6002_v21, %v5938_v16  ;;  %4571 = vmatprep.mubr.bf16.mxu1 %v5446_v11  ;;  %6524 = vmatpush3.bf16.msra.mxu0 %v7076_v7  ;;  %v7091_v7 = vld [vmem:[%s9384_s1 + $0x640] sm:$0xff]  }
 0x136   :  { %v6019_v30 = vpop.f32.mrb[32].mxu0  ;;  %6588 = vmatpush3.bf16.msra.mxu1 %v7078_v13  ;;  %6525 = vmatprep.subr.bf16.mxu0 %v7079_v15  ;;  %v7093_v11 = vld [vmem:[%s9384_s1 + $0x6c0] sm:$0xff]  }
 0x137   :  { %v6083_v34 = vpop.f32.mrb[32].mxu1  ;;  %v6020_v35 = vpop.f32.mrb[33].mxu0  ;;  %6589 = vmatprep.subr.bf16.mxu1 %v7081_v18  ;;  %v5508_v18 = vcombine.high %v8325_v61, %v8330_v62  ;;  %v274_v31 = vld [vmem:[%s9385_s0 + $0x6c0] sm:$0xff] }
 0x138   :  { %v6021_v38 = vadd.f32 %v6020_v35, %v6019_v30  ;;  %v6084_v39 = vpop.f32.mrb[33].mxu1  ;;  %v6022_v40 = vpop.f32.mrb[34].mxu0 }
 0x139   :  { %v6085_v46 = vadd.f32 %v6084_v39, %v6083_v34  ;;  %v6086_v50 = vpop.f32.mrb[34].mxu1  ;;  %v6023_v51 = vpop.f32.mrb[35].mxu0  ;;  %6526 = vmatpush3.bf16.msra.mxu0 %v7080_v27  ;;  %v275_v39 = vld [vmem:[%s9385_s0 + $0x6c8] sm:$0xff] }
 0x13a   :  { %v3871_v56 = vadd.f32 %v6021_v38, %v8022_v14  ;;  %v6024_v57 = vadd.f32 %v6023_v51, %v6022_v40  ;;  %v6087_v58 = vpop.f32.mrb[35].mxu1  ;;  %6590 = vmatpush3.bf16.msra.mxu1 %v7082_v32  ;;  %6527 = vmatprep.subr.bf16.mxu0 %v7083_v33  ;;  %v7088_v14 = vld [vmem:[%s9384_s1 + $0x538] sm:$0xff]   ;;  %v5510_v32 = vcombine.high %v8341_v2, %v243_v6  ;;  %v259_v38 = vld [vmem:[%s9385_s0 + $0x648] sm:$0xff] }
 0x13b   :  { %v6088_v60 = vadd.f32 %v6087_v58, %v6086_v50  ;;  %4475 = vmatmul.mubr.bf16.gmra.mrb[140].mxu0 %v5443_v36  ;;  %6591 = vmatprep.subr.bf16.mxu1 %v7085_v37  ;;  %v5509_v50 = vcombine.low %v8341_v2, %v243_v6  ;;  %v5540_v51 = vcombine.high %v258_v28, %v274_v31 }
 0x13c   :  { %v8335_v0 = vadd.f32 %v6085_v46, %v3871_v56  ;;  %v3874_v1 = vadd.f32 %v6024_v57, %v8046_v22  ;;  %4572 = vmatmul.mubr.bf16.gmra.mrb[140].mxu1 %v5445_v42  ;;  %4482 = vmatprep.mubr.bf16.mxu0 %v5476_v44  ;;  %v7090_v22 = vld [vmem:[%s9384_s1 + $0x5b8] sm:$0xff]   ;;  %v5507_v44 = vcombine.low %v8325_v61, %v8330_v62  ;;  %v290_v62 = vld [vmem:[%s9385_s0 + $0x740] sm:$0xff] }
 0x13d   :  { %4579 = vmatprep.mubr.bf16.mxu1 %v5478_v52  ;;  %6528 = vmatpush3.bf16.msra.mxu0 %v7084_v45  ;;  %v5542_v56 = vcombine.high %v259_v38, %v275_v39 }
 0x13e   :  { %v8343_v4 = vadd.f32 %v6088_v60, %v3874_v1  ;;  %v6025_v5 = vpop.f32.mrb[36].mxu0  ;;  %6592 = vmatpush3.bf16.msra.mxu1 %v7086_v53  ;;  %6529 = vmatprep.subr.bf16.mxu0 %v7087_v54  ;;  %v306_v1 = vld [vmem:[%s9385_s0 + $0x7c0] sm:$0xff] }
 0x13f   :  { %v6089_v8 = vpop.f32.mrb[36].mxu1  ;;  %v6026_v9 = vpop.f32.mrb[37].mxu0  ;;  %6593 = vmatprep.subr.bf16.mxu1 %v7089_v59 }
 0x140   :  { %v6027_v13 = vadd.f32 %v6026_v9, %v6025_v5  ;;  %v6090_v15 = vpop.f32.mrb[37].mxu1  ;;  %v6028_v16 = vpop.f32.mrb[38].mxu0  ;;  %v291_v5 = vld [vmem:[%s9385_s0 + $0x748] sm:$0xff] }
 0x141   :  { %v6091_v21 = vadd.f32 %v6090_v15, %v6089_v8  ;;  %v6092_v27 = vpop.f32.mrb[38].mxu1  ;;  %v6029_v30 = vpop.f32.mrb[39].mxu0  ;;  %6530 = vmatpush3.bf16.msra.mxu0 %v7088_v14 }
 0x142   :  { %v3879_v24 = vadd.f32 %v6027_v13, %v8063_v41  ;;  %v6030_v25 = vadd.f32 %v6029_v30, %v6028_v16  ;;  %v6093_v33 = vpop.f32.mrb[39].mxu1  ;;  %6594 = vmatpush3.bf16.msra.mxu1 %v7090_v22  ;;  %6643 = vmatprep.subr.bf16.mxu0 %v7091_v7  ;;  %v5539_v7 = vcombine.low %v258_v28, %v274_v31  ;;  %v69_v31 = vld [vmem:[%s9385_s0 + $0x58] sm:$0xff] }
 0x143   :  { %v6094_v34 = vadd.f32 %v6093_v33, %v6092_v27  ;;  %4483 = vmatmul.mubr.bf16.gmra.mrb[144].mxu0 %v5475_v10  ;;  %6707 = vmatprep.subr.bf16.mxu1 %v7093_v11  ;;  %v5541_v11 = vcombine.low %v259_v38, %v275_v39  ;;  %v5572_v13 = vcombine.high %v290_v62, %v306_v1  ;;  %v68_v33 = vld [vmem:[%s9385_s0 + $0x50] sm:$0xff] }
 0x144   :  { %v8371_v35 = vadd.f32 %v6091_v21, %v3879_v24  ;;  %v3882_v36 = vadd.f32 %v6030_v25, %v8065_v43  ;;  %4580 = vmatmul.mubr.bf16.gmra.mrb[144].mxu1 %v5477_v17  ;;  %4490 = vmatprep.mubr.bf16.mxu0 %v5508_v18  ;;  %v5571_v38 = vcombine.low %v290_v62, %v306_v1 }
 0x145   :  { %4587 = vmatprep.mubr.bf16.mxu1 %v5510_v32 }
 0x146   :  { %v8374_v41 = vadd.f32 %v6094_v34, %v3882_v36  ;;  %v6031_v37 = vpop.f32.mrb[40].mxu0  ;;  %v84_v34 = vld [vmem:[%s9385_s0 + $0xd0] sm:$0xff] }
 0x147   :  { %v6095_v40 = vpop.f32.mrb[40].mxu1  ;;  %v6032_v42 = vpop.f32.mrb[41].mxu0 }
 0x148   :  { %v6033_v43 = vadd.f32 %v6032_v42, %v6031_v37  ;;  %v6096_v45 = vpop.f32.mrb[41].mxu1  ;;  %v6034_v46 = vpop.f32.mrb[42].mxu0 }
 0x149   :  { %v6097_v52 = vadd.f32 %v6096_v45, %v6095_v40  ;;  %v6098_v53 = vpop.f32.mrb[42].mxu1  ;;  %v6035_v54 = vpop.f32.mrb[43].mxu0 }
 0x14a   :  { %v3887_v57 = vadd.f32 %v6033_v43, %v8081_v63  ;;  %v6036_v58 = vadd.f32 %v6035_v54, %v6034_v46  ;;  %v6099_v59 = vpop.f32.mrb[43].mxu1  ;;  %v5352_v43 = vcombine.high %v68_v33, %v84_v34 }
 0x14b   :  { %v6100_v60 = vadd.f32 %v6099_v59, %v6098_v53  ;;  %4491 = vmatmul.mubr.bf16.gmra.mrb[148].mxu0 %v5507_v44 }
 0x14c   :  { %v8386_v14 = vadd.f32 %v6097_v52, %v3887_v57  ;;  %v3890_v61 = vadd.f32 %v6036_v58, %v8089_v3  ;;  %4588 = vmatmul.mubr.bf16.gmra.mrb[148].mxu1 %v5509_v50  ;;  %4498 = vmatprep.mubr.bf16.mxu0 %v5540_v51  ;;  %v307_v3 = vld [vmem:[%s9385_s0 + $0x7c8] sm:$0xff] }
 0x14d   :  { %4595 = vmatprep.mubr.bf16.mxu1 %v5542_v56  ;;  %v5574_v18 = vcombine.high %v291_v5, %v307_v3  ;;  %v5573_v44 = vcombine.low %v291_v5, %v307_v3  ;;  %v8445_v5 = vld [vmem:[%s9385_s0 + $0x1d8] sm:$0xff] }
 0x14e   :  { %v8395_v63 = vadd.f32 %v6100_v60, %v3890_v61  ;;  %v6037_v2 = vpop.f32.mrb[44].mxu0  ;;  %v8430_v61 = vld [vmem:[%s9385_s0 + $0x150] sm:$0xff] }
 0x14f   :  { %v6101_v6 = vpop.f32.mrb[44].mxu1  ;;  %v6038_v22 = vpop.f32.mrb[45].mxu0 }
 0x150   :  { %v6039_v8 = vadd.f32 %v6038_v22, %v6037_v2  ;;  %v6102_v9 = vpop.f32.mrb[45].mxu1  ;;  %v6040_v10 = vpop.f32.mrb[46].mxu0  ;;  %v5351_v2 = vcombine.low %v68_v33, %v84_v34  ;;  %v7098_v34 = vld [vmem:[%s9384_s1 + $0x688] sm:$0xff]  }
 0x151   :  { %v6103_v15 = vadd.f32 %v6102_v9, %v6101_v6  ;;  %v6104_v16 = vpop.f32.mrb[46].mxu1  ;;  %v6041_v17 = vpop.f32.mrb[47].mxu0 }
 0x152   :  { %v3895_v21 = vadd.f32 %v6039_v8, %v8097_v23  ;;  %v6042_v27 = vadd.f32 %v6041_v17, %v6040_v10  ;;  %v6105_v30 = vpop.f32.mrb[47].mxu1  ;;  %v7092_v8 = vld [vmem:[%s9384_s1 + $0x600] sm:$0xff]  }
 0x153   :  { %v6106_v32 = vadd.f32 %v6105_v30, %v6104_v16  ;;  %4499 = vmatmul.mubr.bf16.gmra.mrb[152].mxu0 %v5539_v7 }
 0x154   :  { %v8404_v24 = vadd.f32 %v6103_v15, %v3895_v21  ;;  %v3898_v25 = vadd.f32 %v6042_v27, %v8102_v26  ;;  %4596 = vmatmul.mubr.bf16.gmra.mrb[152].mxu1 %v5541_v11  ;;  %4506 = vmatprep.mubr.bf16.mxu0 %v5572_v13  ;;  %v85_v26 = vld [vmem:[%s9385_s0 + $0xd8] sm:$0xff]  ;;  %v7094_v13 = vld [vmem:[%s9384_s1 + $0x680] sm:$0xff]   ;;  %v7095_v27 = vld [vmem:[%s9384_s1 + $0x648] sm:$0xff]  }
 0x155   :  { %4603 = vmatprep.mubr.bf16.mxu1 %v5574_v18  ;;  %v5354_v51 = vcombine.high %v69_v31, %v85_v26  ;;  %v5353_v7 = vcombine.low %v69_v31, %v85_v26  ;;  %v7099_v31 = vld [vmem:[%s9384_s1 + $0x650] sm:$0xff]  }
 0x156   :  { %v8413_v23 = vadd.f32 %v6106_v32, %v3898_v25  ;;  %v6043_v28 = vpop.f32.mrb[48].mxu0  ;;  %v7097_v32 = vld [vmem:[%s9384_s1 + $0x6c8] sm:$0xff]  }
 0x157   :  { %v6107_v36 = vpop.f32.mrb[48].mxu1  ;;  %v6044_v37 = vpop.f32.mrb[49].mxu0 }
 0x158   :  { %v6045_v39 = vadd.f32 %v6044_v37, %v6043_v28  ;;  %v6108_v40 = vpop.f32.mrb[49].mxu1  ;;  %v6046_v42 = vpop.f32.mrb[50].mxu0  ;;  %v8476_v28 = vld [vmem:[%s9385_s0 + $0x250] sm:$0xff]  ;;  %v8491_v37 = vld [vmem:[%s9385_s0 + $0x258] sm:$0xff] }
 0x159   :  { %v6109_v45 = vadd.f32 %v6108_v40, %v6107_v36  ;;  %v6110_v46 = vpop.f32.mrb[50].mxu1  ;;  %v6047_v50 = vpop.f32.mrb[51].mxu0 }
 0x15a   :  { %v3903_v52 = vadd.f32 %v6045_v39, %v8113_v47  ;;  %v6048_v53 = vadd.f32 %v6047_v50, %v6046_v42  ;;  %v6111_v54 = vpop.f32.mrb[51].mxu1  ;;  %v8435_v47 = vld [vmem:[%s9385_s0 + $0x1d0] sm:$0xff] }
 0x15b   :  { %v6112_v56 = vadd.f32 %v6111_v54, %v6110_v46  ;;  %4507 = vmatmul.mubr.bf16.gmra.mrb[156].mxu0 %v5571_v38  ;;  %v5384_v15 = vcombine.high %v8430_v61, %v8435_v47  ;;  %v8496_v38 = vld [vmem:[%s9385_s0 + $0x2d8] sm:$0xff]  ;;  %v7101_v39 = vld [vmem:[%s9384_s1 + $0x6d0] sm:$0xff]  }
 0x15c   :  { %v8422_v57 = vadd.f32 %v6109_v45, %v3903_v52  ;;  %v3906_v58 = vadd.f32 %v6048_v53, %v8115_v49  ;;  %4604 = vmatmul.mubr.bf16.gmra.mrb[156].mxu1 %v5573_v44  ;;  %4644 = vmatprep.mubr.bf16.mxu0 %v5352_v43  ;;  %v8440_v49 = vld [vmem:[%s9385_s0 + $0x158] sm:$0xff]  ;;  %v5383_v44 = vcombine.low %v8430_v61, %v8435_v47 }
 0x15d   :  { %4741 = vmatprep.mubr.bf16.mxu1 %v5354_v51  ;;  %v5386_v21 = vcombine.high %v8440_v49, %v8445_v5  ;;  %v5385_v50 = vcombine.low %v8440_v49, %v8445_v5  ;;  %v7105_v49 = vld [vmem:[%s9384_s1 + $0x6d8] sm:$0xff]  }
 0x15e   :  { %v8425_v59 = vadd.f32 %v6112_v56, %v3906_v58  ;;  %v6049_v60 = vpop.f32.mrb[52].mxu0  ;;  %v5418_v56 = vcombine.high %v8491_v37, %v8496_v38  ;;  %v7100_v58 = vld [vmem:[%s9384_s1 + $0x610] sm:$0xff]  }
 0x15f   :  { %v6113_v62 = vpop.f32.mrb[52].mxu1  ;;  %v6050_v1 = vpop.f32.mrb[53].mxu0 }
 0x160   :  { %v6051_v3 = vadd.f32 %v6050_v1, %v6049_v60  ;;  %v6114_v6 = vpop.f32.mrb[53].mxu1  ;;  %v6052_v22 = vpop.f32.mrb[54].mxu0  ;;  %v7103_v1 = vld [vmem:[%s9384_s1 + $0x658] sm:$0xff]  }
 0x161   :  { %v6115_v9 = vadd.f32 %v6114_v6, %v6113_v62  ;;  %v6116_v10 = vpop.f32.mrb[54].mxu1  ;;  %v6053_v11 = vpop.f32.mrb[55].mxu0  ;;  %v7102_v62 = vld [vmem:[%s9384_s1 + $0x690] sm:$0xff]  }
 0x162   :  { %v3911_v16 = vadd.f32 %v6051_v3, %v8156_v12  ;;  %v6054_v17 = vadd.f32 %v6053_v11, %v6052_v22  ;;  %v6117_v18 = vpop.f32.mrb[55].mxu1  ;;  %v7096_v12 = vld [vmem:[%s9384_s1 + $0x608] sm:$0xff]   ;;  %v8528_v3 = vld [vmem:[%s9385_s0 + $0x350] sm:$0xff]  ;;  %v8538_v22 = vld [vmem:[%s9385_s0 + $0x358] sm:$0xff] }
 0x163   :  { %v6118_v30 = vadd.f32 %v6117_v18, %v6116_v10  ;;  %4645 = vmatmul.mubr.bf16.vlgmr.msra.gmra.mrb[160].mxu0 %v5351_v2  ;;  %v8533_v6 = vld [vmem:[%s9385_s0 + $0x3d0] sm:$0xff]  ;;  %v7106_v10 = vld [vmem:[%s9384_s1 + $0x698] sm:$0xff]   ;;  %v7107_v11 = vld [vmem:[%s9384_s1 + $0x660] sm:$0xff]  }
 0x164   :  { %v8464_v25 = vadd.f32 %v6115_v9, %v3911_v16  ;;  %v3914_v33 = vadd.f32 %v6054_v17, %v8174_v19  ;;  %4742 = vmatmul.mubr.bf16.vlgmr.msra.gmra.mrb[160].mxu1 %v5353_v7  ;;  %6644 = vmatpush3.bf16.msra.mxu0 %v7092_v8  ;;  %v8481_v19 = vld [vmem:[%s9385_s0 + $0x2d0] sm:$0xff]  ;;  %v8548_v9 = vld [vmem:[%s9385_s0 + $0x3d8] sm:$0xff]  ;;  %v7109_v17 = vld [vmem:[%s9384_s1 + $0x6e0] sm:$0xff]  }
 0x165   :  { %6708 = vmatpush3.bf16.msra.mxu1 %v7094_v13  ;;  %4652 = vmatprep.mubr.bf16.mxu0 %v5384_v15  ;;  %v5416_v51 = vcombine.high %v8476_v28, %v8481_v19  ;;  %v5415_v16 = vcombine.low %v8476_v28, %v8481_v19  ;;  %v5450_v28 = vcombine.high %v8538_v22, %v8548_v9  ;;  %v7108_v19 = vld [vmem:[%s9384_s1 + $0x620] sm:$0xff]  }
 0x166   :  { %v8486_v26 = vadd.f32 %v6118_v30, %v3914_v33  ;;  %v6055_v36 = vpop.f32.mrb[56].mxu0  ;;  %4749 = vmatprep.mubr.bf16.mxu1 %v5386_v21  ;;  %6645 = vmatprep.subr.bf16.mxu0 %v7095_v27  ;;  %v5417_v30 = vcombine.low %v8491_v37, %v8496_v38  ;;  %v7110_v37 = vld [vmem:[%s9384_s1 + $0x6a0] sm:$0xff]   ;;  %v7111_v38 = vld [vmem:[%s9384_s1 + $0x668] sm:$0xff]  }
 0x167   :  { %v6119_v40 = vpop.f32.mrb[56].mxu1  ;;  %v6056_v42 = vpop.f32.mrb[57].mxu0  ;;  %6709 = vmatprep.subr.bf16.mxu1 %v7097_v32  ;;  %v5448_v32 = vcombine.high %v8528_v3, %v8533_v6 }
 0x168   :  { %v6057_v43 = vadd.f32 %v6056_v42, %v6055_v36  ;;  %v6120_v45 = vpop.f32.mrb[57].mxu1  ;;  %v6058_v46 = vpop.f32.mrb[58].mxu0  ;;  %6646 = vmatpush3.bf16.msra.mxu0 %v7096_v12  ;;  %v7113_v42 = vld [vmem:[%s9384_s1 + $0x6e8] sm:$0xff]  }
 0x169   :  { %v6121_v52 = vadd.f32 %v6120_v45, %v6119_v40  ;;  %v6122_v53 = vpop.f32.mrb[58].mxu1  ;;  %v6059_v54 = vpop.f32.mrb[59].mxu0  ;;  %6710 = vmatpush3.bf16.msra.mxu1 %v7098_v34  ;;  %6647 = vmatprep.subr.bf16.mxu0 %v7099_v31  ;;  %v8591_v45 = vld [vmem:[%s9385_s0 + $0x4d0] sm:$0xff] }
 0x16a   :  { %v3919_v60 = vadd.f32 %v6057_v43, %v8209_v48  ;;  %v6060_v61 = vadd.f32 %v6059_v54, %v6058_v46  ;;  %v6123_v47 = vpop.f32.mrb[59].mxu1  ;;  %6711 = vmatprep.subr.bf16.mxu1 %v7101_v39  ;;  %v8586_v43 = vld [vmem:[%s9385_s0 + $0x450] sm:$0xff]  ;;  %v8596_v46 = vld [vmem:[%s9385_s0 + $0x458] sm:$0xff] }
 0x16b   :  { %v6124_v2 = vadd.f32 %v6123_v47, %v6122_v53  ;;  %4653 = vmatmul.mubr.bf16.gmra.mrb[164].mxu0 %v5383_v44  ;;  %v7114_v53 = vld [vmem:[%s9384_s1 + $0x6a8] sm:$0xff]   ;;  %v7115_v54 = vld [vmem:[%s9384_s1 + $0x670] sm:$0xff]  }
 0x16c   :  { %v8522_v5 = vadd.f32 %v6121_v52, %v3919_v60  ;;  %v3922_v48 = vadd.f32 %v6060_v61, %v8229_v55  ;;  %4750 = vmatmul.mubr.bf16.gmra.mrb[164].mxu1 %v5385_v50  ;;  %4660 = vmatprep.mubr.bf16.mxu0 %v5416_v51  ;;  %v7104_v55 = vld [vmem:[%s9384_s1 + $0x618] sm:$0xff]   ;;  %v5447_v60 = vcombine.low %v8528_v3, %v8533_v6  ;;  %v7117_v61 = vld [vmem:[%s9384_s1 + $0x6f0] sm:$0xff]  }
 0x16d   :  { %4757 = vmatprep.mubr.bf16.mxu1 %v5418_v56  ;;  %6648 = vmatpush3.bf16.msra.mxu0 %v7100_v58  ;;  %v8606_v52 = vld [vmem:[%s9385_s0 + $0x4d8] sm:$0xff]  ;;  %v7116_v6 = vld [vmem:[%s9384_s1 + $0x630] sm:$0xff]  }
 0x16e   :  { %v8543_v7 = vadd.f32 %v6124_v2, %v3922_v48  ;;  %v6061_v8 = vpop.f32.mrb[60].mxu0  ;;  %6712 = vmatpush3.bf16.msra.mxu1 %v7102_v62  ;;  %6649 = vmatprep.subr.bf16.mxu0 %v7103_v1  ;;  %v5449_v2 = vcombine.low %v8538_v22, %v8548_v9  ;;  %v5482_v3 = vcombine.high %v8596_v46, %v8606_v52  ;;  %v7118_v22 = vld [vmem:[%s9384_s1 + $0x6b0] sm:$0xff]   ;;  %v7119_v9 = vld [vmem:[%s9384_s1 + $0x678] sm:$0xff]  }
 0x16f   :  { %v6125_v13 = vpop.f32.mrb[60].mxu1  ;;  %v6062_v15 = vpop.f32.mrb[61].mxu0  ;;  %6713 = vmatprep.subr.bf16.mxu1 %v7105_v49  ;;  %v5480_v49 = vcombine.high %v8586_v43, %v8591_v45 }
 0x170   :  { %v6063_v18 = vadd.f32 %v6062_v15, %v6061_v8  ;;  %v6126_v21 = vpop.f32.mrb[61].mxu1  ;;  %v6064_v27 = vpop.f32.mrb[62].mxu0 }
 0x171   :  { %v6127_v33 = vadd.f32 %v6126_v21, %v6125_v13  ;;  %v6128_v12 = vpop.f32.mrb[62].mxu1  ;;  %v6065_v34 = vpop.f32.mrb[63].mxu0  ;;  %6650 = vmatpush3.bf16.msra.mxu0 %v7104_v55  ;;  %v244_v21 = vld [vmem:[%s9385_s0 + $0x5d0] sm:$0xff] }
 0x172   :  { %v3927_v31 = vadd.f32 %v6063_v18, %v8265_v20  ;;  %v6066_v36 = vadd.f32 %v6065_v34, %v6064_v27  ;;  %v6129_v39 = vpop.f32.mrb[63].mxu1  ;;  %6714 = vmatpush3.bf16.msra.mxu1 %v7106_v10  ;;  %6651 = vmatprep.subr.bf16.mxu0 %v7107_v11  ;;  %v8644_v18 = vld [vmem:[%s9385_s0 + $0x550] sm:$0xff]  ;;  %v8652_v27 = vld [vmem:[%s9385_s0 + $0x558] sm:$0xff]  ;;  %v7123_v34 = vld [vmem:[%s9384_s1 + $0x740] sm:$0xff]  }
 0x173   :  { %v6130_v40 = vadd.f32 %v6129_v39, %v6128_v12  ;;  %4661 = vmatmul.mubr.bf16.gmra.mrb[168].mxu0 %v5415_v16  ;;  %6715 = vmatprep.subr.bf16.mxu1 %v7109_v17  ;;  %v7121_v16 = vld [vmem:[%s9384_s1 + $0x6f8] sm:$0xff]  }
 0x174   :  { %v8580_v20 = vadd.f32 %v6127_v33, %v3927_v31  ;;  %v3930_v44 = vadd.f32 %v6066_v36, %v8285_v29  ;;  %4758 = vmatmul.mubr.bf16.gmra.mrb[168].mxu1 %v5417_v30  ;;  %4668 = vmatprep.mubr.bf16.mxu0 %v5448_v32  ;;  %v7112_v29 = vld [vmem:[%s9384_s1 + $0x628] sm:$0xff]   ;;  %v245_v33 = vld [vmem:[%s9385_s0 + $0x5d8] sm:$0xff]  ;;  %v5479_v31 = vcombine.low %v8586_v43, %v8591_v45  ;;  %v7125_v36 = vld [vmem:[%s9384_s1 + $0x7c0] sm:$0xff]  }
 0x175   :  { %4765 = vmatprep.mubr.bf16.mxu1 %v5450_v28  ;;  %6652 = vmatpush3.bf16.msra.mxu0 %v7108_v19  ;;  %v7122_v12 = vld [vmem:[%s9384_s1 + $0x6b8] sm:$0xff]  }
 0x176   :  { %v8601_v50 = vadd.f32 %v6130_v40, %v3930_v44  ;;  %v6147_v51 = vpop.f32.mrb[64].mxu0  ;;  %6716 = vmatpush3.bf16.msra.mxu1 %v7110_v37  ;;  %6653 = vmatprep.subr.bf16.mxu0 %v7111_v38  ;;  %v5481_v40 = vcombine.low %v8596_v46, %v8606_v52  ;;  %v260_v52 = vld [vmem:[%s9385_s0 + $0x650] sm:$0xff] }
 0x177   :  { %v6211_v56 = vpop.f32.mrb[64].mxu1  ;;  %v6148_v58 = vpop.f32.mrb[65].mxu0  ;;  %6717 = vmatprep.subr.bf16.mxu1 %v7113_v42  ;;  %v5512_v42 = vcombine.high %v8644_v18, %v244_v21 }
 0x178   :  { %v6149_v47 = vadd.f32 %v6148_v58, %v6147_v51  ;;  %v6212_v62 = vpop.f32.mrb[65].mxu1  ;;  %v6150_v1 = vpop.f32.mrb[66].mxu0 }
 0x179   :  { %v6213_v48 = vadd.f32 %v6212_v62, %v6211_v56  ;;  %v6214_v55 = vpop.f32.mrb[66].mxu1  ;;  %v6151_v8 = vpop.f32.mrb[67].mxu0  ;;  %6654 = vmatpush3.bf16.msra.mxu0 %v7112_v29 }
 0x17a   :  { %v4065_v10 = vadd.f32 %v6149_v47, %v8335_v0  ;;  %v6152_v11 = vadd.f32 %v6151_v8, %v6150_v1  ;;  %v6215_v13 = vpop.f32.mrb[67].mxu1  ;;  %6718 = vmatpush3.bf16.msra.mxu1 %v7114_v53  ;;  %6655 = vmatprep.subr.bf16.mxu0 %v7115_v54  ;;  %v5514_v53 = vcombine.high %v8652_v27, %v245_v33  ;;  %v261_v47 = vld [vmem:[%s9385_s0 + $0x658] sm:$0xff] }
 0x17b   :  { %v6216_v15 = vadd.f32 %v6215_v13, %v6214_v55  ;;  %4669 = vmatmul.mubr.bf16.gmra.mrb[172].mxu0 %v5447_v60  ;;  %6719 = vmatprep.subr.bf16.mxu1 %v7117_v61  ;;  %v5513_v8 = vcombine.low %v8652_v27, %v245_v33  ;;  %v308_v27 = vld [vmem:[%s9385_s0 + $0x7d0] sm:$0xff] }
 0x17c   :  { %v8638_v0 = vadd.f32 %v6213_v48, %v4065_v10  ;;  %v4068_v17 = vadd.f32 %v6152_v11, %v8343_v4  ;;  %4766 = vmatmul.mubr.bf16.gmra.mrb[172].mxu1 %v5449_v2  ;;  %4676 = vmatprep.mubr.bf16.mxu0 %v5480_v49  ;;  %v7120_v4 = vld [vmem:[%s9384_s1 + $0x638] sm:$0xff]   ;;  %v5511_v2 = vcombine.low %v8644_v18, %v244_v21  ;;  %v292_v21 = vld [vmem:[%s9385_s0 + $0x750] sm:$0xff] }
 0x17d   :  { %4773 = vmatprep.mubr.bf16.mxu1 %v5482_v3  ;;  %6656 = vmatpush3.bf16.msra.mxu0 %v7116_v6 }
 0x17e   :  { %v8657_v30 = vadd.f32 %v6216_v15, %v4068_v17  ;;  %v6153_v32 = vpop.f32.mrb[68].mxu0  ;;  %6720 = vmatpush3.bf16.msra.mxu1 %v7118_v22  ;;  %6657 = vmatprep.subr.bf16.mxu0 %v7119_v9 }
 0x17f   :  { %v6217_v28 = vpop.f32.mrb[68].mxu1  ;;  %v6154_v19 = vpop.f32.mrb[69].mxu0  ;;  %6721 = vmatprep.subr.bf16.mxu1 %v7121_v16 }
 0x180   :  { %v6155_v39 = vadd.f32 %v6154_v19, %v6153_v32  ;;  %v6218_v37 = vpop.f32.mrb[69].mxu1  ;;  %v6156_v38 = vpop.f32.mrb[70].mxu0  ;;  %v293_v32 = vld [vmem:[%s9385_s0 + $0x758] sm:$0xff] }
 0x181   :  { %v6219_v44 = vadd.f32 %v6218_v37, %v6217_v28  ;;  %v6220_v29 = vpop.f32.mrb[70].mxu1  ;;  %v6157_v51 = vpop.f32.mrb[71].mxu0  ;;  %6658 = vmatpush3.bf16.msra.mxu0 %v7120_v4 }
 0x182   :  { %v4073_v43 = vadd.f32 %v6155_v39, %v8371_v35  ;;  %v6158_v45 = vadd.f32 %v6157_v51, %v6156_v38  ;;  %v6221_v54 = vpop.f32.mrb[71].mxu1  ;;  %6722 = vmatpush3.bf16.msra.mxu1 %v7122_v12  ;;  %6771 = vmatprep.subr.bf16.mxu0 %v7123_v34  ;;  %v276_v35 = vld [vmem:[%s9385_s0 + $0x6d0] sm:$0xff]  ;;  %v5576_v39 = vcombine.high %v292_v21, %v308_v27 }
 0x183   :  { %v6222_v56 = vadd.f32 %v6221_v54, %v6220_v29  ;;  %4677 = vmatmul.mubr.bf16.gmra.mrb[176].mxu0 %v5479_v31  ;;  %6835 = vmatprep.subr.bf16.mxu1 %v7125_v36  ;;  %v5544_v3 = vcombine.high %v260_v52, %v276_v35  ;;  %v5543_v34 = vcombine.low %v260_v52, %v276_v35  ;;  %v70_v54 = vld [vmem:[%s9385_s0 + $0x60] sm:$0xff]  ;;  %v71_v52 = vld [vmem:[%s9385_s0 + $0x68] sm:$0xff] }
 0x184   :  { %v8678_v58 = vadd.f32 %v6219_v44, %v4073_v43  ;;  %v4076_v46 = vadd.f32 %v6158_v45, %v8374_v41  ;;  %4774 = vmatmul.mubr.bf16.gmra.mrb[176].mxu1 %v5481_v40  ;;  %4684 = vmatprep.mubr.bf16.mxu0 %v5512_v42  ;;  %v277_v41 = vld [vmem:[%s9385_s0 + $0x6d8] sm:$0xff] }
 0x185   :  { %4781 = vmatprep.mubr.bf16.mxu1 %v5514_v53  ;;  %v5546_v13 = vcombine.high %v261_v47, %v277_v41  ;;  %v5545_v36 = vcombine.low %v261_v47, %v277_v41  ;;  %v5575_v47 = vcombine.low %v292_v21, %v308_v27 }
 0x186   :  { %v8687_v60 = vadd.f32 %v6222_v56, %v4076_v46  ;;  %v6159_v61 = vpop.f32.mrb[72].mxu0  ;;  %v86_v56 = vld [vmem:[%s9385_s0 + $0xe0] sm:$0xff] }
 0x187   :  { %v6223_v62 = vpop.f32.mrb[72].mxu1  ;;  %v6160_v1 = vpop.f32.mrb[73].mxu0 }
 0x188   :  { %v6161_v49 = vadd.f32 %v6160_v1, %v6159_v61  ;;  %v6224_v48 = vpop.f32.mrb[73].mxu1  ;;  %v6162_v55 = vpop.f32.mrb[74].mxu0 }
 0x189   :  { %v6225_v6 = vadd.f32 %v6224_v48, %v6223_v62  ;;  %v6226_v10 = vpop.f32.mrb[74].mxu1  ;;  %v6163_v11 = vpop.f32.mrb[75].mxu0 }
 0x18a   :  { %v4081_v22 = vadd.f32 %v6161_v49, %v8386_v14  ;;  %v6164_v9 = vadd.f32 %v6163_v11, %v6162_v55  ;;  %v6227_v15 = vpop.f32.mrb[75].mxu1  ;;  %v5356_v49 = vcombine.high %v70_v54, %v86_v56 }
 0x18b   :  { %v6228_v16 = vadd.f32 %v6227_v15, %v6226_v10  ;;  %4685 = vmatmul.mubr.bf16.gmra.mrb[180].mxu0 %v5511_v2 }
 0x18c   :  { %v8698_v17 = vadd.f32 %v6225_v6, %v4081_v22  ;;  %v4084_v18 = vadd.f32 %v6164_v9, %v8395_v63  ;;  %4782 = vmatmul.mubr.bf16.gmra.mrb[180].mxu1 %v5513_v8  ;;  %4692 = vmatprep.mubr.bf16.mxu0 %v5544_v3  ;;  %v309_v63 = vld [vmem:[%s9385_s0 + $0x7d8] sm:$0xff] }
 0x18d   :  { %4789 = vmatprep.mubr.bf16.mxu1 %v5546_v13  ;;  %v5578_v42 = vcombine.high %v293_v32, %v309_v63  ;;  %v5577_v2 = vcombine.low %v293_v32, %v309_v63  ;;  %v8757_v32 = vld [vmem:[%s9385_s0 + $0x1e8] sm:$0xff] }
 0x18e   :  { %v8707_v14 = vadd.f32 %v6228_v16, %v4084_v18  ;;  %v6165_v4 = vpop.f32.mrb[76].mxu0  ;;  %v8742_v18 = vld [vmem:[%s9385_s0 + $0x160] sm:$0xff] }
 0x18f   :  { %v6229_v33 = vpop.f32.mrb[76].mxu1  ;;  %v6166_v12 = vpop.f32.mrb[77].mxu0 }
 0x190   :  { %v6167_v28 = vadd.f32 %v6166_v12, %v6165_v4  ;;  %v6230_v19 = vpop.f32.mrb[77].mxu1  ;;  %v6168_v31 = vpop.f32.mrb[78].mxu0  ;;  %v5355_v4 = vcombine.low %v70_v54, %v86_v56  ;;  %v7130_v56 = vld [vmem:[%s9384_s1 + $0x788] sm:$0xff]  }
 0x191   :  { %v6231_v37 = vadd.f32 %v6230_v19, %v6229_v33  ;;  %v6232_v38 = vpop.f32.mrb[78].mxu1  ;;  %v6169_v40 = vpop.f32.mrb[79].mxu0 }
 0x192   :  { %v4089_v44 = vadd.f32 %v6167_v28, %v8404_v24  ;;  %v6170_v29 = vadd.f32 %v6169_v40, %v6168_v31  ;;  %v6233_v51 = vpop.f32.mrb[79].mxu1  ;;  %v7124_v28 = vld [vmem:[%s9384_s1 + $0x700] sm:$0xff]  }
 0x193   :  { %v6234_v53 = vadd.f32 %v6233_v51, %v6232_v38  ;;  %4693 = vmatmul.mubr.bf16.gmra.mrb[184].mxu0 %v5543_v34 }
 0x194   :  { %v8716_v43 = vadd.f32 %v6231_v37, %v4089_v44  ;;  %v4092_v45 = vadd.f32 %v6170_v29, %v8413_v23  ;;  %4790 = vmatmul.mubr.bf16.gmra.mrb[184].mxu1 %v5545_v36  ;;  %4700 = vmatprep.mubr.bf16.mxu0 %v5576_v39  ;;  %v87_v23 = vld [vmem:[%s9385_s0 + $0xe8] sm:$0xff]  ;;  %v7126_v39 = vld [vmem:[%s9384_s1 + $0x780] sm:$0xff]  }
 0x195   :  { %4797 = vmatprep.mubr.bf16.mxu1 %v5578_v42  ;;  %v5358_v3 = vcombine.high %v71_v52, %v87_v23  ;;  %v5357_v34 = vcombine.low %v71_v52, %v87_v23  ;;  %v7127_v29 = vld [vmem:[%s9384_s1 + $0x748] sm:$0xff]   ;;  %v7131_v52 = vld [vmem:[%s9384_s1 + $0x750] sm:$0xff]  }
 0x196   :  { %v8725_v24 = vadd.f32 %v6234_v53, %v4092_v45  ;;  %v6171_v46 = vpop.f32.mrb[80].mxu0  ;;  %v7129_v53 = vld [vmem:[%s9384_s1 + $0x7c8] sm:$0xff]  }
 0x197   :  { %v6235_v35 = vpop.f32.mrb[80].mxu1  ;;  %v6172_v61 = vpop.f32.mrb[81].mxu0 }
 0x198   :  { %v6173_v41 = vadd.f32 %v6172_v61, %v6171_v46  ;;  %v6236_v62 = vpop.f32.mrb[81].mxu1  ;;  %v6174_v1 = vpop.f32.mrb[82].mxu0  ;;  %v8788_v46 = vld [vmem:[%s9385_s0 + $0x260] sm:$0xff]  ;;  %v8803_v61 = vld [vmem:[%s9385_s0 + $0x268] sm:$0xff] }
 0x199   :  { %v6237_v48 = vadd.f32 %v6236_v62, %v6235_v35  ;;  %v6238_v55 = vpop.f32.mrb[82].mxu1  ;;  %v6175_v8 = vpop.f32.mrb[83].mxu0 }
 0x19a   :  { %v4097_v6 = vadd.f32 %v6173_v41, %v8422_v57  ;;  %v6176_v10 = vadd.f32 %v6175_v8, %v6174_v1  ;;  %v6239_v11 = vpop.f32.mrb[83].mxu1  ;;  %v8747_v57 = vld [vmem:[%s9385_s0 + $0x1e0] sm:$0xff]  ;;  %v7133_v41 = vld [vmem:[%s9384_s1 + $0x7d0] sm:$0xff]  }
 0x19b   :  { %v6240_v13 = vadd.f32 %v6239_v11, %v6238_v55  ;;  %4701 = vmatmul.mubr.bf16.gmra.mrb[188].mxu0 %v5575_v47  ;;  %v5388_v37 = vcombine.high %v8742_v18, %v8747_v57  ;;  %v8808_v47 = vld [vmem:[%s9385_s0 + $0x2e8] sm:$0xff] }
 0x19c   :  { %v8734_v22 = vadd.f32 %v6237_v48, %v4097_v6  ;;  %v4100_v9 = vadd.f32 %v6176_v10, %v8425_v59  ;;  %4798 = vmatmul.mubr.bf16.gmra.mrb[188].mxu1 %v5577_v2  ;;  %4838 = vmatprep.mubr.bf16.mxu0 %v5356_v49  ;;  %v8752_v59 = vld [vmem:[%s9385_s0 + $0x168] sm:$0xff]  ;;  %v5387_v2 = vcombine.low %v8742_v18, %v8747_v57 }
 0x19d   :  { %4935 = vmatprep.mubr.bf16.mxu1 %v5358_v3  ;;  %v5390_v44 = vcombine.high %v8752_v59, %v8757_v32  ;;  %v5389_v8 = vcombine.low %v8752_v59, %v8757_v32  ;;  %v7137_v59 = vld [vmem:[%s9384_s1 + $0x7d8] sm:$0xff]  }
 0x19e   :  { %v8737_v15 = vadd.f32 %v6240_v13, %v4100_v9  ;;  %v6177_v16 = vpop.f32.mrb[84].mxu0  ;;  %v5422_v13 = vcombine.high %v8803_v61, %v8808_v47  ;;  %v7132_v9 = vld [vmem:[%s9384_s1 + $0x710] sm:$0xff]  }
 0x19f   :  { %v6241_v21 = vpop.f32.mrb[84].mxu1  ;;  %v6178_v27 = vpop.f32.mrb[85].mxu0 }
 0x1a0   :  { %v6179_v63 = vadd.f32 %v6178_v27, %v6177_v16  ;;  %v6242_v33 = vpop.f32.mrb[85].mxu1  ;;  %v6180_v12 = vpop.f32.mrb[86].mxu0  ;;  %v7135_v27 = vld [vmem:[%s9384_s1 + $0x758] sm:$0xff]  }
 0x1a1   :  { %v6243_v19 = vadd.f32 %v6242_v33, %v6241_v21  ;;  %v6244_v31 = vpop.f32.mrb[86].mxu1  ;;  %v6181_v36 = vpop.f32.mrb[87].mxu0  ;;  %v7134_v21 = vld [vmem:[%s9384_s1 + $0x790] sm:$0xff]   ;;  %v8845_v33 = vld [vmem:[%s9385_s0 + $0x3e0] sm:$0xff] }
 0x1a2   :  { %v4105_v38 = vadd.f32 %v6179_v63, %v8464_v25  ;;  %v6182_v40 = vadd.f32 %v6181_v36, %v6180_v12  ;;  %v6245_v42 = vpop.f32.mrb[87].mxu1  ;;  %v7128_v25 = vld [vmem:[%s9384_s1 + $0x708] sm:$0xff]   ;;  %v8840_v63 = vld [vmem:[%s9385_s0 + $0x360] sm:$0xff] }
 0x1a3   :  { %v6246_v51 = vadd.f32 %v6245_v42, %v6244_v31  ;;  %4839 = vmatmul.mubr.bf16.vlgmr.msra.gmra.mrb[192].mxu0 %v5355_v4  ;;  %v8850_v12 = vld [vmem:[%s9385_s0 + $0x368] sm:$0xff]  ;;  %v7138_v31 = vld [vmem:[%s9384_s1 + $0x798] sm:$0xff]   ;;  %v7139_v36 = vld [vmem:[%s9384_s1 + $0x760] sm:$0xff]  }
 0x1a4   :  { %v8776_v45 = vadd.f32 %v6243_v19, %v4105_v38  ;;  %v4108_v54 = vadd.f32 %v6182_v40, %v8486_v26  ;;  %4936 = vmatmul.mubr.bf16.vlgmr.msra.gmra.mrb[192].mxu1 %v5357_v34  ;;  %6772 = vmatpush3.bf16.msra.mxu0 %v7124_v28  ;;  %v8793_v26 = vld [vmem:[%s9385_s0 + $0x2e0] sm:$0xff]  ;;  %v8860_v19 = vld [vmem:[%s9385_s0 + $0x3e8] sm:$0xff] }
 0x1a5   :  { %6836 = vmatpush3.bf16.msra.mxu1 %v7126_v39  ;;  %4846 = vmatprep.mubr.bf16.mxu0 %v5388_v37  ;;  %v5420_v3 = vcombine.high %v8788_v46, %v8793_v26  ;;  %v5419_v38 = vcombine.low %v8788_v46, %v8793_v26  ;;  %v7141_v40 = vld [vmem:[%s9384_s1 + $0x7e0] sm:$0xff]   ;;  %v5454_v46 = vcombine.high %v8850_v12, %v8860_v19 }
 0x1a6   :  { %v8798_v23 = vadd.f32 %v6246_v51, %v4108_v54  ;;  %v6183_v35 = vpop.f32.mrb[88].mxu0  ;;  %4943 = vmatprep.mubr.bf16.mxu1 %v5390_v44  ;;  %6773 = vmatprep.subr.bf16.mxu0 %v7127_v29  ;;  %v5421_v51 = vcombine.low %v8803_v61, %v8808_v47  ;;  %v7140_v26 = vld [vmem:[%s9384_s1 + $0x720] sm:$0xff]   ;;  %v7143_v47 = vld [vmem:[%s9384_s1 + $0x768] sm:$0xff]  }
 0x1a7   :  { %v6247_v62 = vpop.f32.mrb[88].mxu1  ;;  %v6184_v1 = vpop.f32.mrb[89].mxu0  ;;  %6837 = vmatprep.subr.bf16.mxu1 %v7129_v53  ;;  %v5452_v53 = vcombine.high %v8840_v63, %v8845_v33  ;;  %v7142_v61 = vld [vmem:[%s9384_s1 + $0x7a0] sm:$0xff]  }
 0x1a8   :  { %v6185_v49 = vadd.f32 %v6184_v1, %v6183_v35  ;;  %v6248_v48 = vpop.f32.mrb[89].mxu1  ;;  %v6186_v55 = vpop.f32.mrb[90].mxu0  ;;  %6774 = vmatpush3.bf16.msra.mxu0 %v7128_v25  ;;  %v7145_v1 = vld [vmem:[%s9384_s1 + $0x7e8] sm:$0xff]  }
 0x1a9   :  { %v6249_v6 = vadd.f32 %v6248_v48, %v6247_v62  ;;  %v6250_v10 = vpop.f32.mrb[90].mxu1  ;;  %v6187_v11 = vpop.f32.mrb[91].mxu0  ;;  %6838 = vmatpush3.bf16.msra.mxu1 %v7130_v56  ;;  %6775 = vmatprep.subr.bf16.mxu0 %v7131_v52  ;;  %v8903_v48 = vld [vmem:[%s9385_s0 + $0x4e0] sm:$0xff] }
 0x1aa   :  { %v4113_v16 = vadd.f32 %v6185_v49, %v8522_v5  ;;  %v6188_v18 = vadd.f32 %v6187_v11, %v6186_v55  ;;  %v6251_v57 = vpop.f32.mrb[91].mxu1  ;;  %6839 = vmatprep.subr.bf16.mxu1 %v7133_v41  ;;  %v8898_v49 = vld [vmem:[%s9385_s0 + $0x460] sm:$0xff]  ;;  %v8908_v55 = vld [vmem:[%s9385_s0 + $0x468] sm:$0xff]  ;;  %v7147_v11 = vld [vmem:[%s9384_s1 + $0x770] sm:$0xff]  }
 0x1ab   :  { %v6252_v4 = vadd.f32 %v6251_v57, %v6250_v10  ;;  %4847 = vmatmul.mubr.bf16.gmra.mrb[196].mxu0 %v5387_v2  ;;  %v7146_v10 = vld [vmem:[%s9384_s1 + $0x7a8] sm:$0xff]  }
 0x1ac   :  { %v8834_v32 = vadd.f32 %v6249_v6, %v4113_v16  ;;  %v4116_v5 = vadd.f32 %v6188_v18, %v8543_v7  ;;  %4944 = vmatmul.mubr.bf16.gmra.mrb[196].mxu1 %v5389_v8  ;;  %4854 = vmatprep.mubr.bf16.mxu0 %v5420_v3  ;;  %v7136_v7 = vld [vmem:[%s9384_s1 + $0x718] sm:$0xff]   ;;  %v8918_v6 = vld [vmem:[%s9385_s0 + $0x4e8] sm:$0xff]  ;;  %v5451_v16 = vcombine.low %v8840_v63, %v8845_v33  ;;  %v7149_v18 = vld [vmem:[%s9384_s1 + $0x7f0] sm:$0xff]  }
 0x1ad   :  { %4951 = vmatprep.mubr.bf16.mxu1 %v5422_v13  ;;  %6776 = vmatpush3.bf16.msra.mxu0 %v7132_v9  ;;  %v5486_v63 = vcombine.high %v8908_v55, %v8918_v6  ;;  %v7148_v33 = vld [vmem:[%s9384_s1 + $0x730] sm:$0xff]  }
 0x1ae   :  { %v8855_v34 = vadd.f32 %v6252_v4, %v4116_v5  ;;  %v6189_v28 = vpop.f32.mrb[92].mxu0  ;;  %6840 = vmatpush3.bf16.msra.mxu1 %v7134_v21  ;;  %6777 = vmatprep.subr.bf16.mxu0 %v7135_v27  ;;  %v5453_v4 = vcombine.low %v8850_v12, %v8860_v19  ;;  %v7150_v12 = vld [vmem:[%s9384_s1 + $0x7b0] sm:$0xff]   ;;  %v7151_v19 = vld [vmem:[%s9384_s1 + $0x778] sm:$0xff]  }
 0x1af   :  { %v6253_v39 = vpop.f32.mrb[92].mxu1  ;;  %v6190_v37 = vpop.f32.mrb[93].mxu0  ;;  %6841 = vmatprep.subr.bf16.mxu1 %v7137_v59  ;;  %v5484_v59 = vcombine.high %v8898_v49, %v8903_v48 }
 0x1b0   :  { %v6191_v42 = vadd.f32 %v6190_v37, %v6189_v28  ;;  %v6254_v44 = vpop.f32.mrb[93].mxu1  ;;  %v6192_v29 = vpop.f32.mrb[94].mxu0 }
 0x1b1   :  { %v6255_v54 = vadd.f32 %v6254_v44, %v6253_v39  ;;  %v6256_v25 = vpop.f32.mrb[94].mxu1  ;;  %v6193_v56 = vpop.f32.mrb[95].mxu0  ;;  %6778 = vmatpush3.bf16.msra.mxu0 %v7136_v7  ;;  %v246_v44 = vld [vmem:[%s9385_s0 + $0x5e0] sm:$0xff] }
 0x1b2   :  { %v4121_v52 = vadd.f32 %v6191_v42, %v8580_v20  ;;  %v6194_v35 = vadd.f32 %v6193_v56, %v6192_v29  ;;  %v6257_v41 = vpop.f32.mrb[95].mxu1  ;;  %6842 = vmatpush3.bf16.msra.mxu1 %v7138_v31  ;;  %6779 = vmatprep.subr.bf16.mxu0 %v7139_v36  ;;  %v230_v42 = vld [vmem:[%s9385_s0 + $0x560] sm:$0xff]  ;;  %v7152_v29 = vld [vmem:[%s9384_s1 + $0x738] sm:$0xff]  }
 0x1b3   :  { %v6258_v62 = vadd.f32 %v6257_v41, %v6256_v25  ;;  %4855 = vmatmul.mubr.bf16.gmra.mrb[200].mxu0 %v5419_v38  ;;  %6843 = vmatprep.subr.bf16.mxu1 %v7141_v40  ;;  %v7153_v38 = vld [vmem:[%s9384_s1 + $0x7f8] sm:$0xff]  }
 0x1b4   :  { %v8892_v20 = vadd.f32 %v6255_v54, %v4121_v52  ;;  %v4124_v2 = vadd.f32 %v6194_v35, %v8601_v50  ;;  %4952 = vmatmul.mubr.bf16.gmra.mrb[200].mxu1 %v5421_v51  ;;  %4862 = vmatprep.mubr.bf16.mxu0 %v5452_v53  ;;  %v7144_v50 = vld [vmem:[%s9384_s1 + $0x728] sm:$0xff]   ;;  %v7154_v25 = vld [vmem:[%s9384_s1 + $0x7b8] sm:$0xff]  }
 0x1b5   :  { %4959 = vmatprep.mubr.bf16.mxu1 %v5454_v46  ;;  %6780 = vmatpush3.bf16.msra.mxu0 %v7140_v26  ;;  %v247_v54 = vld [vmem:[%s9385_s0 + $0x5e8] sm:$0xff]  ;;  %v5483_v26 = vcombine.low %v8898_v49, %v8903_v48 }
 0x1b6   :  { %v8913_v8 = vadd.f32 %v6258_v62, %v4124_v2  ;;  %v6275_v3 = vpop.f32.mrb[96].mxu0  ;;  %6844 = vmatpush3.bf16.msra.mxu1 %v7142_v61  ;;  %6781 = vmatprep.subr.bf16.mxu0 %v7143_v47  ;;  %v5485_v61 = vcombine.low %v8908_v55, %v8918_v6  ;;  %v5516_v47 = vcombine.high %v230_v42, %v246_v44  ;;  %v262_v55 = vld [vmem:[%s9385_s0 + $0x660] sm:$0xff] }
 0x1b7   :  { %v6339_v13 = vpop.f32.mrb[96].mxu1  ;;  %v6276_v9 = vpop.f32.mrb[97].mxu0  ;;  %6845 = vmatprep.subr.bf16.mxu1 %v7145_v1 }
 0x1b8   :  { %v6277_v57 = vadd.f32 %v6276_v9, %v6275_v3  ;;  %v6340_v21 = vpop.f32.mrb[97].mxu1  ;;  %v6278_v27 = vpop.f32.mrb[98].mxu0 }
 0x1b9   :  { %v6341_v5 = vadd.f32 %v6340_v21, %v6339_v13  ;;  %v6342_v7 = vpop.f32.mrb[98].mxu1  ;;  %v6279_v28 = vpop.f32.mrb[99].mxu0  ;;  %6782 = vmatpush3.bf16.msra.mxu0 %v7144_v50  ;;  %v5515_v21 = vcombine.low %v230_v42, %v246_v44  ;;  %v310_v42 = vld [vmem:[%s9385_s0 + $0x7e0] sm:$0xff] }
 0x1ba   :  { %v4259_v31 = vadd.f32 %v6277_v57, %v8638_v0  ;;  %v6280_v36 = vadd.f32 %v6279_v28, %v6278_v27  ;;  %v6343_v39 = vpop.f32.mrb[99].mxu1  ;;  %6846 = vmatpush3.bf16.msra.mxu1 %v7146_v10  ;;  %6783 = vmatprep.subr.bf16.mxu0 %v7147_v11 }
 0x1bb   :  { %v6344_v37 = vadd.f32 %v6343_v39, %v6342_v7  ;;  %4863 = vmatmul.mubr.bf16.gmra.mrb[204].mxu0 %v5451_v16  ;;  %6847 = vmatprep.subr.bf16.mxu1 %v7149_v18  ;;  %v263_v16 = vld [vmem:[%s9385_s0 + $0x668] sm:$0xff] }
 0x1bc   :  { %v8950_v0 = vadd.f32 %v6341_v5, %v4259_v31  ;;  %v4262_v40 = vadd.f32 %v6280_v36, %v8657_v30  ;;  %4960 = vmatmul.mubr.bf16.gmra.mrb[204].mxu1 %v5453_v4  ;;  %4870 = vmatprep.mubr.bf16.mxu0 %v5484_v59  ;;  %v231_v30 = vld [vmem:[%s9385_s0 + $0x568] sm:$0xff] }
 0x1bd   :  { %4967 = vmatprep.mubr.bf16.mxu1 %v5486_v63  ;;  %6784 = vmatpush3.bf16.msra.mxu0 %v7148_v33  ;;  %v5518_v50 = vcombine.high %v231_v30, %v247_v54  ;;  %v5517_v5 = vcombine.low %v231_v30, %v247_v54 }
 0x1be   :  { %v8962_v51 = vadd.f32 %v6344_v37, %v4262_v40  ;;  %v6281_v53 = vpop.f32.mrb[100].mxu0  ;;  %6848 = vmatpush3.bf16.msra.mxu1 %v7150_v12  ;;  %6785 = vmatprep.subr.bf16.mxu0 %v7151_v19  ;;  %v294_v40 = vld [vmem:[%s9385_s0 + $0x760] sm:$0xff] }
 0x1bf   :  { %v6345_v56 = vpop.f32.mrb[100].mxu1  ;;  %v6282_v46 = vpop.f32.mrb[101].mxu0  ;;  %6849 = vmatprep.subr.bf16.mxu1 %v7153_v38 }
 0x1c0   :  { %v6283_v52 = vadd.f32 %v6282_v46, %v6281_v53  ;;  %v6346_v35 = vpop.f32.mrb[101].mxu1  ;;  %v6284_v41 = vpop.f32.mrb[102].mxu0 }
 0x1c1   :  { %v6347_v62 = vadd.f32 %v6346_v35, %v6345_v56  ;;  %v6348_v1 = vpop.f32.mrb[102].mxu1  ;;  %v6285_v2 = vpop.f32.mrb[103].mxu0  ;;  %6786 = vmatpush3.bf16.msra.mxu0 %v7152_v29  ;;  %v295_v29 = vld [vmem:[%s9385_s0 + $0x768] sm:$0xff] }
 0x1c2   :  { %v4267_v3 = vadd.f32 %v6283_v52, %v8678_v58  ;;  %v6286_v10 = vadd.f32 %v6285_v2, %v6284_v41  ;;  %v6349_v11 = vpop.f32.mrb[103].mxu1  ;;  %6850 = vmatpush3.bf16.msra.mxu1 %v7154_v25  ;;  %v278_v58 = vld [vmem:[%s9385_s0 + $0x6e0] sm:$0xff]  ;;  %v5580_v52 = vcombine.high %v294_v40, %v310_v42 }
 0x1c3   :  { %v6350_v13 = vadd.f32 %v6349_v11, %v6348_v1  ;;  %4871 = vmatmul.mubr.bf16.gmra.mrb[208].mxu0 %v5483_v26  ;;  %v5548_v7 = vcombine.high %v262_v55, %v278_v58  ;;  %v5547_v54 = vcombine.low %v262_v55, %v278_v58  ;;  %v72_v11 = vld [vmem:[%s9385_s0 + $0x70] sm:$0xff]  ;;  %v73_v55 = vld [vmem:[%s9385_s0 + $0x78] sm:$0xff] }
 0x1c4   :  { %v8978_v49 = vadd.f32 %v6347_v62, %v4267_v3  ;;  %v4270_v48 = vadd.f32 %v6286_v10, %v8687_v60  ;;  %4968 = vmatmul.mubr.bf16.gmra.mrb[208].mxu1 %v5485_v61  ;;  %4878 = vmatprep.mubr.bf16.mxu0 %v5516_v47  ;;  %v279_v60 = vld [vmem:[%s9385_s0 + $0x6e8] sm:$0xff] }
 0x1c5   :  { %4975 = vmatprep.mubr.bf16.mxu1 %v5518_v50  ;;  %v5550_v31 = vcombine.high %v263_v16, %v279_v60  ;;  %v5549_v26 = vcombine.low %v263_v16, %v279_v60  ;;  %v5579_v16 = vcombine.low %v294_v40, %v310_v42  ;;  %v105_v40 = vld [vmem:[%s9385_s0 + $0x178] sm:$0xff] }
 0x1c6   :  { %v8987_v6 = vadd.f32 %v6350_v13, %v4270_v48  ;;  %v6287_v9 = vpop.f32.mrb[104].mxu0  ;;  %v88_v13 = vld [vmem:[%s9385_s0 + $0xf0] sm:$0xff] }
 0x1c7   :  { %v6351_v18 = vpop.f32.mrb[104].mxu1  ;;  %v6288_v57 = vpop.f32.mrb[105].mxu0 }
 0x1c8   :  { %v6289_v27 = vadd.f32 %v6288_v57, %v6287_v9  ;;  %v6352_v4 = vpop.f32.mrb[105].mxu1  ;;  %v6290_v59 = vpop.f32.mrb[106].mxu0 }
 0x1c9   :  { %v6353_v28 = vadd.f32 %v6352_v4, %v6351_v18  ;;  %v6354_v63 = vpop.f32.mrb[106].mxu1  ;;  %v6291_v33 = vpop.f32.mrb[107].mxu0 }
 0x1ca   :  { %v4275_v36 = vadd.f32 %v6289_v27, %v8698_v17  ;;  %v6292_v39 = vadd.f32 %v6291_v33, %v6290_v59  ;;  %v6355_v12 = vpop.f32.mrb[107].mxu1  ;;  %v5360_v27 = vcombine.high %v72_v11, %v88_v13 }
 0x1cb   :  { %v6356_v19 = vadd.f32 %v6355_v12, %v6354_v63  ;;  %4879 = vmatmul.mubr.bf16.gmra.mrb[212].mxu0 %v5515_v21  ;;  %v104_v12 = vld [vmem:[%s9385_s0 + $0x170] sm:$0xff] }
 0x1cc   :  { %v8996_v37 = vadd.f32 %v6353_v28, %v4275_v36  ;;  %v4278_v38 = vadd.f32 %v6292_v39, %v8707_v14  ;;  %4976 = vmatmul.mubr.bf16.gmra.mrb[212].mxu1 %v5517_v5  ;;  %4886 = vmatprep.mubr.bf16.mxu0 %v5548_v7  ;;  %v311_v14 = vld [vmem:[%s9385_s0 + $0x7e8] sm:$0xff] }
 0x1cd   :  { %4983 = vmatprep.mubr.bf16.mxu1 %v5550_v31  ;;  %v5582_v47 = vcombine.high %v295_v29, %v311_v14  ;;  %v5581_v21 = vcombine.low %v295_v29, %v311_v14  ;;  %v5359_v29 = vcombine.low %v72_v11, %v88_v13  ;;  %v137_v11 = vld [vmem:[%s9385_s0 + $0x278] sm:$0xff] }
 0x1ce   :  { %v9005_v17 = vadd.f32 %v6356_v19, %v4278_v38  ;;  %v6293_v44 = vpop.f32.mrb[108].mxu0  ;;  %v120_v19 = vld [vmem:[%s9385_s0 + $0x1f0] sm:$0xff] }
 0x1cf   :  { %v6357_v53 = vpop.f32.mrb[108].mxu1  ;;  %v6294_v30 = vpop.f32.mrb[109].mxu0 }
 0x1d0   :  { %v6295_v25 = vadd.f32 %v6294_v30, %v6293_v44  ;;  %v6358_v56 = vpop.f32.mrb[109].mxu1  ;;  %v6296_v46 = vpop.f32.mrb[110].mxu0 }
 0x1d1   :  { %v6359_v35 = vadd.f32 %v6358_v56, %v6357_v53  ;;  %v6360_v41 = vpop.f32.mrb[110].mxu1  ;;  %v6297_v61 = vpop.f32.mrb[111].mxu0 }
 0x1d2   :  { %v4283_v62 = vadd.f32 %v6295_v25, %v8716_v43  ;;  %v6298_v1 = vadd.f32 %v6297_v61, %v6296_v46  ;;  %v6361_v2 = vpop.f32.mrb[111].mxu1  ;;  %v5392_v25 = vcombine.high %v104_v12, %v120_v19 }
 0x1d3   :  { %v6362_v50 = vadd.f32 %v6361_v2, %v6360_v41  ;;  %4887 = vmatmul.mubr.bf16.gmra.mrb[216].mxu0 %v5547_v54  ;;  %v136_v2 = vld [vmem:[%s9385_s0 + $0x270] sm:$0xff] }
 0x1d4   :  { %v9014_v3 = vadd.f32 %v6359_v35, %v4283_v62  ;;  %v4286_v10 = vadd.f32 %v6298_v1, %v8725_v24  ;;  %4984 = vmatmul.mubr.bf16.gmra.mrb[216].mxu1 %v5549_v26  ;;  %4894 = vmatprep.mubr.bf16.mxu0 %v5580_v52  ;;  %v89_v24 = vld [vmem:[%s9385_s0 + $0xf8] sm:$0xff] }
 0x1d5   :  { %4991 = vmatprep.mubr.bf16.mxu1 %v5582_v47  ;;  %v5362_v7 = vcombine.high %v73_v55, %v89_v24  ;;  %v5361_v54 = vcombine.low %v73_v55, %v89_v24  ;;  %v5391_v55 = vcombine.low %v104_v12, %v120_v19  ;;  %v169_v12 = vld [vmem:[%s9385_s0 + $0x378] sm:$0xff] }
 0x1d6   :  { %v9023_v43 = vadd.f32 %v6362_v50, %v4286_v10  ;;  %v6299_v48 = vpop.f32.mrb[112].mxu0  ;;  %v152_v50 = vld [vmem:[%s9385_s0 + $0x2f0] sm:$0xff] }
 0x1d7   :  { %v6363_v58 = vpop.f32.mrb[112].mxu1  ;;  %v6300_v9 = vpop.f32.mrb[113].mxu0 }
 0x1d8   :  { %v6301_v60 = vadd.f32 %v6300_v9, %v6299_v48  ;;  %v6364_v18 = vpop.f32.mrb[113].mxu1  ;;  %v6302_v57 = vpop.f32.mrb[114].mxu0 }
 0x1d9   :  { %v6365_v4 = vadd.f32 %v6364_v18, %v6363_v58  ;;  %v6366_v59 = vpop.f32.mrb[114].mxu1  ;;  %v6303_v5 = vpop.f32.mrb[115].mxu0 }
 0x1da   :  { %v4291_v28 = vadd.f32 %v6301_v60, %v8734_v22  ;;  %v6304_v63 = vadd.f32 %v6303_v5, %v6302_v57  ;;  %v6367_v33 = vpop.f32.mrb[115].mxu1  ;;  %v5424_v60 = vcombine.high %v136_v2, %v152_v50 }
 0x1db   :  { %v6368_v31 = vadd.f32 %v6367_v33, %v6366_v59  ;;  %4895 = vmatmul.mubr.bf16.gmra.mrb[220].mxu0 %v5579_v16  ;;  %v168_v33 = vld [vmem:[%s9385_s0 + $0x370] sm:$0xff] }
 0x1dc   :  { %v9032_v36 = vadd.f32 %v6365_v4, %v4291_v28  ;;  %v4294_v39 = vadd.f32 %v6304_v63, %v8737_v15  ;;  %4992 = vmatmul.mubr.bf16.gmra.mrb[220].mxu1 %v5581_v21  ;;  %5032 = vmatprep.mubr.bf16.mxu0 %v5360_v27  ;;  %v121_v15 = vld [vmem:[%s9385_s0 + $0x1f8] sm:$0xff] }
 0x1dd   :  { %5129 = vmatprep.mubr.bf16.mxu1 %v5362_v7  ;;  %v5394_v52 = vcombine.high %v105_v40, %v121_v15  ;;  %v5393_v16 = vcombine.low %v105_v40, %v121_v15  ;;  %v5423_v40 = vcombine.low %v136_v2, %v152_v50  ;;  %v201_v2 = vld [vmem:[%s9385_s0 + $0x478] sm:$0xff] }
 0x1de   :  { %v9041_v22 = vadd.f32 %v6368_v31, %v4294_v39  ;;  %v6305_v38 = vpop.f32.mrb[116].mxu0  ;;  %v184_v31 = vld [vmem:[%s9385_s0 + $0x3f0] sm:$0xff] }
 0x1df   :  { %v6369_v42 = vpop.f32.mrb[116].mxu1  ;;  %v6306_v44 = vpop.f32.mrb[117].mxu0 }
 0x1e0   :  { %v6307_v14 = vadd.f32 %v6306_v44, %v6305_v38  ;;  %v6370_v53 = vpop.f32.mrb[117].mxu1  ;;  %v6308_v30 = vpop.f32.mrb[118].mxu0 }
 0x1e1   :  { %v6371_v56 = vadd.f32 %v6370_v53, %v6369_v42  ;;  %v6372_v46 = vpop.f32.mrb[118].mxu1  ;;  %v6309_v26 = vpop.f32.mrb[119].mxu0 }
 0x1e2   :  { %v4299_v35 = vadd.f32 %v6307_v14, %v8776_v45  ;;  %v6310_v41 = vadd.f32 %v6309_v26, %v6308_v30  ;;  %v6373_v61 = vpop.f32.mrb[119].mxu1  ;;  %v5456_v14 = vcombine.high %v168_v33, %v184_v31 }
 0x1e3   :  { %v6374_v47 = vadd.f32 %v6373_v61, %v6372_v46  ;;  %5033 = vmatmul.mubr.bf16.vlgmr.msra.gmra.mrb[224].mxu0 %v5359_v29  ;;  %v200_v61 = vld [vmem:[%s9385_s0 + $0x470] sm:$0xff] }
 0x1e4   :  { %v9050_v62 = vadd.f32 %v6371_v56, %v4299_v35  ;;  %v4302_v1 = vadd.f32 %v6310_v41, %v8798_v23  ;;  %5130 = vmatmul.mubr.bf16.vlgmr.msra.gmra.mrb[224].mxu1 %v5361_v54  ;;  %5040 = vmatprep.mubr.bf16.mxu0 %v5392_v25  ;;  %v153_v23 = vld [vmem:[%s9385_s0 + $0x2f8] sm:$0xff] }
 0x1e5   :  { %5137 = vmatprep.mubr.bf16.mxu1 %v5394_v52  ;;  %v5426_v27 = vcombine.high %v137_v11, %v153_v23  ;;  %v5425_v29 = vcombine.low %v137_v11, %v153_v23  ;;  %v5455_v11 = vcombine.low %v168_v33, %v184_v31  ;;  %v233_v33 = vld [vmem:[%s9385_s0 + $0x578] sm:$0xff] }
 0x1e6   :  { %v9059_v45 = vadd.f32 %v6374_v47, %v4302_v1  ;;  %v6311_v10 = vpop.f32.mrb[120].mxu0  ;;  %v216_v47 = vld [vmem:[%s9385_s0 + $0x4f0] sm:$0xff] }
 0x1e7   :  { %v6375_v13 = vpop.f32.mrb[120].mxu1  ;;  %v6312_v48 = vpop.f32.mrb[121].mxu0 }
 0x1e8   :  { %v6313_v24 = vadd.f32 %v6312_v48, %v6311_v10  ;;  %v6376_v58 = vpop.f32.mrb[121].mxu1  ;;  %v6314_v9 = vpop.f32.mrb[122].mxu0 }
 0x1e9   :  { %v6377_v18 = vadd.f32 %v6376_v58, %v6375_v13  ;;  %v6378_v57 = vpop.f32.mrb[122].mxu1  ;;  %v6315_v21 = vpop.f32.mrb[123].mxu0 }
 0x1ea   :  { %v4307_v4 = vadd.f32 %v6313_v24, %v8834_v32  ;;  %v6316_v59 = vadd.f32 %v6315_v21, %v6314_v9  ;;  %v6379_v5 = vpop.f32.mrb[123].mxu1  ;;  %v5488_v24 = vcombine.high %v200_v61, %v216_v47 }
 0x1eb   :  { %v6380_v7 = vadd.f32 %v6379_v5, %v6378_v57  ;;  %5041 = vmatmul.mubr.bf16.gmra.mrb[228].mxu0 %v5391_v55  ;;  %v232_v5 = vld [vmem:[%s9385_s0 + $0x570] sm:$0xff] }
 0x1ec   :  { %v9068_v28 = vadd.f32 %v6377_v18, %v4307_v4  ;;  %v4310_v63 = vadd.f32 %v6316_v59, %v8855_v34  ;;  %5138 = vmatmul.mubr.bf16.gmra.mrb[228].mxu1 %v5393_v16  ;;  %5048 = vmatprep.mubr.bf16.mxu0 %v5424_v60  ;;  %v185_v34 = vld [vmem:[%s9385_s0 + $0x3f8] sm:$0xff] }
 0x1ed   :  { %5145 = vmatprep.mubr.bf16.mxu1 %v5426_v27  ;;  %v5458_v25 = vcombine.high %v169_v12, %v185_v34  ;;  %v5457_v55 = vcombine.low %v169_v12, %v185_v34  ;;  %v5487_v12 = vcombine.low %v200_v61, %v216_v47  ;;  %v265_v61 = vld [vmem:[%s9385_s0 + $0x678] sm:$0xff] }
 0x1ee   :  { %v9077_v32 = vadd.f32 %v6380_v7, %v4310_v63  ;;  %v6317_v39 = vpop.f32.mrb[124].mxu0  ;;  %v248_v7 = vld [vmem:[%s9385_s0 + $0x5f0] sm:$0xff] }
 0x1ef   :  { %v6381_v19 = vpop.f32.mrb[124].mxu1  ;;  %v6318_v38 = vpop.f32.mrb[125].mxu0 }
 0x1f0   :  { %v6319_v15 = vadd.f32 %v6318_v38, %v6317_v39  ;;  %v6382_v42 = vpop.f32.mrb[125].mxu1  ;;  %v6320_v44 = vpop.f32.mrb[126].mxu0 }
 0x1f1   :  { %v6383_v53 = vadd.f32 %v6382_v42, %v6381_v19  ;;  %v6384_v30 = vpop.f32.mrb[126].mxu1  ;;  %v6321_v54 = vpop.f32.mrb[127].mxu0 }
 0x1f2   :  { %v4315_v56 = vadd.f32 %v6319_v15, %v8892_v20  ;;  %v6322_v46 = vadd.f32 %v6321_v54, %v6320_v44  ;;  %v6385_v26 = vpop.f32.mrb[127].mxu1  ;;  %v5520_v15 = vcombine.high %v232_v5, %v248_v7 }
 0x1f3   :  { %v6386_v52 = vadd.f32 %v6385_v26, %v6384_v30  ;;  %5049 = vmatmul.mubr.bf16.gmra.mrb[232].mxu0 %v5423_v40  ;;  %v264_v26 = vld [vmem:[%s9385_s0 + $0x670] sm:$0xff] }
 0x1f4   :  { %v9086_v35 = vadd.f32 %v6383_v53, %v4315_v56  ;;  %v4318_v41 = vadd.f32 %v6322_v46, %v8913_v8  ;;  %5146 = vmatmul.mubr.bf16.gmra.mrb[232].mxu1 %v5425_v29  ;;  %5056 = vmatprep.mubr.bf16.mxu0 %v5456_v14  ;;  %v217_v8 = vld [vmem:[%s9385_s0 + $0x4f8] sm:$0xff] }
 0x1f5   :  { %5153 = vmatprep.mubr.bf16.mxu1 %v5458_v25  ;;  %v5490_v60 = vcombine.high %v201_v2, %v217_v8  ;;  %v5489_v40 = vcombine.low %v201_v2, %v217_v8  ;;  %v5519_v2 = vcombine.low %v232_v5, %v248_v7  ;;  %v297_v5 = vld [vmem:[%s9385_s0 + $0x778] sm:$0xff] }
 0x1f6   :  { %v9095_v20 = vadd.f32 %v6386_v52, %v4318_v41  ;;  %v6403_v1 = vpop.f32.mrb[128].mxu0  ;;  %v280_v52 = vld [vmem:[%s9385_s0 + $0x6f0] sm:$0xff] }
 0x1f7   :  { %v6467_v50 = vpop.f32.mrb[128].mxu1  ;;  %v6404_v10 = vpop.f32.mrb[129].mxu0 }
 0x1f8   :  { %v6405_v23 = vadd.f32 %v6404_v10, %v6403_v1  ;;  %v6468_v13 = vpop.f32.mrb[129].mxu1  ;;  %v6406_v48 = vpop.f32.mrb[130].mxu0 }
 0x1f9   :  { %v6469_v58 = vadd.f32 %v6468_v13, %v6467_v50  ;;  %v6470_v9 = vpop.f32.mrb[130].mxu1  ;;  %v6407_v16 = vpop.f32.mrb[131].mxu0 }
 0x1fa   :  { %v4453_v18 = vadd.f32 %v6405_v23, %v8950_v0  ;;  %v6408_v57 = vadd.f32 %v6407_v16, %v6406_v48  ;;  %v6471_v21 = vpop.f32.mrb[131].mxu1  ;;  %v5552_v23 = vcombine.high %v264_v26, %v280_v52 }
 0x1fb   :  { %v6472_v27 = vadd.f32 %v6471_v21, %v6470_v9  ;;  %5057 = vmatmul.mubr.bf16.gmra.mrb[236].mxu0 %v5455_v11  ;;  %v296_v21 = vld [vmem:[%s9385_s0 + $0x770] sm:$0xff] }
 0x1fc   :  { %v9104_v4 = vadd.f32 %v6469_v58, %v4453_v18  ;;  %v4456_v59 = vadd.f32 %v6408_v57, %v8962_v51  ;;  %5154 = vmatmul.mubr.bf16.gmra.mrb[236].mxu1 %v5457_v55  ;;  %5064 = vmatprep.mubr.bf16.mxu0 %v5488_v24  ;;  %v249_v51 = vld [vmem:[%s9385_s0 + $0x5f8] sm:$0xff] }
 0x1fd   :  { %5161 = vmatprep.mubr.bf16.mxu1 %v5490_v60  ;;  %v5522_v14 = vcombine.high %v233_v33, %v249_v51  ;;  %v5521_v11 = vcombine.low %v233_v33, %v249_v51  ;;  %v5551_v33 = vcombine.low %v264_v26, %v280_v52 }
 0x1fe   :  { %v9113_v0 = vadd.f32 %v6472_v27, %v4456_v59  ;;  %v6409_v63 = vpop.f32.mrb[132].mxu0  ;;  %v312_v27 = vld [vmem:[%s9385_s0 + $0x7f0] sm:$0xff] }
 0x1ff   :  { %v6473_v31 = vpop.f32.mrb[132].mxu1  ;;  %v6410_v39 = vpop.f32.mrb[133].mxu0  ;;  %v5583_v52 = vcombine.low %v296_v21, %v312_v27 }
 0x200   :  { %v6411_v34 = vadd.f32 %v6410_v39, %v6409_v63  ;;  %v6474_v19 = vpop.f32.mrb[133].mxu1  ;;  %v6412_v38 = vpop.f32.mrb[134].mxu0 }
 0x201   :  { %v6475_v42 = vadd.f32 %v6474_v19, %v6473_v31  ;;  %v6476_v44 = vpop.f32.mrb[134].mxu1  ;;  %v6413_v29 = vpop.f32.mrb[135].mxu0 }
 0x202   :  { %v4461_v53 = vadd.f32 %v6411_v34, %v8978_v49  ;;  %v6414_v30 = vadd.f32 %v6413_v29, %v6412_v38  ;;  %v6477_v54 = vpop.f32.mrb[135].mxu1  ;;  %v5584_v34 = vcombine.high %v296_v21, %v312_v27 }
 0x203   :  { %v6478_v25 = vadd.f32 %v6477_v54, %v6476_v44  ;;  %5065 = vmatmul.mubr.bf16.gmra.mrb[240].mxu0 %v5487_v12 }
 0x204   :  { %v9122_v56 = vadd.f32 %v6475_v42, %v4461_v53  ;;  %v4464_v46 = vadd.f32 %v6414_v30, %v8987_v6  ;;  %5162 = vmatmul.mubr.bf16.gmra.mrb[240].mxu1 %v5489_v40  ;;  %5072 = vmatprep.mubr.bf16.mxu0 %v5520_v15  ;;  %v281_v6 = vld [vmem:[%s9385_s0 + $0x6f8] sm:$0xff] }
 0x205   :  { %5169 = vmatprep.mubr.bf16.mxu1 %v5522_v14  ;;  %v5554_v24 = vcombine.high %v265_v61, %v281_v6  ;;  %v5553_v12 = vcombine.low %v265_v61, %v281_v6 }
 0x206   :  { %v9131_v49 = vadd.f32 %v6478_v25, %v4464_v46  ;;  %v6415_v41 = vpop.f32.mrb[136].mxu0 }
 0x207   :  { %v6479_v47 = vpop.f32.mrb[136].mxu1  ;;  %v6416_v1 = vpop.f32.mrb[137].mxu0 }
 0x208   :  { %v6417_v8 = vadd.f32 %v6416_v1, %v6415_v41  ;;  %v6480_v50 = vpop.f32.mrb[137].mxu1  ;;  %v6418_v10 = vpop.f32.mrb[138].mxu0 }
 0x209   :  { %v6481_v13 = vadd.f32 %v6480_v50, %v6479_v47  ;;  %v6482_v48 = vpop.f32.mrb[138].mxu1  ;;  %v6419_v55 = vpop.f32.mrb[139].mxu0 }
 0x20a   :  { %v4469_v58 = vadd.f32 %v6417_v8, %v8996_v37  ;;  %v6420_v9 = vadd.f32 %v6419_v55, %v6418_v10  ;;  %v6483_v16 = vpop.f32.mrb[139].mxu1 }
 0x20b   :  { %v6484_v60 = vadd.f32 %v6483_v16, %v6482_v48  ;;  %5073 = vmatmul.mubr.bf16.gmra.mrb[244].mxu0 %v5519_v2 }
 0x20c   :  { %v9140_v18 = vadd.f32 %v6481_v13, %v4469_v58  ;;  %v4472_v57 = vadd.f32 %v6420_v9, %v9005_v17  ;;  %5170 = vmatmul.mubr.bf16.gmra.mrb[244].mxu1 %v5521_v11  ;;  %5080 = vmatprep.mubr.bf16.mxu0 %v5552_v23  ;;  %v313_v17 = vld [vmem:[%s9385_s0 + $0x7f8] sm:$0xff] }
 0x20d   :  { %5177 = vmatprep.mubr.bf16.mxu1 %v5554_v24  ;;  %v5586_v15 = vcombine.high %v297_v5, %v313_v17  ;;  %v5585_v6 = vcombine.low %v297_v5, %v313_v17 }
 0x20e   :  { %v9149_v37 = vadd.f32 %v6484_v60, %v4472_v57  ;;  %v6421_v59 = vpop.f32.mrb[140].mxu0 }
 0x20f   :  { %v6485_v7 = vpop.f32.mrb[140].mxu1  ;;  %v6422_v63 = vpop.f32.mrb[141].mxu0 }
 0x210   :  { %v6423_v51 = vadd.f32 %v6422_v63, %v6421_v59  ;;  %v6486_v31 = vpop.f32.mrb[141].mxu1  ;;  %v6424_v39 = vpop.f32.mrb[142].mxu0 }
 0x211   :  { %v6487_v19 = vadd.f32 %v6486_v31, %v6485_v7  ;;  %v6488_v38 = vpop.f32.mrb[142].mxu1  ;;  %v6425_v40 = vpop.f32.mrb[143].mxu0 }
 0x212   :  { %v4477_v42 = vadd.f32 %v6423_v51, %v9014_v3  ;;  %v6426_v44 = vadd.f32 %v6425_v40, %v6424_v39  ;;  %v6489_v29 = vpop.f32.mrb[143].mxu1 }
 0x213   :  { %v6490_v14 = vadd.f32 %v6489_v29, %v6488_v38  ;;  %5081 = vmatmul.mubr.bf16.gmra.mrb[248].mxu0 %v5551_v33 }
 0x214   :  { %v9158_v53 = vadd.f32 %v6487_v19, %v4477_v42  ;;  %v4480_v30 = vadd.f32 %v6426_v44, %v9023_v43  ;;  %5178 = vmatmul.mubr.bf16.gmra.mrb[248].mxu1 %v5553_v12  ;;  %5088 = vmatprep.mubr.bf16.mxu0 %v5584_v34 }
 0x215   :  { %5185 = vmatprep.mubr.bf16.mxu1 %v5586_v15 }
 0x216   :  { %v9161_v54 = vadd.f32 %v6490_v14, %v4480_v30  ;;  %v6427_v25 = vpop.f32.mrb[144].mxu0 }
 0x217   :  { %v6491_v46 = vpop.f32.mrb[144].mxu1  ;;  %v6428_v26 = vpop.f32.mrb[145].mxu0 }
 0x218   :  { %v6429_v41 = vadd.f32 %v6428_v26, %v6427_v25  ;;  %v6492_v61 = vpop.f32.mrb[145].mxu1  ;;  %v6430_v3 = vpop.f32.mrb[146].mxu0 }
 0x219   :  { %v6493_v47 = vadd.f32 %v6492_v61, %v6491_v46  ;;  %v6494_v1 = vpop.f32.mrb[146].mxu1  ;;  %v6431_v2 = vpop.f32.mrb[147].mxu0 }
 0x21a   :  { %v4485_v8 = vadd.f32 %v6429_v41, %v9032_v36  ;;  %v6432_v50 = vadd.f32 %v6431_v2, %v6430_v3  ;;  %v6495_v43 = vpop.f32.mrb[147].mxu1 }
 0x21b   :  { %v6496_v10 = vadd.f32 %v6495_v43, %v6494_v1  ;;  %5089 = vmatmul.mubr.bf16.gmra.mrb[252].mxu0 %v5583_v52 }
 0x21c   :  { %v9164_v11 = vadd.f32 %v6493_v47, %v4485_v8  ;;  %v4488_v23 = vadd.f32 %v6432_v50, %v9041_v22  ;;  %5186 = vmatmul.mubr.bf16.gmra.mrb[252].mxu1 %v5585_v6 }
 0x21e   :  { %v9167_v13 = vadd.f32 %v6496_v10, %v4488_v23  ;;  %v6433_v48 = vpop.f32.mrb[148].mxu0 }
 0x21f   :  { %v6497_v55 = vpop.f32.mrb[148].mxu1  ;;  %v6434_v24 = vpop.f32.mrb[149].mxu0 }
 0x220   :  { %v6435_v58 = vadd.f32 %v6434_v24, %v6433_v48  ;;  %v6498_v9 = vpop.f32.mrb[149].mxu1  ;;  %v6436_v16 = vpop.f32.mrb[150].mxu0 }
 0x221   :  { %v6499_v60 = vadd.f32 %v6498_v9, %v6497_v55  ;;  %v6500_v57 = vpop.f32.mrb[150].mxu1  ;;  %v6437_v36 = vpop.f32.mrb[151].mxu0 }
 0x222   :  { %v4493_v21 = vadd.f32 %v6435_v58, %v9050_v62  ;;  %v6438_v27 = vadd.f32 %v6437_v36, %v6436_v16  ;;  %v6501_v59 = vpop.f32.mrb[151].mxu1 }
 0x223   :  { %v6502_v5 = vadd.f32 %v6501_v59, %v6500_v57 }
 0x224   :  { %v9170_v17 = vadd.f32 %v6499_v60, %v4493_v21  ;;  %v4496_v22 = vadd.f32 %v6438_v27, %v9059_v45 }
 0x226   :  { %v9173_v7 = vadd.f32 %v6502_v5, %v4496_v22  ;;  %v6439_v63 = vpop.f32.mrb[152].mxu0 }
 0x227   :  { %v6503_v33 = vpop.f32.mrb[152].mxu1  ;;  %v6440_v51 = vpop.f32.mrb[153].mxu0 }
 0x228   :  { %v6441_v31 = vadd.f32 %v6440_v51, %v6439_v63  ;;  %v6504_v39 = vpop.f32.mrb[153].mxu1  ;;  %v6442_v12 = vpop.f32.mrb[154].mxu0 }
 0x229   :  { %v6505_v34 = vadd.f32 %v6504_v39, %v6503_v33  ;;  %v6506_v19 = vpop.f32.mrb[154].mxu1  ;;  %v6443_v38 = vpop.f32.mrb[155].mxu0 }
 0x22a   :  { %v4501_v62 = vadd.f32 %v6441_v31, %v9068_v28  ;;  %v6444_v40 = vadd.f32 %v6443_v38, %v6442_v12  ;;  %v6507_v15 = vpop.f32.mrb[155].mxu1 }
 0x22b   :  { %v6508_v42 = vadd.f32 %v6507_v15, %v6506_v19 }
 0x22c   :  { %v9176_v44 = vadd.f32 %v6505_v34, %v4501_v62  ;;  %v4504_v45 = vadd.f32 %v6444_v40, %v9077_v32 }
 0x22e   :  { %v9179_v29 = vadd.f32 %v6508_v42, %v4504_v45  ;;  %v6445_v14 = vpop.f32.mrb[156].mxu0 }
 0x22f   :  { %v6509_v30 = vpop.f32.mrb[156].mxu1  ;;  %v6446_v25 = vpop.f32.mrb[157].mxu0 }
 0x230   :  { %v6447_v46 = vadd.f32 %v6446_v25, %v6445_v14  ;;  %v6510_v26 = vpop.f32.mrb[157].mxu1  ;;  %v6448_v52 = vpop.f32.mrb[158].mxu0 }
 0x231   :  { %v6511_v41 = vadd.f32 %v6510_v26, %v6509_v30  ;;  %v6512_v61 = vpop.f32.mrb[158].mxu1  ;;  %v6449_v3 = vpop.f32.mrb[159].mxu0 }
 0x232   :  { %v4509_v28 = vadd.f32 %v6447_v46, %v9086_v35  ;;  %v6450_v6 = vadd.f32 %v6449_v3, %v6448_v52  ;;  %v6513_v47 = vpop.f32.mrb[159].mxu1 }
 0x233   :  { %v6514_v1 = vadd.f32 %v6513_v47, %v6512_v61 }
 0x234   :  { %v9182_v2 = vadd.f32 %v6511_v41, %v4509_v28  ;;  %v4512_v32 = vadd.f32 %v6450_v6, %v9095_v20 }
 0x236   :  { %v9185_v8 = vadd.f32 %v6514_v1, %v4512_v32  ;;  %v6531_v50 = vpop.f32.mrb[160].mxu0 }
 0x237   :  { %v6595_v43 = vpop.f32.mrb[160].mxu1  ;;  %v6532_v10 = vpop.f32.mrb[161].mxu0 }
 0x238   :  { %v6533_v23 = vadd.f32 %v6532_v10, %v6531_v50  ;;  %v6596_v48 = vpop.f32.mrb[161].mxu1  ;;  %v6534_v55 = vpop.f32.mrb[162].mxu0 }
 0x239   :  { %v6597_v24 = vadd.f32 %v6596_v48, %v6595_v43  ;;  %v6598_v58 = vpop.f32.mrb[162].mxu1  ;;  %v6535_v9 = vpop.f32.mrb[163].mxu0 }
 0x23a   :  { %v4647_v35 = vadd.f32 %v6533_v23, %v9104_v4  ;;  %v6536_v16 = vadd.f32 %v6535_v9, %v6534_v55  ;;  %v6599_v60 = vpop.f32.mrb[163].mxu1 }
 0x23b   :  { %v6600_v57 = vadd.f32 %v6599_v60, %v6598_v58 }
 0x23c   :  { %v9188_v36 = vadd.f32 %v6597_v24, %v4647_v35  ;;  %v4650_v20 = vadd.f32 %v6536_v16, %v9113_v0 }
 0x23e   :  { %v9191_v21 = vadd.f32 %v6600_v57, %v4650_v20  ;;  %v6537_v27 = vpop.f32.mrb[164].mxu0 }
 0x23f   :  { %v6601_v59 = vpop.f32.mrb[164].mxu1  ;;  %v6538_v5 = vpop.f32.mrb[165].mxu0 }
 0x240   :  { %v6539_v22 = vadd.f32 %v6538_v5, %v6537_v27  ;;  %v6602_v63 = vpop.f32.mrb[165].mxu1  ;;  %v6540_v33 = vpop.f32.mrb[166].mxu0 }
 0x241   :  { %v6603_v51 = vadd.f32 %v6602_v63, %v6601_v59  ;;  %v6604_v31 = vpop.f32.mrb[166].mxu1  ;;  %v6541_v39 = vpop.f32.mrb[167].mxu0 }
 0x242   :  { %v4655_v4 = vadd.f32 %v6539_v22, %v9122_v56  ;;  %v6542_v12 = vadd.f32 %v6541_v39, %v6540_v33  ;;  %v6605_v34 = vpop.f32.mrb[167].mxu1 }
 0x243   :  { %v6606_v19 = vadd.f32 %v6605_v34, %v6604_v31 }
 0x244   :  { %v9194_v38 = vadd.f32 %v6603_v51, %v4655_v4  ;;  %v4658_v0 = vadd.f32 %v6542_v12, %v9131_v49 }
 0x246   :  { %v9197_v62 = vadd.f32 %v6606_v19, %v4658_v0  ;;  %v6543_v40 = vpop.f32.mrb[168].mxu0 }
 0x247   :  { %v6607_v15 = vpop.f32.mrb[168].mxu1  ;;  %v6544_v42 = vpop.f32.mrb[169].mxu0 }
 0x248   :  { %v6545_v45 = vadd.f32 %v6544_v42, %v6543_v40  ;;  %v6608_v14 = vpop.f32.mrb[169].mxu1  ;;  %v6546_v30 = vpop.f32.mrb[170].mxu0 }
 0x249   :  { %v6609_v25 = vadd.f32 %v6608_v14, %v6607_v15  ;;  %v6610_v46 = vpop.f32.mrb[170].mxu1  ;;  %v6547_v26 = vpop.f32.mrb[171].mxu0 }
 0x24a   :  { %v4663_v56 = vadd.f32 %v6545_v45, %v9140_v18  ;;  %v6548_v52 = vadd.f32 %v6547_v26, %v6546_v30  ;;  %v6611_v41 = vpop.f32.mrb[171].mxu1 }
 0x24b   :  { %v6612_v61 = vadd.f32 %v6611_v41, %v6610_v46 }
 0x24c   :  { %v9200_v3 = vadd.f32 %v6609_v25, %v4663_v56  ;;  %v4666_v49 = vadd.f32 %v6548_v52, %v9149_v37 }
 0x24e   :  { %v9203_v28 = vadd.f32 %v6612_v61, %v4666_v49  ;;  %v6549_v6 = vpop.f32.mrb[172].mxu0 }
 0x24f   :  { %v6613_v47 = vpop.f32.mrb[172].mxu1  ;;  %v6550_v1 = vpop.f32.mrb[173].mxu0 }
 0x250   :  { %v6551_v32 = vadd.f32 %v6550_v1, %v6549_v6  ;;  %v6614_v50 = vpop.f32.mrb[173].mxu1  ;;  %v6552_v43 = vpop.f32.mrb[174].mxu0 }
 0x251   :  { %v6615_v10 = vadd.f32 %v6614_v50, %v6613_v47  ;;  %v6616_v23 = vpop.f32.mrb[174].mxu1  ;;  %v6553_v48 = vpop.f32.mrb[175].mxu0 }
 0x252   :  { %v4671_v18 = vadd.f32 %v6551_v32, %v9158_v53  ;;  %v6554_v55 = vadd.f32 %v6553_v48, %v6552_v43  ;;  %v6617_v24 = vpop.f32.mrb[175].mxu1 }
 0x253   :  { %v6618_v58 = vadd.f32 %v6617_v24, %v6616_v23 }
 0x254   :  { %v9206_v9 = vadd.f32 %v6615_v10, %v4671_v18  ;;  %v4674_v37 = vadd.f32 %v6554_v55, %v9161_v54 }
 0x256   :  { %v9209_v35 = vadd.f32 %v6618_v58, %v4674_v37  ;;  %v6555_v16 = vpop.f32.mrb[176].mxu0 }
 0x257   :  { %v6619_v60 = vpop.f32.mrb[176].mxu1  ;;  %v6556_v57 = vpop.f32.mrb[177].mxu0 }
 0x258   :  { %v6557_v20 = vadd.f32 %v6556_v57, %v6555_v16  ;;  %v6620_v27 = vpop.f32.mrb[177].mxu1  ;;  %v6558_v59 = vpop.f32.mrb[178].mxu0 }
 0x259   :  { %v6621_v5 = vadd.f32 %v6620_v27, %v6619_v60  ;;  %v6622_v22 = vpop.f32.mrb[178].mxu1  ;;  %v6559_v63 = vpop.f32.mrb[179].mxu0 }
 0x25a   :  { %v4679_v53 = vadd.f32 %v6557_v20, %v9164_v11  ;;  %v6560_v33 = vadd.f32 %v6559_v63, %v6558_v59  ;;  %v6623_v51 = vpop.f32.mrb[179].mxu1 }
 0x25b   :  { %v6624_v31 = vadd.f32 %v6623_v51, %v6622_v22 }
 0x25c   :  { %v9212_v39 = vadd.f32 %v6621_v5, %v4679_v53  ;;  %v4682_v54 = vadd.f32 %v6560_v33, %v9167_v13 }
 0x25e   :  { %v9215_v4 = vadd.f32 %v6624_v31, %v4682_v54  ;;  %v6561_v12 = vpop.f32.mrb[180].mxu0 }
 0x25f   :  { %v6625_v34 = vpop.f32.mrb[180].mxu1  ;;  %v6562_v19 = vpop.f32.mrb[181].mxu0 }
 0x260   :  { %v6563_v0 = vadd.f32 %v6562_v19, %v6561_v12  ;;  %v6626_v40 = vpop.f32.mrb[181].mxu1  ;;  %v6564_v15 = vpop.f32.mrb[182].mxu0 }
 0x261   :  { %v6627_v42 = vadd.f32 %v6626_v40, %v6625_v34  ;;  %v6628_v45 = vpop.f32.mrb[182].mxu1  ;;  %v6565_v14 = vpop.f32.mrb[183].mxu0 }
 0x262   :  { %v4687_v11 = vadd.f32 %v6563_v0, %v9170_v17  ;;  %v6566_v30 = vadd.f32 %v6565_v14, %v6564_v15  ;;  %v6629_v25 = vpop.f32.mrb[183].mxu1 }
 0x263   :  { %v6630_v46 = vadd.f32 %v6629_v25, %v6628_v45 }
 0x264   :  { %v9218_v26 = vadd.f32 %v6627_v42, %v4687_v11  ;;  %v4690_v13 = vadd.f32 %v6566_v30, %v9173_v7 }
 0x266   :  { %v9221_v56 = vadd.f32 %v6630_v46, %v4690_v13  ;;  %v6567_v52 = vpop.f32.mrb[184].mxu0 }
 0x267   :  { %v6631_v41 = vpop.f32.mrb[184].mxu1  ;;  %v6568_v61 = vpop.f32.mrb[185].mxu0 }
 0x268   :  { %v6569_v49 = vadd.f32 %v6568_v61, %v6567_v52  ;;  %v6632_v6 = vpop.f32.mrb[185].mxu1  ;;  %v6570_v47 = vpop.f32.mrb[186].mxu0 }
 0x269   :  { %v6633_v1 = vadd.f32 %v6632_v6, %v6631_v41  ;;  %v6634_v32 = vpop.f32.mrb[186].mxu1  ;;  %v6571_v50 = vpop.f32.mrb[187].mxu0 }
 0x26a   :  { %v4695_v17 = vadd.f32 %v6569_v49, %v9176_v44  ;;  %v6572_v43 = vadd.f32 %v6571_v50, %v6570_v47  ;;  %v6635_v10 = vpop.f32.mrb[187].mxu1 }
 0x26b   :  { %v6636_v23 = vadd.f32 %v6635_v10, %v6634_v32 }
 0x26c   :  { %v9224_v48 = vadd.f32 %v6633_v1, %v4695_v17  ;;  %v4698_v7 = vadd.f32 %v6572_v43, %v9179_v29 }
 0x26e   :  { %v9227_v18 = vadd.f32 %v6636_v23, %v4698_v7  ;;  %v6573_v55 = vpop.f32.mrb[188].mxu0 }
 0x26f   :  { %v6637_v24 = vpop.f32.mrb[188].mxu1  ;;  %v6574_v58 = vpop.f32.mrb[189].mxu0 }
 0x270   :  { %v6575_v37 = vadd.f32 %v6574_v58, %v6573_v55  ;;  %v6638_v16 = vpop.f32.mrb[189].mxu1  ;;  %v6576_v60 = vpop.f32.mrb[190].mxu0 }
 0x271   :  { %v6639_v57 = vadd.f32 %v6638_v16, %v6637_v24  ;;  %v6640_v20 = vpop.f32.mrb[190].mxu1  ;;  %v6577_v27 = vpop.f32.mrb[191].mxu0 }
 0x272   :  { %v4703_v44 = vadd.f32 %v6575_v37, %v9182_v2  ;;  %v6578_v59 = vadd.f32 %v6577_v27, %v6576_v60  ;;  %v6641_v5 = vpop.f32.mrb[191].mxu1 }
 0x273   :  { %v6642_v22 = vadd.f32 %v6641_v5, %v6640_v20 }
 0x274   :  { %v9230_v63 = vadd.f32 %v6639_v57, %v4703_v44  ;;  %v4706_v29 = vadd.f32 %v6578_v59, %v9185_v8 }
 0x276   :  { %v9233_v53 = vadd.f32 %v6642_v22, %v4706_v29  ;;  %v6659_v33 = vpop.f32.mrb[192].mxu0 }
 0x277   :  { %v6723_v51 = vpop.f32.mrb[192].mxu1  ;;  %v6660_v31 = vpop.f32.mrb[193].mxu0 }
 0x278   :  { %v6661_v54 = vadd.f32 %v6660_v31, %v6659_v33  ;;  %v6724_v12 = vpop.f32.mrb[193].mxu1  ;;  %v6662_v34 = vpop.f32.mrb[194].mxu0 }
 0x279   :  { %v6725_v19 = vadd.f32 %v6724_v12, %v6723_v51  ;;  %v6726_v0 = vpop.f32.mrb[194].mxu1  ;;  %v6663_v40 = vpop.f32.mrb[195].mxu0 }
 0x27a   :  { %v4841_v2 = vadd.f32 %v6661_v54, %v9188_v36  ;;  %v6664_v15 = vadd.f32 %v6663_v40, %v6662_v34  ;;  %v6727_v42 = vpop.f32.mrb[195].mxu1 }
 0x27b   :  { %v6728_v45 = vadd.f32 %v6727_v42, %v6726_v0 }
 0x27c   :  { %v9236_v14 = vadd.f32 %v6725_v19, %v4841_v2  ;;  %v4844_v8 = vadd.f32 %v6664_v15, %v9191_v21 }
 0x27e   :  { %v9239_v11 = vadd.f32 %v6728_v45, %v4844_v8  ;;  %v6665_v30 = vpop.f32.mrb[196].mxu0 }
 0x27f   :  { %v6729_v25 = vpop.f32.mrb[196].mxu1  ;;  %v6666_v46 = vpop.f32.mrb[197].mxu0 }
 0x280   :  { %v6667_v13 = vadd.f32 %v6666_v46, %v6665_v30  ;;  %v6730_v52 = vpop.f32.mrb[197].mxu1  ;;  %v6668_v41 = vpop.f32.mrb[198].mxu0 }
 0x281   :  { %v6731_v61 = vadd.f32 %v6730_v52, %v6729_v25  ;;  %v6732_v49 = vpop.f32.mrb[198].mxu1  ;;  %v6669_v6 = vpop.f32.mrb[199].mxu0 }
 0x282   :  { %v4849_v36 = vadd.f32 %v6667_v13, %v9194_v38  ;;  %v6670_v47 = vadd.f32 %v6669_v6, %v6668_v41  ;;  %v6733_v1 = vpop.f32.mrb[199].mxu1 }
 0x283   :  { %v6734_v32 = vadd.f32 %v6733_v1, %v6732_v49 }
 0x284   :  { %v9242_v50 = vadd.f32 %v6731_v61, %v4849_v36  ;;  %v4852_v21 = vadd.f32 %v6670_v47, %v9197_v62 }
 0x286   :  { %v9245_v17 = vadd.f32 %v6734_v32, %v4852_v21  ;;  %v6671_v43 = vpop.f32.mrb[200].mxu0 }
 0x287   :  { %v6735_v10 = vpop.f32.mrb[200].mxu1  ;;  %v6672_v23 = vpop.f32.mrb[201].mxu0 }
 0x288   :  { %v6673_v7 = vadd.f32 %v6672_v23, %v6671_v43  ;;  %v6736_v55 = vpop.f32.mrb[201].mxu1  ;;  %v6674_v24 = vpop.f32.mrb[202].mxu0 }
 0x289   :  { %v6737_v58 = vadd.f32 %v6736_v55, %v6735_v10  ;;  %v6738_v37 = vpop.f32.mrb[202].mxu1  ;;  %v6675_v16 = vpop.f32.mrb[203].mxu0 }
 0x28a   :  { %v4857_v38 = vadd.f32 %v6673_v7, %v9200_v3  ;;  %v6676_v60 = vadd.f32 %v6675_v16, %v6674_v24  ;;  %v6739_v57 = vpop.f32.mrb[203].mxu1 }
 0x28b   :  { %v6740_v20 = vadd.f32 %v6739_v57, %v6738_v37 }
 0x28c   :  { %v9248_v27 = vadd.f32 %v6737_v58, %v4857_v38  ;;  %v4860_v62 = vadd.f32 %v6676_v60, %v9203_v28 }
 0x28e   :  { %v9251_v44 = vadd.f32 %v6740_v20, %v4860_v62  ;;  %v6677_v59 = vpop.f32.mrb[204].mxu0 }
 0x28f   :  { %v6741_v5 = vpop.f32.mrb[204].mxu1  ;;  %v6678_v22 = vpop.f32.mrb[205].mxu0 }
 0x290   :  { %v6679_v29 = vadd.f32 %v6678_v22, %v6677_v59  ;;  %v6742_v33 = vpop.f32.mrb[205].mxu1  ;;  %v6680_v51 = vpop.f32.mrb[206].mxu0 }
 0x291   :  { %v6743_v31 = vadd.f32 %v6742_v33, %v6741_v5  ;;  %v6744_v54 = vpop.f32.mrb[206].mxu1  ;;  %v6681_v12 = vpop.f32.mrb[207].mxu0 }
 0x292   :  { %v4865_v3 = vadd.f32 %v6679_v29, %v9206_v9  ;;  %v6682_v34 = vadd.f32 %v6681_v12, %v6680_v51  ;;  %v6745_v19 = vpop.f32.mrb[207].mxu1 }
 0x293   :  { %v6746_v0 = vadd.f32 %v6745_v19, %v6744_v54 }
 0x294   :  { %v9254_v40 = vadd.f32 %v6743_v31, %v4865_v3  ;;  %v4868_v28 = vadd.f32 %v6682_v34, %v9209_v35 }
 0x296   :  { %v9257_v2 = vadd.f32 %v6746_v0, %v4868_v28  ;;  %v6683_v15 = vpop.f32.mrb[208].mxu0 }
 0x297   :  { %v6747_v42 = vpop.f32.mrb[208].mxu1  ;;  %v6684_v45 = vpop.f32.mrb[209].mxu0 }
 0x298   :  { %v6685_v8 = vadd.f32 %v6684_v45, %v6683_v15  ;;  %v6748_v30 = vpop.f32.mrb[209].mxu1  ;;  %v6686_v25 = vpop.f32.mrb[210].mxu0 }
 0x299   :  { %v6749_v46 = vadd.f32 %v6748_v30, %v6747_v42  ;;  %v6750_v13 = vpop.f32.mrb[210].mxu1  ;;  %v6687_v52 = vpop.f32.mrb[211].mxu0 }
 0x29a   :  { %v4873_v9 = vadd.f32 %v6685_v8, %v9212_v39  ;;  %v6688_v41 = vadd.f32 %v6687_v52, %v6686_v25  ;;  %v6751_v61 = vpop.f32.mrb[211].mxu1 }
 0x29b   :  { %v6752_v49 = vadd.f32 %v6751_v61, %v6750_v13 }
 0x29c   :  { %v9260_v6 = vadd.f32 %v6749_v46, %v4873_v9  ;;  %v4876_v35 = vadd.f32 %v6688_v41, %v9215_v4 }
 0x29e   :  { %v9263_v36 = vadd.f32 %v6752_v49, %v4876_v35  ;;  %v6689_v47 = vpop.f32.mrb[212].mxu0 }
 0x29f   :  { %v6753_v1 = vpop.f32.mrb[212].mxu1  ;;  %v6690_v32 = vpop.f32.mrb[213].mxu0 }
 0x2a0   :  { %v6691_v21 = vadd.f32 %v6690_v32, %v6689_v47  ;;  %v6754_v43 = vpop.f32.mrb[213].mxu1  ;;  %v6692_v10 = vpop.f32.mrb[214].mxu0 }
 0x2a1   :  { %v6755_v23 = vadd.f32 %v6754_v43, %v6753_v1  ;;  %v6756_v7 = vpop.f32.mrb[214].mxu1  ;;  %v6693_v55 = vpop.f32.mrb[215].mxu0 }
 0x2a2   :  { %v4881_v39 = vadd.f32 %v6691_v21, %v9218_v26  ;;  %v6694_v24 = vadd.f32 %v6693_v55, %v6692_v10  ;;  %v6757_v58 = vpop.f32.mrb[215].mxu1 }
 0x2a3   :  { %v6758_v37 = vadd.f32 %v6757_v58, %v6756_v7  ;;  %v9287_v7 = vld [vmem:[%s9386_s2] ss:$0 sm:$0xff] }
 0x2a4   :  { %v9266_v16 = vadd.f32 %v6755_v23, %v4881_v39  ;;  %v4884_v4 = vadd.f32 %v6694_v24, %v9221_v56 }
 0x2a6   :  { %v9269_v38 = vadd.f32 %v6758_v37, %v4884_v4  ;;  %v6695_v60 = vpop.f32.mrb[216].mxu0 }
 0x2a7   :  { %v6759_v57 = vpop.f32.mrb[216].mxu1  ;;  %v6696_v20 = vpop.f32.mrb[217].mxu0 }
 0x2a8   :  { %v6697_v62 = vadd.f32 %v6696_v20, %v6695_v60  ;;  %v6760_v59 = vpop.f32.mrb[217].mxu1  ;;  %v6698_v5 = vpop.f32.mrb[218].mxu0 }
 0x2a9   :  { %v6761_v22 = vadd.f32 %v6760_v59, %v6759_v57  ;;  %v6762_v29 = vpop.f32.mrb[218].mxu1  ;;  %v6699_v33 = vpop.f32.mrb[219].mxu0 }
 0x2aa   :  { %v4889_v26 = vadd.f32 %v6697_v62, %v9224_v48  ;;  %v6700_v51 = vadd.f32 %v6699_v33, %v6698_v5  ;;  %v6763_v31 = vpop.f32.mrb[219].mxu1 }
 0x2ab   :  { %v6764_v54 = vadd.f32 %v6763_v31, %v6762_v29 }
 0x2ac   :  { %v9272_v12 = vadd.f32 %v6761_v22, %v4889_v26  ;;  %v4892_v56 = vadd.f32 %v6700_v51, %v9227_v18 }
 0x2ae   :  { %v9275_v3 = vadd.f32 %v6764_v54, %v4892_v56  ;;  %v6701_v34 = vpop.f32.mrb[220].mxu0 }
 0x2af   :  { %v6765_v19 = vpop.f32.mrb[220].mxu1  ;;  %v6702_v0 = vpop.f32.mrb[221].mxu0 }
 0x2b0   :  { %v6703_v28 = vadd.f32 %v6702_v0, %v6701_v34  ;;  %v6766_v15 = vpop.f32.mrb[221].mxu1  ;;  %v6704_v42 = vpop.f32.mrb[222].mxu0 }
 0x2b1   :  { %v6767_v45 = vadd.f32 %v6766_v15, %v6765_v19  ;;  %v6768_v8 = vpop.f32.mrb[222].mxu1  ;;  %v6705_v30 = vpop.f32.mrb[223].mxu0 }
 0x2b2   :  { %v4897_v48 = vadd.f32 %v6703_v28, %v9230_v63  ;;  %v6706_v25 = vadd.f32 %v6705_v30, %v6704_v42  ;;  %v6769_v46 = vpop.f32.mrb[223].mxu1 }
 0x2b3   :  { %v6770_v13 = vadd.f32 %v6769_v46, %v6768_v8 }
 0x2b4   :  { %v9278_v52 = vadd.f32 %v6767_v45, %v4897_v48  ;;  %v4900_v18 = vadd.f32 %v6706_v25, %v9233_v53 }
 0x2b6   :  { %v9281_v9 = vadd.f32 %v6770_v13, %v4900_v18  ;;  %v6787_v41 = vpop.f32.mrb[224].mxu0 }
 0x2b7   :  { %v6851_v61 = vpop.f32.mrb[224].mxu1  ;;  %v6788_v49 = vpop.f32.mrb[225].mxu0 }
 0x2b8   :  { %v6789_v35 = vadd.f32 %v6788_v49, %v6787_v41  ;;  %v6852_v47 = vpop.f32.mrb[225].mxu1  ;;  %v6790_v1 = vpop.f32.mrb[226].mxu0 }
 0x2b9   :  { %v6853_v32 = vadd.f32 %v6852_v47, %v6851_v61  ;;  %v6854_v21 = vpop.f32.mrb[226].mxu1  ;;  %v6791_v43 = vpop.f32.mrb[227].mxu0 }
 0x2ba   :  { %v5035_v63 = vadd.f32 %v6789_v35, %v9236_v14  ;;  %v6792_v10 = vadd.f32 %v6791_v43, %v6790_v1  ;;  %v6855_v23 = vpop.f32.mrb[227].mxu1 }
 0x2bb   :  { %v6856_v53 = vadd.f32 %v6855_v23, %v6854_v21 }
 0x2bc   :  { %v5132_v55 = vadd.f32 %v6853_v32, %v5035_v63  ;;  %v5038_v39 = vadd.f32 %v6792_v10, %v9239_v11 }
 0x2be   :  { %v5194_v24 = vadd.f32 %v9287_v7, %v5132_v55  ;;  %v5135_v58 = vadd.f32 %v6856_v53, %v5038_v39  ;;  %v6793_v37 = vpop.f32.mrb[228].mxu0 }
 0x2bf   :  { %v6857_v4 = vpop.f32.mrb[228].mxu1  ;;  %v6794_v60 = vpop.f32.mrb[229].mxu0 }
 0x2c0   :  { %v5859_v57 = vpack.c.bf16 %v5194_v24, %v5194_v24  ;;  %v5195_v14 = vadd.f32 %v9287_v7, %v5135_v58  ;;  %v6795_v20 = vadd.f32 %v6794_v60, %v6793_v37  ;;  %v6858_v62 = vpop.f32.mrb[229].mxu1  ;;  %v6796_v59 = vpop.f32.mrb[230].mxu0 }
 0x2c1   :  { %v6859_v5 = vadd.f32 %v6858_v62, %v6857_v4  ;;  %v6860_v22 = vpop.f32.mrb[230].mxu1  ;;  %v6797_v29 = vpop.f32.mrb[231].mxu0 }
 0x2c2   :  { %5310 = vst.msk [vmem:[%s9387_s3] sm:$0xf] %vm5309_vm0, %v5859_v57  ;;  %v5860_v11 = vpack.c.bf16 %v5195_v14, %v5195_v14  ;;  %v5043_v33 = vadd.f32 %v6795_v20, %v9242_v50  ;;  %v6798_v26 = vadd.f32 %v6797_v29, %v6796_v59  ;;  %v6861_v51 = vpop.f32.mrb[231].mxu1 }
 0x2c3   :  { %v6862_v31 = vadd.f32 %v6861_v51, %v6860_v22 }
 0x2c4   :  { %5311 = vst.msk [vmem:[%s9387_s3 + $0x4] sm:$0xf] %vm5309_vm0, %v5860_v11  ;;  %v5140_v54 = vadd.f32 %v6859_v5, %v5043_v33  ;;  %v5046_v56 = vadd.f32 %v6798_v26, %v9245_v17 }
 0x2c6   :  { %v5196_v34 = vadd.f32 %v9287_v7, %v5140_v54  ;;  %v5143_v19 = vadd.f32 %v6862_v31, %v5046_v56  ;;  %v6799_v0 = vpop.f32.mrb[232].mxu0 }
 0x2c7   :  { %v6863_v28 = vpop.f32.mrb[232].mxu1  ;;  %v6800_v15 = vpop.f32.mrb[233].mxu0 }
 0x2c8   :  { %v5861_v42 = vpack.c.bf16 %v5196_v34, %v5196_v34  ;;  %v5197_v50 = vadd.f32 %v9287_v7, %v5143_v19  ;;  %v6801_v45 = vadd.f32 %v6800_v15, %v6799_v0  ;;  %v6864_v8 = vpop.f32.mrb[233].mxu1  ;;  %v6802_v30 = vpop.f32.mrb[234].mxu0 }
 0x2c9   :  { %v6865_v48 = vadd.f32 %v6864_v8, %v6863_v28  ;;  %v6866_v25 = vpop.f32.mrb[234].mxu1  ;;  %v6803_v46 = vpop.f32.mrb[235].mxu0 }
 0x2ca   :  { %5312 = vst.msk [vmem:[%s9387_s3 + $0x8] sm:$0xf] %vm5309_vm0, %v5861_v42  ;;  %v5862_v17 = vpack.c.bf16 %v5197_v50, %v5197_v50  ;;  %v5051_v13 = vadd.f32 %v6801_v45, %v9248_v27  ;;  %v6804_v18 = vadd.f32 %v6803_v46, %v6802_v30  ;;  %v6867_v41 = vpop.f32.mrb[235].mxu1 }
 0x2cb   :  { %v6868_v61 = vadd.f32 %v6867_v41, %v6866_v25 }
 0x2cc   :  { %5313 = vst.msk [vmem:[%s9387_s3 + $0xc] sm:$0xf] %vm5309_vm0, %v5862_v17  ;;  %v5148_v49 = vadd.f32 %v6865_v48, %v5051_v13  ;;  %v5054_v35 = vadd.f32 %v6804_v18, %v9251_v44 }
 0x2ce   :  { %v5198_v47 = vadd.f32 %v9287_v7, %v5148_v49  ;;  %v5151_v1 = vadd.f32 %v6868_v61, %v5054_v35  ;;  %v6805_v32 = vpop.f32.mrb[236].mxu0 }
 0x2cf   :  { %v6869_v21 = vpop.f32.mrb[236].mxu1  ;;  %v6806_v43 = vpop.f32.mrb[237].mxu0 }
 0x2d0   :  { %v5863_v63 = vpack.c.bf16 %v5198_v47, %v5198_v47  ;;  %v5199_v27 = vadd.f32 %v9287_v7, %v5151_v1  ;;  %v6807_v10 = vadd.f32 %v6806_v43, %v6805_v32  ;;  %v6870_v23 = vpop.f32.mrb[237].mxu1  ;;  %v6808_v53 = vpop.f32.mrb[238].mxu0 }
 0x2d1   :  { %v6871_v55 = vadd.f32 %v6870_v23, %v6869_v21  ;;  %v6872_v39 = vpop.f32.mrb[238].mxu1  ;;  %v6809_v24 = vpop.f32.mrb[239].mxu0 }
 0x2d2   :  { %5314 = vst.msk [vmem:[%s9387_s3 + $0x10] sm:$0xf] %vm5309_vm0, %v5863_v63  ;;  %v5864_v44 = vpack.c.bf16 %v5199_v27, %v5199_v27  ;;  %v5059_v58 = vadd.f32 %v6807_v10, %v9254_v40  ;;  %v6810_v37 = vadd.f32 %v6809_v24, %v6808_v53  ;;  %v6873_v4 = vpop.f32.mrb[239].mxu1 }
 0x2d3   :  { %v6874_v60 = vadd.f32 %v6873_v4, %v6872_v39 }
 0x2d4   :  { %5315 = vst.msk [vmem:[%s9387_s3 + $0x14] sm:$0xf] %vm5309_vm0, %v5864_v44  ;;  %v5156_v57 = vadd.f32 %v6871_v55, %v5059_v58  ;;  %v5062_v14 = vadd.f32 %v6810_v37, %v9257_v2 }
 0x2d6   :  { %v5200_v20 = vadd.f32 %v9287_v7, %v5156_v57  ;;  %v5159_v62 = vadd.f32 %v6874_v60, %v5062_v14  ;;  %v6811_v59 = vpop.f32.mrb[240].mxu0 }
 0x2d7   :  { %v6875_v5 = vpop.f32.mrb[240].mxu1  ;;  %v6812_v22 = vpop.f32.mrb[241].mxu0 }
 0x2d8   :  { %v5865_v29 = vpack.c.bf16 %v5200_v20, %v5200_v20  ;;  %v5201_v40 = vadd.f32 %v9287_v7, %v5159_v62  ;;  %v6813_v11 = vadd.f32 %v6812_v22, %v6811_v59  ;;  %v6876_v33 = vpop.f32.mrb[241].mxu1  ;;  %v6814_v26 = vpop.f32.mrb[242].mxu0 }
 0x2d9   :  { %v6877_v51 = vadd.f32 %v6876_v33, %v6875_v5  ;;  %v6878_v31 = vpop.f32.mrb[242].mxu1  ;;  %v6815_v54 = vpop.f32.mrb[243].mxu0 }
 0x2da   :  { %5316 = vst.msk [vmem:[%s9387_s3 + $0x18] sm:$0xf] %vm5309_vm0, %v5865_v29  ;;  %v5866_v2 = vpack.c.bf16 %v5201_v40, %v5201_v40  ;;  %v5067_v56 = vadd.f32 %v6813_v11, %v9260_v6  ;;  %v6816_v34 = vadd.f32 %v6815_v54, %v6814_v26  ;;  %v6879_v19 = vpop.f32.mrb[243].mxu1 }
 0x2db   :  { %v6880_v0 = vadd.f32 %v6879_v19, %v6878_v31 }
 0x2dc   :  { %5317 = vst.msk [vmem:[%s9387_s3 + $0x1c] sm:$0xf] %vm5309_vm0, %v5866_v2  ;;  %v5164_v28 = vadd.f32 %v6877_v51, %v5067_v56  ;;  %v5070_v15 = vadd.f32 %v6816_v34, %v9263_v36 }
 0x2de   :  { %v5202_v42 = vadd.f32 %v9287_v7, %v5164_v28  ;;  %v5167_v50 = vadd.f32 %v6880_v0, %v5070_v15  ;;  %v6817_v45 = vpop.f32.mrb[244].mxu0 }
 0x2df   :  { %v6881_v8 = vpop.f32.mrb[244].mxu1  ;;  %v6818_v30 = vpop.f32.mrb[245].mxu0 }
 0x2e0   :  { %v5867_v48 = vpack.c.bf16 %v5202_v42, %v5202_v42  ;;  %v5203_v6 = vadd.f32 %v9287_v7, %v5167_v50  ;;  %v6819_v25 = vadd.f32 %v6818_v30, %v6817_v45  ;;  %v6882_v46 = vpop.f32.mrb[245].mxu1  ;;  %v6820_v17 = vpop.f32.mrb[246].mxu0 }
 0x2e1   :  { %v6883_v13 = vadd.f32 %v6882_v46, %v6881_v8  ;;  %v6884_v18 = vpop.f32.mrb[246].mxu1  ;;  %v6821_v41 = vpop.f32.mrb[247].mxu0 }
 0x2e2   :  { %5318 = vst.msk [vmem:[%s9387_s3 + $0x20] sm:$0xf] %vm5309_vm0, %v5867_v48  ;;  %v5868_v36 = vpack.c.bf16 %v5203_v6, %v5203_v6  ;;  %v5075_v61 = vadd.f32 %v6819_v25, %v9266_v16  ;;  %v6822_v49 = vadd.f32 %v6821_v41, %v6820_v17  ;;  %v6885_v35 = vpop.f32.mrb[247].mxu1 }
 0x2e3   :  { %v6886_v47 = vadd.f32 %v6885_v35, %v6884_v18 }
 0x2e4   :  { %5319 = vst.msk [vmem:[%s9387_s3 + $0x24] sm:$0xf] %vm5309_vm0, %v5868_v36  ;;  %v5172_v1 = vadd.f32 %v6883_v13, %v5075_v61  ;;  %v5078_v32 = vadd.f32 %v6822_v49, %v9269_v38 }
 0x2e6   :  { %v5204_v21 = vadd.f32 %v9287_v7, %v5172_v1  ;;  %v5175_v43 = vadd.f32 %v6886_v47, %v5078_v32  ;;  %v6823_v63 = vpop.f32.mrb[248].mxu0 }
 0x2e7   :  { %v6887_v27 = vpop.f32.mrb[248].mxu1  ;;  %v6824_v10 = vpop.f32.mrb[249].mxu0 }
 0x2e8   :  { %v5869_v23 = vpack.c.bf16 %v5204_v21, %v5204_v21  ;;  %v5205_v16 = vadd.f32 %v9287_v7, %v5175_v43  ;;  %v6825_v53 = vadd.f32 %v6824_v10, %v6823_v63  ;;  %v6888_v55 = vpop.f32.mrb[249].mxu1  ;;  %v6826_v39 = vpop.f32.mrb[250].mxu0 }
 0x2e9   :  { %v6889_v24 = vadd.f32 %v6888_v55, %v6887_v27  ;;  %v6890_v44 = vpop.f32.mrb[250].mxu1  ;;  %v6827_v58 = vpop.f32.mrb[251].mxu0 }
 0x2ea   :  { %5320 = vst.msk [vmem:[%s9387_s3 + $0x28] sm:$0xf] %vm5309_vm0, %v5869_v23  ;;  %v5870_v38 = vpack.c.bf16 %v5205_v16, %v5205_v16  ;;  %v5083_v37 = vadd.f32 %v6825_v53, %v9272_v12  ;;  %v6828_v4 = vadd.f32 %v6827_v58, %v6826_v39  ;;  %v6891_v60 = vpop.f32.mrb[251].mxu1 }
 0x2eb   :  { %v6892_v57 = vadd.f32 %v6891_v60, %v6890_v44 }
 0x2ec   :  { %5321 = vst.msk [vmem:[%s9387_s3 + $0x2c] sm:$0xf] %vm5309_vm0, %v5870_v38  ;;  %v5180_v14 = vadd.f32 %v6889_v24, %v5083_v37  ;;  %v5086_v20 = vadd.f32 %v6828_v4, %v9275_v3 }
 0x2ee   :  { %v5206_v62 = vadd.f32 %v9287_v7, %v5180_v14  ;;  %v5183_v59 = vadd.f32 %v6892_v57, %v5086_v20  ;;  %v6829_v5 = vpop.f32.mrb[252].mxu0 }
 0x2ef   :  { %v6893_v22 = vpop.f32.mrb[252].mxu1  ;;  %v6830_v29 = vpop.f32.mrb[253].mxu0 }
 0x2f0   :  { %v5871_v40 = vpack.c.bf16 %v5206_v62, %v5206_v62  ;;  %v5207_v12 = vadd.f32 %v9287_v7, %v5183_v59  ;;  %v6831_v11 = vadd.f32 %v6830_v29, %v6829_v5  ;;  %v6894_v33 = vpop.f32.mrb[253].mxu1  ;;  %v6832_v26 = vpop.f32.mrb[254].mxu0 }
 0x2f1   :  { %v6895_v51 = vadd.f32 %v6894_v33, %v6893_v22  ;;  %v6896_v31 = vpop.f32.mrb[254].mxu1  ;;  %v6833_v54 = vpop.f32.mrb[255].mxu0 }
 0x2f2   :  { %5322 = vst.msk [vmem:[%s9387_s3 + $0x30] sm:$0xf] %vm5309_vm0, %v5871_v40  ;;  %v5872_v3 = vpack.c.bf16 %v5207_v12, %v5207_v12  ;;  %v5091_v2 = vadd.f32 %v6831_v11, %v9278_v52  ;;  %v6834_v56 = vadd.f32 %v6833_v54, %v6832_v26  ;;  %v6897_v34 = vpop.f32.mrb[255].mxu1 }
 0x2f3   :  { %v6898_v19 = vadd.f32 %v6897_v34, %v6896_v31 }
 0x2f4   :  { %5323 = vst.msk [vmem:[%s9387_s3 + $0x34] sm:$0xf] %vm5309_vm0, %v5872_v3  ;;  %v5188_v0 = vadd.f32 %v6895_v51, %v5091_v2  ;;  %v5094_v28 = vadd.f32 %v6834_v56, %v9281_v9 }
 0x2f6   :  { %v5208_v15 = vadd.f32 %v9287_v7, %v5188_v0  ;;  %v5191_v42 = vadd.f32 %v6898_v19, %v5094_v28 }
 0x2f8   :  { %v5873_v50 = vpack.c.bf16 %v5208_v15, %v5208_v15  ;;  %v5209_v45 = vadd.f32 %v9287_v7, %v5191_v42 }
 0x2fa   :  { %5324 = vst.msk [vmem:[%s9387_s3 + $0x38] sm:$0xf] %vm5309_vm0, %v5873_v50  ;;  %v5874_v52 = vpack.c.bf16 %v5209_v45, %v5209_v45 }
 0x2fc   :  { %5325 = vst.msk [vmem:[%s9387_s3 + $0x3c] sm:$0xf] %vm5309_vm0, %v5874_v52 }

</bundles_post_ra>
